<compile_context>
chip_gen: v6e
topology: v6e:2x2x1
jax: 0.10.0
libtpu: 0.0.40
codegen_flags: <defaults>
</compile_context>

<pallas_src>
import functools

import jax
import jax.numpy as jnp
from jax.experimental import pallas as pl
from jax.experimental.pallas import tpu as pltpu

_TAPS = tuple((dy, dx) for dy in range(3) for dx in range(3))


def _conv3x3_im2col(src_ref, patches_ref, w_ref, b_ref, H, W, C):
    """3x3 'same' conv over a padded (H+2, W+2, C) VMEM ref via one im2col matmul.

    Builds the (H*W, 9*C) patch slab once in VMEM, then does a single MXU matmul
    (bf16 operands, f32 accumulation). Returns (H*W, C) f32 with bias added.
    """
    for t, (dy, dx) in enumerate(_TAPS):
        patch = src_ref[dy:dy + H, dx:dx + W, :].reshape(H * W, C)
        patches_ref[:, t * C:(t + 1) * C] = patch
    acc = jnp.dot(patches_ref[...].astype(jnp.bfloat16), w_ref[...],
                  preferred_element_type=jnp.float32)
    return acc + b_ref[...]          # (H*W, C) + (1, C) broadcast, f32


def residual_block_kernel(x_ref, w1_ref, b1_ref, w2_ref, b2_ref, out_ref,
                          xpad_ref, h1pad_ref, patches_ref, *, H, W, C,
                          res_scale):
    # Zero the halo borders once; only the interiors are rewritten per image.
    @pl.when(pl.program_id(0) == 0)
    def _init():
        xpad_ref[...] = jnp.zeros_like(xpad_ref)
        h1pad_ref[...] = jnp.zeros_like(h1pad_ref)

    # conv1 + bias + ReLU (padding done in VMEM).
    xpad_ref[1:H + 1, 1:W + 1, :] = x_ref[0].astype(jnp.float32)
    h1 = _conv3x3_im2col(xpad_ref, patches_ref, w1_ref, b1_ref, H, W, C)
    h1 = jnp.maximum(h1, 0.0)                                  # (H*W, C) f32

    # conv2 + bias + scaled residual add; h1 stays entirely in VMEM.
    h1pad_ref[1:H + 1, 1:W + 1, :] = h1.reshape(H, W, C)
    h2 = _conv3x3_im2col(h1pad_ref, patches_ref, w2_ref, b2_ref, H, W, C)

    identity = x_ref[0].astype(jnp.float32).reshape(H * W, C)
    out = identity + res_scale * h2
    out_ref[0] = out.reshape(H, W, C).astype(out_ref.dtype)


def residual_block_no_bn(x_nchw, w1_oihw, b1, w2_oihw, b2, res_scale=1.0):
    """Pallas implementation of ResidualBlockNoBN.forward (NCHW in / NCHW out)."""
    N, C, H, W = x_nchw.shape
    dtype = x_nchw.dtype

    # NCHW -> NHWC; OIHW -> HWIO -> im2col-ready (9*Cin, Cout) bf16 slabs; f32 biases.
    x = jnp.transpose(x_nchw, (0, 2, 3, 1))
    w1 = jnp.transpose(w1_oihw, (2, 3, 1, 0)).reshape(9 * C, C).astype(jnp.bfloat16)
    w2 = jnp.transpose(w2_oihw, (2, 3, 1, 0)).reshape(9 * C, C).astype(jnp.bfloat16)
    b1r = b1.reshape(1, C).astype(jnp.float32)
    b2r = b2.reshape(1, C).astype(jnp.float32)

    kernel = functools.partial(residual_block_kernel, H=H, W=W, C=C,
                               res_scale=float(res_scale))

    out = pl.pallas_call(
        kernel,
        out_shape=jax.ShapeDtypeStruct((N, H, W, C), dtype),
        grid=(N,),
        in_specs=[
            pl.BlockSpec((1, H, W, C), lambda n: (n, 0, 0, 0)),   # x
            pl.BlockSpec((9 * C, C), lambda n: (0, 0)),           # w1 (resident)
            pl.BlockSpec((1, C), lambda n: (0, 0)),               # b1
            pl.BlockSpec((9 * C, C), lambda n: (0, 0)),           # w2 (resident)
            pl.BlockSpec((1, C), lambda n: (0, 0)),               # b2
        ],
        out_specs=pl.BlockSpec((1, H, W, C), lambda n: (n, 0, 0, 0)),
        scratch_shapes=[
            pltpu.VMEM((H + 2, W + 2, C), jnp.float32),   # padded input (halo in VMEM)
            pltpu.VMEM((H + 2, W + 2, C), jnp.float32),   # padded h1 (never hits HBM)
            pltpu.VMEM((H * W, 9 * C), jnp.float32),      # shared im2col slab
        ],
        compiler_params=pltpu.CompilerParams(
            dimension_semantics=("parallel",),
            vmem_limit_bytes=64 * 1024 * 1024,
        ),
    )(x, w1, b1r, w2, b2r)

    # NHWC -> NCHW
    return jnp.transpose(out, (0, 3, 1, 2))


def _reference(x, w1, b1, w2, b2, res_scale):
    """Pure-JAX NCHW reference (f32 everywhere) for verification."""
    dn = jax.lax.conv_dimension_numbers(x.shape, w1.shape, ("NCHW", "OIHW", "NCHW"))

    def conv(inp, w, b):
        y = jax.lax.conv_general_dilated(inp, w, (1, 1), ((1, 1), (1, 1)),
                                         dimension_numbers=dn)
        return y + b[None, :, None, None]

    h = jnp.maximum(conv(x, w1, b1), 0.0)
    return x + res_scale * conv(h, w2, b2)


if __name__ == "__main__":
    key = jax.random.PRNGKey(0)
    N, C, H, W = 2, 4, 16, 16
    res_scale = 1.0

    k_x, k_w1, k_w2 = jax.random.split(key, 3)

    # Deterministic init mirroring default_init_weights(scale=0.1):
    # kaiming_normal_ (fan_in = C*3*3, gain = sqrt(2)) scaled by 0.1, bias = 0.
    fan_in = C * 3 * 3
    std = (2.0 / fan_in) ** 0.5
    w1 = jax.random.normal(k_w1, (C, C, 3, 3), jnp.float32) * std * 0.1
    w2 = jax.random.normal(k_w2, (C, C, 3, 3), jnp.float32) * std * 0.1
    b1 = jnp.zeros((C,), jnp.float32)
    b2 = jnp.zeros((C,), jnp.float32)

    x = jax.random.normal(k_x, (N, C, H, W), jnp.float32)

    out = residual_block_no_bn(x, w1, b1, w2, b2, res_scale)
    out = jax.block_until_ready(out)

    ref = _reference(x, w1, b1, w2, b2, res_scale)
    assert out.shape == (N, C, H, W)
    # Tolerance loosened slightly vs. pure-f32 because matmul operands are bf16
    # (accumulation and epilogue are f32).
    max_err = jnp.max(jnp.abs(out - ref))
    assert jnp.allclose(out, ref, atol=1e-2, rtol=1e-2), f"max abs err {max_err}"

    print("KERNEL_OK")
</pallas_src>

<mosaic_0001>
module attributes {stable_mosaic.version = 11 : i64} {
  func.func @residual_block_kernel(%arg0: i32, %arg1: memref<1x16x16x4xf32, #tpu.memory_space<vmem>>, %arg2: memref<36x4xbf16, #tpu.memory_space<vmem>>, %arg3: memref<1x4xf32, #tpu.memory_space<vmem>>, %arg4: memref<36x4xbf16, #tpu.memory_space<vmem>>, %arg5: memref<1x4xf32, #tpu.memory_space<vmem>>, %arg6: memref<1x16x16x4xf32, #tpu.memory_space<vmem>>, %arg7: memref<18x18x4xf32, #tpu.memory_space<vmem>>, %arg8: memref<18x18x4xf32, #tpu.memory_space<vmem>>, %arg9: memref<256x36xf32, #tpu.memory_space<vmem>>) attributes {dimension_semantics = [#tpu.dimension_semantics<parallel>], iteration_bounds = array<i64: 2>, scalar_prefetch = 0 : i64, scratch_operands = 3 : i64, tpu.core_type = #tpu.core_type<tc>, window_params = [{transform_indices = @transform_0, window_bounds = array<i64: 1, 16, 16, 4>}, {pipeline_mode = #tpu.pipeline_mode<synchronous>, transform_indices = @transform_1, window_bounds = array<i64: 36, 4>}, {pipeline_mode = #tpu.pipeline_mode<synchronous>, transform_indices = @transform_2, window_bounds = array<i64: 1, 4>}, {pipeline_mode = #tpu.pipeline_mode<synchronous>, transform_indices = @transform_3, window_bounds = array<i64: 36, 4>}, {pipeline_mode = #tpu.pipeline_mode<synchronous>, transform_indices = @transform_4, window_bounds = array<i64: 1, 4>}, {transform_indices = @transform_5, window_bounds = array<i64: 1, 16, 16, 4>}]} {
    %c0_i32 = arith.constant 0 : i32
    %0 = arith.cmpi eq, %arg0, %c0_i32 : i32
    %1 = arith.extui %0 : i1 to i32
    %c0_i32_0 = arith.constant 0 : i32
    %2 = arith.cmpi ne, %1, %c0_i32_0 : i32
    scf.if %2 {
      %cst_113 = arith.constant 0.000000e+00 : f32
      %88 = vector.broadcast %cst_113 : f32 to vector<18x18x4xf32>
      %c0_114 = arith.constant 0 : index
      %c0_115 = arith.constant 0 : index
      %c0_116 = arith.constant 0 : index
      %89 = vector.load %arg7[%c0_114, %c0_115, %c0_116] : memref<18x18x4xf32, #tpu.memory_space<vmem>>, vector<18x18x4xf32>
      tpu.vector_store %arg7[%c0_114, %c0_115, %c0_116], %88 {strides = array<i32>} : memref<18x18x4xf32, #tpu.memory_space<vmem>>, vector<18x18x4xf32>,
      %cst_117 = arith.constant 0.000000e+00 : f32
      %90 = vector.broadcast %cst_117 : f32 to vector<18x18x4xf32>
      %c0_118 = arith.constant 0 : index
      %c0_119 = arith.constant 0 : index
      %c0_120 = arith.constant 0 : index
      %91 = vector.load %arg8[%c0_118, %c0_119, %c0_120] : memref<18x18x4xf32, #tpu.memory_space<vmem>>, vector<18x18x4xf32>
      tpu.vector_store %arg8[%c0_118, %c0_119, %c0_120], %90 {strides = array<i32>} : memref<18x18x4xf32, #tpu.memory_space<vmem>>, vector<18x18x4xf32>,
    } else {
    }
    %c0 = arith.constant 0 : index
    %c0_1 = arith.constant 0 : index
    %c0_2 = arith.constant 0 : index
    %c0_3 = arith.constant 0 : index
    %3 = vector.load %arg1[%c0, %c0_1, %c0_2, %c0_3] : memref<1x16x16x4xf32, #tpu.memory_space<vmem>>, vector<1x16x16x4xf32>
    %4 = vector.shape_cast %3 : vector<1x16x16x4xf32> to vector<16x16x4xf32>
    %c1 = arith.constant 1 : index
    %c1_4 = arith.constant 1 : index
    %c0_5 = arith.constant 0 : index
    %5 = vector.load %arg7[%c1, %c1_4, %c0_5] : memref<18x18x4xf32, #tpu.memory_space<vmem>>, vector<16x16x4xf32>
    tpu.vector_store %arg7[%c1, %c1_4, %c0_5], %4 {strides = array<i32>} : memref<18x18x4xf32, #tpu.memory_space<vmem>>, vector<16x16x4xf32>,
    %c0_6 = arith.constant 0 : index
    %c0_7 = arith.constant 0 : index
    %c0_8 = arith.constant 0 : index
    %6 = vector.load %arg7[%c0_6, %c0_7, %c0_8] : memref<18x18x4xf32, #tpu.memory_space<vmem>>, vector<16x16x4xf32>
    %7 = vector.shape_cast %6 : vector<16x16x4xf32> to vector<256x4xf32>
    %c0_9 = arith.constant 0 : index
    %c0_10 = arith.constant 0 : index
    %8 = vector.load %arg9[%c0_9, %c0_10] : memref<256x36xf32, #tpu.memory_space<vmem>>, vector<256x4xf32>
    tpu.vector_store %arg9[%c0_9, %c0_10], %7 {strides = array<i32>} : memref<256x36xf32, #tpu.memory_space<vmem>>, vector<256x4xf32>,
    %c0_11 = arith.constant 0 : index
    %c1_12 = arith.constant 1 : index
    %c0_13 = arith.constant 0 : index
    %9 = vector.load %arg7[%c0_11, %c1_12, %c0_13] : memref<18x18x4xf32, #tpu.memory_space<vmem>>, vector<16x16x4xf32>
    %10 = vector.shape_cast %9 : vector<16x16x4xf32> to vector<256x4xf32>
    %c0_14 = arith.constant 0 : index
    %c4 = arith.constant 4 : index
    %11 = vector.load %arg9[%c0_14, %c4] : memref<256x36xf32, #tpu.memory_space<vmem>>, vector<256x4xf32>
    tpu.vector_store %arg9[%c0_14, %c4], %10 {strides = array<i32>} : memref<256x36xf32, #tpu.memory_space<vmem>>, vector<256x4xf32>,
    %c0_15 = arith.constant 0 : index
    %c2 = arith.constant 2 : index
    %c0_16 = arith.constant 0 : index
    %12 = vector.load %arg7[%c0_15, %c2, %c0_16] : memref<18x18x4xf32, #tpu.memory_space<vmem>>, vector<16x16x4xf32>
    %13 = vector.shape_cast %12 : vector<16x16x4xf32> to vector<256x4xf32>
    %c0_17 = arith.constant 0 : index
    %c8 = arith.constant 8 : index
    %14 = vector.load %arg9[%c0_17, %c8] : memref<256x36xf32, #tpu.memory_space<vmem>>, vector<256x4xf32>
    tpu.vector_store %arg9[%c0_17, %c8], %13 {strides = array<i32>} : memref<256x36xf32, #tpu.memory_space<vmem>>, vector<256x4xf32>,
    %c1_18 = arith.constant 1 : index
    %c0_19 = arith.constant 0 : index
    %c0_20 = arith.constant 0 : index
    %15 = vector.load %arg7[%c1_18, %c0_19, %c0_20] : memref<18x18x4xf32, #tpu.memory_space<vmem>>, vector<16x16x4xf32>
    %16 = vector.shape_cast %15 : vector<16x16x4xf32> to vector<256x4xf32>
    %c0_21 = arith.constant 0 : index
    %c12 = arith.constant 12 : index
    %17 = vector.load %arg9[%c0_21, %c12] : memref<256x36xf32, #tpu.memory_space<vmem>>, vector<256x4xf32>
    tpu.vector_store %arg9[%c0_21, %c12], %16 {strides = array<i32>} : memref<256x36xf32, #tpu.memory_space<vmem>>, vector<256x4xf32>,
    %c1_22 = arith.constant 1 : index
    %c1_23 = arith.constant 1 : index
    %c0_24 = arith.constant 0 : index
    %18 = vector.load %arg7[%c1_22, %c1_23, %c0_24] : memref<18x18x4xf32, #tpu.memory_space<vmem>>, vector<16x16x4xf32>
    %19 = vector.shape_cast %18 : vector<16x16x4xf32> to vector<256x4xf32>
    %c0_25 = arith.constant 0 : index
    %c16 = arith.constant 16 : index
    %20 = vector.load %arg9[%c0_25, %c16] : memref<256x36xf32, #tpu.memory_space<vmem>>, vector<256x4xf32>
    tpu.vector_store %arg9[%c0_25, %c16], %19 {strides = array<i32>} : memref<256x36xf32, #tpu.memory_space<vmem>>, vector<256x4xf32>,
    %c1_26 = arith.constant 1 : index
    %c2_27 = arith.constant 2 : index
    %c0_28 = arith.constant 0 : index
    %21 = vector.load %arg7[%c1_26, %c2_27, %c0_28] : memref<18x18x4xf32, #tpu.memory_space<vmem>>, vector<16x16x4xf32>
    %22 = vector.shape_cast %21 : vector<16x16x4xf32> to vector<256x4xf32>
    %c0_29 = arith.constant 0 : index
    %c20 = arith.constant 20 : index
    %23 = vector.load %arg9[%c0_29, %c20] : memref<256x36xf32, #tpu.memory_space<vmem>>, vector<256x4xf32>
    tpu.vector_store %arg9[%c0_29, %c20], %22 {strides = array<i32>} : memref<256x36xf32, #tpu.memory_space<vmem>>, vector<256x4xf32>,
    %c2_30 = arith.constant 2 : index
    %c0_31 = arith.constant 0 : index
    %c0_32 = arith.constant 0 : index
    %24 = vector.load %arg7[%c2_30, %c0_31, %c0_32] : memref<18x18x4xf32, #tpu.memory_space<vmem>>, vector<16x16x4xf32>
    %25 = vector.shape_cast %24 : vector<16x16x4xf32> to vector<256x4xf32>
    %c0_33 = arith.constant 0 : index
    %c24 = arith.constant 24 : index
    %26 = vector.load %arg9[%c0_33, %c24] : memref<256x36xf32, #tpu.memory_space<vmem>>, vector<256x4xf32>
    tpu.vector_store %arg9[%c0_33, %c24], %25 {strides = array<i32>} : memref<256x36xf32, #tpu.memory_space<vmem>>, vector<256x4xf32>,
    %c2_34 = arith.constant 2 : index
    %c1_35 = arith.constant 1 : index
    %c0_36 = arith.constant 0 : index
    %27 = vector.load %arg7[%c2_34, %c1_35, %c0_36] : memref<18x18x4xf32, #tpu.memory_space<vmem>>, vector<16x16x4xf32>
    %28 = vector.shape_cast %27 : vector<16x16x4xf32> to vector<256x4xf32>
    %c0_37 = arith.constant 0 : index
    %c28 = arith.constant 28 : index
    %29 = vector.load %arg9[%c0_37, %c28] : memref<256x36xf32, #tpu.memory_space<vmem>>, vector<256x4xf32>
    tpu.vector_store %arg9[%c0_37, %c28], %28 {strides = array<i32>} : memref<256x36xf32, #tpu.memory_space<vmem>>, vector<256x4xf32>,
    %c2_38 = arith.constant 2 : index
    %c2_39 = arith.constant 2 : index
    %c0_40 = arith.constant 0 : index
    %30 = vector.load %arg7[%c2_38, %c2_39, %c0_40] : memref<18x18x4xf32, #tpu.memory_space<vmem>>, vector<16x16x4xf32>
    %31 = vector.shape_cast %30 : vector<16x16x4xf32> to vector<256x4xf32>
    %c0_41 = arith.constant 0 : index
    %c32 = arith.constant 32 : index
    %32 = vector.load %arg9[%c0_41, %c32] : memref<256x36xf32, #tpu.memory_space<vmem>>, vector<256x4xf32>
    tpu.vector_store %arg9[%c0_41, %c32], %31 {strides = array<i32>} : memref<256x36xf32, #tpu.memory_space<vmem>>, vector<256x4xf32>,
    %c0_42 = arith.constant 0 : index
    %c0_43 = arith.constant 0 : index
    %33 = vector.load %arg9[%c0_42, %c0_43] : memref<256x36xf32, #tpu.memory_space<vmem>>, vector<256x36xf32>
    %34 = arith.truncf %33 : vector<256x36xf32> to vector<256x36xbf16>
    %c0_44 = arith.constant 0 : index
    %c0_45 = arith.constant 0 : index
    %35 = vector.load %arg2[%c0_44, %c0_45] : memref<36x4xbf16, #tpu.memory_space<vmem>>, vector<36x4xbf16>
    %cst = arith.constant dense<0.000000e+00> : vector<256x4xf32>
    %36 = tpu.matmul %34, %35, %cst {dimension_numbers = #tpu.dot_dimension_numbers<[1], [0], [0], [1], [0, 0, 1, 1], [], []>} : vector<256x36xbf16>, vector<36x4xbf16>, vector<256x4xf32> -> vector<256x4xf32>
    %c0_46 = arith.constant 0 : index
    %c0_47 = arith.constant 0 : index
    %37 = vector.load %arg3[%c0_46, %c0_47] : memref<1x4xf32, #tpu.memory_space<vmem>>, vector<1x4xf32>
    %38 = vector.broadcast %37 : vector<1x4xf32> to vector<256x4xf32>
    %39 = arith.addf %36, %38 : vector<256x4xf32>
    %cst_48 = arith.constant 0.000000e+00 : f32
    %40 = vector.broadcast %cst_48 : f32 to vector<256x4xf32>
    %41 = arith.maximumf %39, %40 : vector<256x4xf32>
    %42 = vector.shape_cast %41 : vector<256x4xf32> to vector<16x16x4xf32>
    %c1_49 = arith.constant 1 : index
    %c1_50 = arith.constant 1 : index
    %c0_51 = arith.constant 0 : index
    %43 = vector.load %arg8[%c1_49, %c1_50, %c0_51] : memref<18x18x4xf32, #tpu.memory_space<vmem>>, vector<16x16x4xf32>
    tpu.vector_store %arg8[%c1_49, %c1_50, %c0_51], %42 {strides = array<i32>} : memref<18x18x4xf32, #tpu.memory_space<vmem>>, vector<16x16x4xf32>,
    %c0_52 = arith.constant 0 : index
    %c0_53 = arith.constant 0 : index
    %c0_54 = arith.constant 0 : index
    %44 = vector.load %arg8[%c0_52, %c0_53, %c0_54] : memref<18x18x4xf32, #tpu.memory_space<vmem>>, vector<16x16x4xf32>
    %45 = vector.shape_cast %44 : vector<16x16x4xf32> to vector<256x4xf32>
    %c0_55 = arith.constant 0 : index
    %c0_56 = arith.constant 0 : index
    %46 = vector.load %arg9[%c0_55, %c0_56] : memref<256x36xf32, #tpu.memory_space<vmem>>, vector<256x4xf32>
    tpu.vector_store %arg9[%c0_55, %c0_56], %45 {strides = array<i32>} : memref<256x36xf32, #tpu.memory_space<vmem>>, vector<256x4xf32>,
    %c0_57 = arith.constant 0 : index
    %c1_58 = arith.constant 1 : index
    %c0_59 = arith.constant 0 : index
    %47 = vector.load %arg8[%c0_57, %c1_58, %c0_59] : memref<18x18x4xf32, #tpu.memory_space<vmem>>, vector<16x16x4xf32>
    %48 = vector.shape_cast %47 : vector<16x16x4xf32> to vector<256x4xf32>
    %c0_60 = arith.constant 0 : index
    %c4_61 = arith.constant 4 : index
    %49 = vector.load %arg9[%c0_60, %c4_61] : memref<256x36xf32, #tpu.memory_space<vmem>>, vector<256x4xf32>
    tpu.vector_store %arg9[%c0_60, %c4_61], %48 {strides = array<i32>} : memref<256x36xf32, #tpu.memory_space<vmem>>, vector<256x4xf32>,
    %c0_62 = arith.constant 0 : index
    %c2_63 = arith.constant 2 : index
    %c0_64 = arith.constant 0 : index
    %50 = vector.load %arg8[%c0_62, %c2_63, %c0_64] : memref<18x18x4xf32, #tpu.memory_space<vmem>>, vector<16x16x4xf32>
    %51 = vector.shape_cast %50 : vector<16x16x4xf32> to vector<256x4xf32>
    %c0_65 = arith.constant 0 : index
    %c8_66 = arith.constant 8 : index
    %52 = vector.load %arg9[%c0_65, %c8_66] : memref<256x36xf32, #tpu.memory_space<vmem>>, vector<256x4xf32>
    tpu.vector_store %arg9[%c0_65, %c8_66], %51 {strides = array<i32>} : memref<256x36xf32, #tpu.memory_space<vmem>>, vector<256x4xf32>,
    %c1_67 = arith.constant 1 : index
    %c0_68 = arith.constant 0 : index
    %c0_69 = arith.constant 0 : index
    %53 = vector.load %arg8[%c1_67, %c0_68, %c0_69] : memref<18x18x4xf32, #tpu.memory_space<vmem>>, vector<16x16x4xf32>
    %54 = vector.shape_cast %53 : vector<16x16x4xf32> to vector<256x4xf32>
    %c0_70 = arith.constant 0 : index
    %c12_71 = arith.constant 12 : index
    %55 = vector.load %arg9[%c0_70, %c12_71] : memref<256x36xf32, #tpu.memory_space<vmem>>, vector<256x4xf32>
    tpu.vector_store %arg9[%c0_70, %c12_71], %54 {strides = array<i32>} : memref<256x36xf32, #tpu.memory_space<vmem>>, vector<256x4xf32>,
    %c1_72 = arith.constant 1 : index
    %c1_73 = arith.constant 1 : index
    %c0_74 = arith.constant 0 : index
    %56 = vector.load %arg8[%c1_72, %c1_73, %c0_74] : memref<18x18x4xf32, #tpu.memory_space<vmem>>, vector<16x16x4xf32>
    %57 = vector.shape_cast %56 : vector<16x16x4xf32> to vector<256x4xf32>
    %c0_75 = arith.constant 0 : index
    %c16_76 = arith.constant 16 : index
    %58 = vector.load %arg9[%c0_75, %c16_76] : memref<256x36xf32, #tpu.memory_space<vmem>>, vector<256x4xf32>
    tpu.vector_store %arg9[%c0_75, %c16_76], %57 {strides = array<i32>} : memref<256x36xf32, #tpu.memory_space<vmem>>, vector<256x4xf32>,
    %c1_77 = arith.constant 1 : index
    %c2_78 = arith.constant 2 : index
    %c0_79 = arith.constant 0 : index
    %59 = vector.load %arg8[%c1_77, %c2_78, %c0_79] : memref<18x18x4xf32, #tpu.memory_space<vmem>>, vector<16x16x4xf32>
    %60 = vector.shape_cast %59 : vector<16x16x4xf32> to vector<256x4xf32>
    %c0_80 = arith.constant 0 : index
    %c20_81 = arith.constant 20 : index
    %61 = vector.load %arg9[%c0_80, %c20_81] : memref<256x36xf32, #tpu.memory_space<vmem>>, vector<256x4xf32>
    tpu.vector_store %arg9[%c0_80, %c20_81], %60 {strides = array<i32>} : memref<256x36xf32, #tpu.memory_space<vmem>>, vector<256x4xf32>,
    %c2_82 = arith.constant 2 : index
    %c0_83 = arith.constant 0 : index
    %c0_84 = arith.constant 0 : index
    %62 = vector.load %arg8[%c2_82, %c0_83, %c0_84] : memref<18x18x4xf32, #tpu.memory_space<vmem>>, vector<16x16x4xf32>
    %63 = vector.shape_cast %62 : vector<16x16x4xf32> to vector<256x4xf32>
    %c0_85 = arith.constant 0 : index
    %c24_86 = arith.constant 24 : index
    %64 = vector.load %arg9[%c0_85, %c24_86] : memref<256x36xf32, #tpu.memory_space<vmem>>, vector<256x4xf32>
    tpu.vector_store %arg9[%c0_85, %c24_86], %63 {strides = array<i32>} : memref<256x36xf32, #tpu.memory_space<vmem>>, vector<256x4xf32>,
    %c2_87 = arith.constant 2 : index
    %c1_88 = arith.constant 1 : index
    %c0_89 = arith.constant 0 : index
    %65 = vector.load %arg8[%c2_87, %c1_88, %c0_89] : memref<18x18x4xf32, #tpu.memory_space<vmem>>, vector<16x16x4xf32>
    %66 = vector.shape_cast %65 : vector<16x16x4xf32> to vector<256x4xf32>
    %c0_90 = arith.constant 0 : index
    %c28_91 = arith.constant 28 : index
    %67 = vector.load %arg9[%c0_90, %c28_91] : memref<256x36xf32, #tpu.memory_space<vmem>>, vector<256x4xf32>
    tpu.vector_store %arg9[%c0_90, %c28_91], %66 {strides = array<i32>} : memref<256x36xf32, #tpu.memory_space<vmem>>, vector<256x4xf32>,
    %c2_92 = arith.constant 2 : index
    %c2_93 = arith.constant 2 : index
    %c0_94 = arith.constant 0 : index
    %68 = vector.load %arg8[%c2_92, %c2_93, %c0_94] : memref<18x18x4xf32, #tpu.memory_space<vmem>>, vector<16x16x4xf32>
    %69 = vector.shape_cast %68 : vector<16x16x4xf32> to vector<256x4xf32>
    %c0_95 = arith.constant 0 : index
    %c32_96 = arith.constant 32 : index
    %70 = vector.load %arg9[%c0_95, %c32_96] : memref<256x36xf32, #tpu.memory_space<vmem>>, vector<256x4xf32>
    tpu.vector_store %arg9[%c0_95, %c32_96], %69 {strides = array<i32>} : memref<256x36xf32, #tpu.memory_space<vmem>>, vector<256x4xf32>,
    %c0_97 = arith.constant 0 : index
    %c0_98 = arith.constant 0 : index
    %71 = vector.load %arg9[%c0_97, %c0_98] : memref<256x36xf32, #tpu.memory_space<vmem>>, vector<256x36xf32>
    %72 = arith.truncf %71 : vector<256x36xf32> to vector<256x36xbf16>
    %c0_99 = arith.constant 0 : index
    %c0_100 = arith.constant 0 : index
    %73 = vector.load %arg4[%c0_99, %c0_100] : memref<36x4xbf16, #tpu.memory_space<vmem>>, vector<36x4xbf16>
    %cst_101 = arith.constant dense<0.000000e+00> : vector<256x4xf32>
    %74 = tpu.matmul %72, %73, %cst_101 {dimension_numbers = #tpu.dot_dimension_numbers<[1], [0], [0], [1], [0, 0, 1, 1], [], []>} : vector<256x36xbf16>, vector<36x4xbf16>, vector<256x4xf32> -> vector<256x4xf32>
    %c0_102 = arith.constant 0 : index
    %c0_103 = arith.constant 0 : index
    %75 = vector.load %arg5[%c0_102, %c0_103] : memref<1x4xf32, #tpu.memory_space<vmem>>, vector<1x4xf32>
    %76 = vector.broadcast %75 : vector<1x4xf32> to vector<256x4xf32>
    %77 = arith.addf %74, %76 : vector<256x4xf32>
    %c0_104 = arith.constant 0 : index
    %c0_105 = arith.constant 0 : index
    %c0_106 = arith.constant 0 : index
    %c0_107 = arith.constant 0 : index
    %78 = vector.load %arg1[%c0_104, %c0_105, %c0_106, %c0_107] : memref<1x16x16x4xf32, #tpu.memory_space<vmem>>, vector<1x16x16x4xf32>
    %79 = vector.shape_cast %78 : vector<1x16x16x4xf32> to vector<16x16x4xf32>
    %80 = vector.shape_cast %79 : vector<16x16x4xf32> to vector<256x4xf32>
    %cst_108 = arith.constant 1.000000e+00 : f32
    %81 = vector.broadcast %cst_108 : f32 to vector<256x4xf32>
    %82 = arith.mulf %81, %77 : vector<256x4xf32>
    %83 = arith.addf %80, %82 : vector<256x4xf32>
    %84 = vector.shape_cast %83 : vector<256x4xf32> to vector<16x16x4xf32>
    %c0_109 = arith.constant 0 : index
    %c0_110 = arith.constant 0 : index
    %c0_111 = arith.constant 0 : index
    %c0_112 = arith.constant 0 : index
    %85 = vector.load %arg6[%c0_109, %c0_110, %c0_111, %c0_112] : memref<1x16x16x4xf32, #tpu.memory_space<vmem>>, vector<1x16x16x4xf32>
    %86 = vector.shape_cast %85 : vector<1x16x16x4xf32> to vector<16x16x4xf32>
    %87 = vector.shape_cast %84 : vector<16x16x4xf32> to vector<1x16x16x4xf32>
    tpu.vector_store %arg6[%c0_109, %c0_110, %c0_111, %c0_112], %87 {strides = array<i32>} : memref<1x16x16x4xf32, #tpu.memory_space<vmem>>, vector<1x16x16x4xf32>,
    return
  }
  func.func @transform_0(%arg0: i32) -> (i32, i32, i32, i32) {
    %c0_i32 = arith.constant 0 : i32
    %c0_i32_0 = arith.constant 0 : i32
    %c0_i32_1 = arith.constant 0 : i32
    %c0_i32_2 = arith.constant 0 : i32
    return %arg0, %c0_i32, %c0_i32_0, %c0_i32_1 : i32, i32, i32, i32
  }
  func.func @transform_1(%arg0: i32) -> (i32, i32) {
    %c0_i32 = arith.constant 0 : i32
    %c0_i32_0 = arith.constant 0 : i32
    %c0_i32_1 = arith.constant 0 : i32
    return %c0_i32, %c0_i32_0 : i32, i32
  }
  func.func @transform_2(%arg0: i32) -> (i32, i32) {
    %c0_i32 = arith.constant 0 : i32
    %c0_i32_0 = arith.constant 0 : i32
    %c0_i32_1 = arith.constant 0 : i32
    return %c0_i32, %c0_i32_0 : i32, i32
  }
  func.func @transform_3(%arg0: i32) -> (i32, i32) {
    %c0_i32 = arith.constant 0 : i32
    %c0_i32_0 = arith.constant 0 : i32
    %c0_i32_1 = arith.constant 0 : i32
    return %c0_i32, %c0_i32_0 : i32, i32
  }
  func.func @transform_4(%arg0: i32) -> (i32, i32) {
    %c0_i32 = arith.constant 0 : i32
    %c0_i32_0 = arith.constant 0 : i32
    %c0_i32_1 = arith.constant 0 : i32
    return %c0_i32, %c0_i32_0 : i32, i32
  }
  func.func @transform_5(%arg0: i32) -> (i32, i32, i32, i32) {
    %c0_i32 = arith.constant 0 : i32
    %c0_i32_0 = arith.constant 0 : i32
    %c0_i32_1 = arith.constant 0 : i32
    %c0_i32_2 = arith.constant 0 : i32
    return %arg0, %c0_i32, %c0_i32_0, %c0_i32_1 : i32, i32, i32, i32
  }
}

</mosaic_0001>

<bundles_post_ra>
// kernel: tpu_custom_call.1
= control target key start
LH: loop header
LB: loop body
LE: loop exit
PB: predicated region body
PF: predicated region fallthrough
CT: control target
= control target key end

     0   :  { %s4648_s18 = smov 0   ;;  %s6961_s0 = inlined_call_operand.vmem [shape: f32[2,16,16,4], index: 0, kind: input, shape index: {}]   ;;  %s6962_s1 = inlined_call_operand.vmem [shape: bf16[36,4], index: 1, kind: input, shape index: {}]   ;;  %s6963_s2 = inlined_call_operand.vmem [shape: f32[1,4], index: 2, kind: input, shape index: {}]   ;;  %s6964_s3 = inlined_call_operand.vmem [shape: bf16[36,4], index: 3, kind: input, shape index: {}]   ;;  %s6965_s4 = inlined_call_operand.vmem [shape: f32[1,4], index: 4, kind: input, shape index: {}]   ;;  %s6966_s5 = inlined_call_operand.vmem [shape: f32[2,16,16,4], index: 5, kind: output, shape index: {}]  }
   0x1 LB: > { %s4408_s19 = sadd.s32 4294967295, %s4607_s18   ;;  %p4412_p0 = scmp.ge.s32.totalorder %s4607_s18, 1  ;;  %s4607_s18 = sphi %s4648_s18, %s15_s18  }
   0x2   : > { %p187_p1 = scmp.lt.s32.totalorder %s4607_s18, 3 }
   0x4   : > { %p188_p2 = pnand %p4412_p0, %p187_p1 }
   0x6   : > { %191 = sbr.rel (%p188_p2) target bundleno = 1707 (0x6ab), region = 40 }
   0xb   : > { %p215_p3 = scmp.lt.s32.totalorder %s4408_s19, 1  ;;  %p4417_p4 = scmp.ne.s32.totalorder %s4408_s19, 0 }
   0xd   : > { %s216_s20 = scalar_select %p215_p3, %s4408_s19, 1 }
   0xe   : > { %229 = sbr.rel (%p4417_p4) target bundleno = 74 (0x4a), region = 44 }
   0xf   : > { %s4460_s21 = sshll.u32 %s216_s20, 8 }
  0x10   : > { %s4659_s24 = scalar_lea.vmem %s6961_s0, %s4460_s21  ;;  %s4664_s27 = scalar_lea.vmem %s6966_s5, %s4460_s21 }
  0x13   : > { %vm230_vm0 = vcmask 31744   ;;  %vm233_vm1 = vcmask 25600   ;;  %v4609_v0 = vmov 0.0  }
  0x14   : > { %231 = vst.msk [vmem:[#allocation2] sm:$0xff] %vm230_vm0, %v4609_v0  ;;  %232 = vst.msk [vmem:[#allocation2 + $0x8] sm:$0xff] %vm230_vm0, %v4609_v0 }
  0x15   : > { %235 = vst.msk [vmem:[#allocation2 + $0x18] sm:$0xff] %vm230_vm0, %v4609_v0  ;;  %236 = vst.msk [vmem:[#allocation2 + $0x20] sm:$0xff] %vm230_vm0, %v4609_v0 }
  0x16   : > { %238 = vst.msk [vmem:[#allocation2 + $0x30] sm:$0xff] %vm230_vm0, %v4609_v0  ;;  %239 = vst.msk [vmem:[#allocation2 + $0x38] sm:$0xff] %vm230_vm0, %v4609_v0 }
  0x17   : > { %241 = vst.msk [vmem:[#allocation2 + $0x48] sm:$0xff] %vm230_vm0, %v4609_v0  ;;  %242 = vst.msk [vmem:[#allocation2 + $0x50] sm:$0xff] %vm230_vm0, %v4609_v0 }
  0x18   : > { %244 = vst.msk [vmem:[#allocation2 + $0x60] sm:$0xff] %vm230_vm0, %v4609_v0  ;;  %245 = vst.msk [vmem:[#allocation2 + $0x68] sm:$0xff] %vm230_vm0, %v4609_v0 }
  0x19   : > { %247 = vst.msk [vmem:[#allocation2 + $0x78] sm:$0xff] %vm230_vm0, %v4609_v0  ;;  %248 = vst.msk [vmem:[#allocation2 + $0x80] sm:$0xff] %vm230_vm0, %v4609_v0 }
  0x1a   : > { %250 = vst.msk [vmem:[#allocation2 + $0x90] sm:$0xff] %vm230_vm0, %v4609_v0  ;;  %251 = vst.msk [vmem:[#allocation2 + $0x98] sm:$0xff] %vm230_vm0, %v4609_v0 }
  0x1b   : > { %253 = vst.msk [vmem:[#allocation2 + $0xa8] sm:$0xff] %vm230_vm0, %v4609_v0  ;;  %254 = vst.msk [vmem:[#allocation2 + $0xb0] sm:$0xff] %vm230_vm0, %v4609_v0 }
  0x1c   : > { %256 = vst.msk [vmem:[#allocation2 + $0xc0] sm:$0xff] %vm230_vm0, %v4609_v0  ;;  %257 = vst.msk [vmem:[#allocation2 + $0xc8] sm:$0xff] %vm230_vm0, %v4609_v0 }
  0x1d   : > { %259 = vst.msk [vmem:[#allocation2 + $0xd8] sm:$0xff] %vm230_vm0, %v4609_v0  ;;  %260 = vst.msk [vmem:[#allocation2 + $0xe0] sm:$0xff] %vm230_vm0, %v4609_v0 }
  0x1e   : > { %262 = vst.msk [vmem:[#allocation2 + $0xf0] sm:$0xff] %vm230_vm0, %v4609_v0  ;;  %263 = vst.msk [vmem:[#allocation2 + $0xf8] sm:$0xff] %vm230_vm0, %v4609_v0 }
  0x1f   : > { %265 = vst.msk [vmem:[#allocation2 + $0x108] sm:$0xff] %vm230_vm0, %v4609_v0  ;;  %266 = vst.msk [vmem:[#allocation2 + $0x110] sm:$0xff] %vm230_vm0, %v4609_v0 }
  0x20   : > { %268 = vst.msk [vmem:[#allocation2 + $0x120] sm:$0xff] %vm230_vm0, %v4609_v0  ;;  %269 = vst.msk [vmem:[#allocation2 + $0x128] sm:$0xff] %vm230_vm0, %v4609_v0 }
  0x21   : > { %271 = vst.msk [vmem:[#allocation2 + $0x138] sm:$0xff] %vm230_vm0, %v4609_v0  ;;  %272 = vst.msk [vmem:[#allocation2 + $0x140] sm:$0xff] %vm230_vm0, %v4609_v0 }
  0x22   : > { %274 = vst.msk [vmem:[#allocation2 + $0x150] sm:$0xff] %vm230_vm0, %v4609_v0  ;;  %275 = vst.msk [vmem:[#allocation2 + $0x158] sm:$0xff] %vm230_vm0, %v4609_v0 }
  0x23   : > { %277 = vst.msk [vmem:[#allocation2 + $0x168] sm:$0xff] %vm230_vm0, %v4609_v0  ;;  %278 = vst.msk [vmem:[#allocation2 + $0x170] sm:$0xff] %vm230_vm0, %v4609_v0 }
  0x24   : > { %280 = vst.msk [vmem:[#allocation2 + $0x180] sm:$0xff] %vm230_vm0, %v4609_v0  ;;  %281 = vst.msk [vmem:[#allocation2 + $0x188] sm:$0xff] %vm230_vm0, %v4609_v0 }
  0x25   : > { %283 = vst.msk [vmem:[#allocation2 + $0x198] sm:$0xff] %vm230_vm0, %v4609_v0  ;;  %284 = vst.msk [vmem:[#allocation2 + $0x1a0] sm:$0xff] %vm230_vm0, %v4609_v0 }
  0x26   : > { %286 = vst.msk [vmem:[#allocation3] sm:$0xff] %vm230_vm0, %v4609_v0  ;;  %287 = vst.msk [vmem:[#allocation3 + $0x8] sm:$0xff] %vm230_vm0, %v4609_v0 }
  0x27   : > { %289 = vst.msk [vmem:[#allocation3 + $0x18] sm:$0xff] %vm230_vm0, %v4609_v0  ;;  %290 = vst.msk [vmem:[#allocation3 + $0x20] sm:$0xff] %vm230_vm0, %v4609_v0 }
  0x28   : > { %292 = vst.msk [vmem:[#allocation3 + $0x30] sm:$0xff] %vm230_vm0, %v4609_v0  ;;  %293 = vst.msk [vmem:[#allocation3 + $0x38] sm:$0xff] %vm230_vm0, %v4609_v0 }
  0x29   : > { %295 = vst.msk [vmem:[#allocation3 + $0x48] sm:$0xff] %vm230_vm0, %v4609_v0  ;;  %296 = vst.msk [vmem:[#allocation3 + $0x50] sm:$0xff] %vm230_vm0, %v4609_v0 }
  0x2a   : > { %298 = vst.msk [vmem:[#allocation3 + $0x60] sm:$0xff] %vm230_vm0, %v4609_v0  ;;  %299 = vst.msk [vmem:[#allocation3 + $0x68] sm:$0xff] %vm230_vm0, %v4609_v0 }
  0x2b   : > { %301 = vst.msk [vmem:[#allocation3 + $0x78] sm:$0xff] %vm230_vm0, %v4609_v0  ;;  %302 = vst.msk [vmem:[#allocation3 + $0x80] sm:$0xff] %vm230_vm0, %v4609_v0 }
  0x2c   : > { %304 = vst.msk [vmem:[#allocation3 + $0x90] sm:$0xff] %vm230_vm0, %v4609_v0  ;;  %305 = vst.msk [vmem:[#allocation3 + $0x98] sm:$0xff] %vm230_vm0, %v4609_v0 }
  0x2d   : > { %307 = vst.msk [vmem:[#allocation3 + $0xa8] sm:$0xff] %vm230_vm0, %v4609_v0  ;;  %308 = vst.msk [vmem:[#allocation3 + $0xb0] sm:$0xff] %vm230_vm0, %v4609_v0 }
  0x2e   : > { %310 = vst.msk [vmem:[#allocation3 + $0xc0] sm:$0xff] %vm230_vm0, %v4609_v0  ;;  %311 = vst.msk [vmem:[#allocation3 + $0xc8] sm:$0xff] %vm230_vm0, %v4609_v0 }
  0x2f   : > { %313 = vst.msk [vmem:[#allocation3 + $0xd8] sm:$0xff] %vm230_vm0, %v4609_v0  ;;  %314 = vst.msk [vmem:[#allocation3 + $0xe0] sm:$0xff] %vm230_vm0, %v4609_v0 }
  0x30   : > { %316 = vst.msk [vmem:[#allocation3 + $0xf0] sm:$0xff] %vm230_vm0, %v4609_v0  ;;  %317 = vst.msk [vmem:[#allocation3 + $0xf8] sm:$0xff] %vm230_vm0, %v4609_v0 }
  0x31   : > { %319 = vst.msk [vmem:[#allocation3 + $0x108] sm:$0xff] %vm230_vm0, %v4609_v0  ;;  %320 = vst.msk [vmem:[#allocation3 + $0x110] sm:$0xff] %vm230_vm0, %v4609_v0 }
  0x32   : > { %322 = vst.msk [vmem:[#allocation3 + $0x120] sm:$0xff] %vm230_vm0, %v4609_v0  ;;  %323 = vst.msk [vmem:[#allocation3 + $0x128] sm:$0xff] %vm230_vm0, %v4609_v0 }
  0x33   : > { %325 = vst.msk [vmem:[#allocation3 + $0x138] sm:$0xff] %vm230_vm0, %v4609_v0  ;;  %326 = vst.msk [vmem:[#allocation3 + $0x140] sm:$0xff] %vm230_vm0, %v4609_v0 }
  0x34   : > { %328 = vst.msk [vmem:[#allocation3 + $0x150] sm:$0xff] %vm230_vm0, %v4609_v0  ;;  %329 = vst.msk [vmem:[#allocation3 + $0x158] sm:$0xff] %vm230_vm0, %v4609_v0 }
  0x35   : > { %331 = vst.msk [vmem:[#allocation3 + $0x168] sm:$0xff] %vm230_vm0, %v4609_v0  ;;  %332 = vst.msk [vmem:[#allocation3 + $0x170] sm:$0xff] %vm230_vm0, %v4609_v0 }
  0x36   : > { %334 = vst.msk [vmem:[#allocation3 + $0x180] sm:$0xff] %vm230_vm0, %v4609_v0  ;;  %335 = vst.msk [vmem:[#allocation3 + $0x188] sm:$0xff] %vm230_vm0, %v4609_v0 }
  0x37   : > { %337 = vst.msk [vmem:[#allocation3 + $0x198] sm:$0xff] %vm230_vm0, %v4609_v0  ;;  %338 = vst.msk [vmem:[#allocation3 + $0x1a0] sm:$0xff] %vm230_vm0, %v4609_v0 }
  0x38   : > { %234 = vst.msk [vmem:[#allocation2 + $0x10] sm:$0x3] %vm233_vm1, %v4609_v0  ;;  %237 = vst.msk [vmem:[#allocation2 + $0x28] sm:$0x3] %vm233_vm1, %v4609_v0 }
  0x39   : > { %240 = vst.msk [vmem:[#allocation2 + $0x40] sm:$0x3] %vm233_vm1, %v4609_v0  ;;  %243 = vst.msk [vmem:[#allocation2 + $0x58] sm:$0x3] %vm233_vm1, %v4609_v0 }
  0x3a   : > { %246 = vst.msk [vmem:[#allocation2 + $0x70] sm:$0x3] %vm233_vm1, %v4609_v0  ;;  %249 = vst.msk [vmem:[#allocation2 + $0x88] sm:$0x3] %vm233_vm1, %v4609_v0 }
  0x3b   : > { %252 = vst.msk [vmem:[#allocation2 + $0xa0] sm:$0x3] %vm233_vm1, %v4609_v0  ;;  %255 = vst.msk [vmem:[#allocation2 + $0xb8] sm:$0x3] %vm233_vm1, %v4609_v0 }
  0x3c   : > { %258 = vst.msk [vmem:[#allocation2 + $0xd0] sm:$0x3] %vm233_vm1, %v4609_v0  ;;  %261 = vst.msk [vmem:[#allocation2 + $0xe8] sm:$0x3] %vm233_vm1, %v4609_v0 }
  0x3d   : > { %264 = vst.msk [vmem:[#allocation2 + $0x100] sm:$0x3] %vm233_vm1, %v4609_v0  ;;  %267 = vst.msk [vmem:[#allocation2 + $0x118] sm:$0x3] %vm233_vm1, %v4609_v0 }
  0x3e   : > { %270 = vst.msk [vmem:[#allocation2 + $0x130] sm:$0x3] %vm233_vm1, %v4609_v0  ;;  %273 = vst.msk [vmem:[#allocation2 + $0x148] sm:$0x3] %vm233_vm1, %v4609_v0 }
  0x3f   : > { %276 = vst.msk [vmem:[#allocation2 + $0x160] sm:$0x3] %vm233_vm1, %v4609_v0  ;;  %279 = vst.msk [vmem:[#allocation2 + $0x178] sm:$0x3] %vm233_vm1, %v4609_v0 }
  0x40   : > { %282 = vst.msk [vmem:[#allocation2 + $0x190] sm:$0x3] %vm233_vm1, %v4609_v0  ;;  %285 = vst.msk [vmem:[#allocation2 + $0x1a8] sm:$0x3] %vm233_vm1, %v4609_v0 }
  0x41   : > { %288 = vst.msk [vmem:[#allocation3 + $0x10] sm:$0x3] %vm233_vm1, %v4609_v0  ;;  %291 = vst.msk [vmem:[#allocation3 + $0x28] sm:$0x3] %vm233_vm1, %v4609_v0 }
  0x42   : > { %294 = vst.msk [vmem:[#allocation3 + $0x40] sm:$0x3] %vm233_vm1, %v4609_v0  ;;  %297 = vst.msk [vmem:[#allocation3 + $0x58] sm:$0x3] %vm233_vm1, %v4609_v0 }
  0x43   : > { %300 = vst.msk [vmem:[#allocation3 + $0x70] sm:$0x3] %vm233_vm1, %v4609_v0  ;;  %303 = vst.msk [vmem:[#allocation3 + $0x88] sm:$0x3] %vm233_vm1, %v4609_v0 }
  0x44   : > { %306 = vst.msk [vmem:[#allocation3 + $0xa0] sm:$0x3] %vm233_vm1, %v4609_v0  ;;  %309 = vst.msk [vmem:[#allocation3 + $0xb8] sm:$0x3] %vm233_vm1, %v4609_v0 }
  0x45   : > { %312 = vst.msk [vmem:[#allocation3 + $0xd0] sm:$0x3] %vm233_vm1, %v4609_v0  ;;  %315 = vst.msk [vmem:[#allocation3 + $0xe8] sm:$0x3] %vm233_vm1, %v4609_v0 }
  0x46   : > { %318 = vst.msk [vmem:[#allocation3 + $0x100] sm:$0x3] %vm233_vm1, %v4609_v0  ;;  %321 = vst.msk [vmem:[#allocation3 + $0x118] sm:$0x3] %vm233_vm1, %v4609_v0 }
  0x47   : > { %324 = vst.msk [vmem:[#allocation3 + $0x130] sm:$0x3] %vm233_vm1, %v4609_v0  ;;  %327 = vst.msk [vmem:[#allocation3 + $0x148] sm:$0x3] %vm233_vm1, %v4609_v0 }
  0x48   : > { %330 = vst.msk [vmem:[#allocation3 + $0x160] sm:$0x3] %vm233_vm1, %v4609_v0  ;;  %333 = vst.msk [vmem:[#allocation3 + $0x178] sm:$0x3] %vm233_vm1, %v4609_v0 }
  0x49   : > { %336 = vst.msk [vmem:[#allocation3 + $0x190] sm:$0x3] %vm233_vm1, %v4609_v0  ;;  %339 = vst.msk [vmem:[#allocation3 + $0x1a8] sm:$0x3] %vm233_vm1, %v4609_v0 }
  0x4a PF: > { %v470_v1 = vld [vmem:[#allocation2 + $0x1] sm:$0xff]  ;;  %vm373_vm2 = vcmask 31744   ;;  %v471_v3 = vld [vmem:[#allocation2 + $0x9] sm:$0xff]  ;;  %s4610_s28 = smov 4   ;;  %v343_v6 = vld [vmem:[%s4659_s24 + $0x18] sm:$0xff]  ;;  %s4611_s29 = smov 8  }
  0x4b   : > { %v340_v2 = vld [vmem:[%s4659_s24] sm:$0xff]  ;;  %534 = vrot.lane.b32.xlu0 %v470_v1, %s4610_s28  ;;  %v341_v4 = vld [vmem:[%s4659_s24 + $0x8] sm:$0xff]  ;;  %v342_v5 = vld [vmem:[%s4659_s24 + $0x10] sm:$0xff]  ;;  %377 = vst.msk [vmem:[#allocation2 + $0x39] sm:$0xff] %vm373_vm2, %v343_v6  ;;  %vm630_vm3 = vcmask 64544   ;;  %s4612_s30 = smov 12  }
  0x4c   : > { %374 = vst.msk [vmem:[#allocation2 + $0x19] sm:$0xff] %vm373_vm2, %v340_v2  ;;  %375 = vst.msk [vmem:[#allocation2 + $0x21] sm:$0xff] %vm373_vm2, %v341_v4  ;;  %v344_v7 = vld [vmem:[%s4659_s24 + $0x20] sm:$0xff]  ;;  %v345_v8 = vld [vmem:[%s4659_s24 + $0x28] sm:$0xff]  ;;  %vm823_vm4 = vcmask 97344   ;;  %s4613_s6 = smov 16  }
  0x4d   : > { %376 = vst.msk [vmem:[#allocation2 + $0x31] sm:$0xff] %vm373_vm2, %v342_v5  ;;  %v346_v9 = vld [vmem:[%s4659_s24 + $0x30] sm:$0xff]  ;;  %378 = vst.msk [vmem:[#allocation2 + $0x49] sm:$0xff] %vm373_vm2, %v344_v7  ;;  %v347_v10 = vld [vmem:[%s4659_s24 + $0x38] sm:$0xff]  ;;  %vm1016_vm5 = vcmask 130144   ;;  %s4614_s7 = smov 20  }
  0x4e   : > { %379 = vst.msk [vmem:[#allocation2 + $0x51] sm:$0xff] %vm373_vm2, %v345_v8  ;;  %380 = vst.msk [vmem:[#allocation2 + $0x61] sm:$0xff] %vm373_vm2, %v346_v9  ;;  %v348_v11 = vld [vmem:[%s4659_s24 + $0x40] sm:$0xff]  ;;  %v349_v12 = vld [vmem:[%s4659_s24 + $0x48] sm:$0xff]  ;;  %vm1209_vm6 = vcmask 162944   ;;  %s4615_s8 = smov 24  }
  0x4f   : > { %381 = vst.msk [vmem:[#allocation2 + $0x69] sm:$0xff] %vm373_vm2, %v347_v10  ;;  %382 = vst.msk [vmem:[#allocation2 + $0x79] sm:$0xff] %vm373_vm2, %v348_v11  ;;  %v350_v13 = vld [vmem:[%s4659_s24 + $0x50] sm:$0xff]  ;;  %v351_v14 = vld [vmem:[%s4659_s24 + $0x58] sm:$0xff]  ;;  %536 = vrot.lane.b32.xlu0 %v471_v3, %s4610_s28  ;;  %vm1402_vm7 = vcmask 195744   ;;  %s4616_s9 = smov 28  }
  0x50   : > { %383 = vst.msk [vmem:[#allocation2 + $0x81] sm:$0xff] %vm373_vm2, %v349_v12  ;;  %v352_v15 = vld [vmem:[%s4659_s24 + $0x60] sm:$0xff]  ;;  %384 = vst.msk [vmem:[#allocation2 + $0x91] sm:$0xff] %vm373_vm2, %v350_v13  ;;  %v353_v16 = vld [vmem:[%s4659_s24 + $0x68] sm:$0xff]  ;;  %vm2139_vm8 = vcmask 1041408   ;;  %s4617_s14 = smov 32  }
  0x51   : > { %385 = vst.msk [vmem:[#allocation2 + $0x99] sm:$0xff] %vm373_vm2, %v351_v14  ;;  %386 = vst.msk [vmem:[#allocation2 + $0xa9] sm:$0xff] %vm373_vm2, %v352_v15  ;;  %v354_v17 = vld [vmem:[%s4659_s24 + $0x70] sm:$0xff]  ;;  %v355_v18 = vld [vmem:[%s4659_s24 + $0x78] sm:$0xff]  ;;  %vm1596_vm9 = vcmask 228544   ;;  %vm1789_vm10 = vcmask 261344  }
  0x52   : > { %387 = vst.msk [vmem:[#allocation2 + $0xb1] sm:$0xff] %vm373_vm2, %v353_v16  ;;  %388 = vst.msk [vmem:[#allocation2 + $0xc1] sm:$0xff] %vm373_vm2, %v354_v17  ;;  %v356_v19 = vld [vmem:[%s4659_s24 + $0x80] sm:$0xff]  ;;  %v357_v20 = vld [vmem:[%s4659_s24 + $0x88] sm:$0xff]  ;;  %vm1982_vm11 = vcmask 294144   ;;  %vm2090_vm12 = vcmask 293888  }
  0x53   : > { %389 = vst.msk [vmem:[#allocation2 + $0xc9] sm:$0xff] %vm373_vm2, %v355_v18  ;;  %v358_v21 = vld [vmem:[%s4659_s24 + $0x90] sm:$0xff]  ;;  %390 = vst.msk [vmem:[#allocation2 + $0xd9] sm:$0xff] %vm373_vm2, %v356_v19  ;;  %v359_v22 = vld [vmem:[%s4659_s24 + $0x98] sm:$0xff] }
  0x54   : > { %391 = vst.msk [vmem:[#allocation2 + $0xe1] sm:$0xff] %vm373_vm2, %v357_v20  ;;  %392 = vst.msk [vmem:[#allocation2 + $0xf1] sm:$0xff] %vm373_vm2, %v358_v21  ;;  %v360_v23 = vld [vmem:[%s4659_s24 + $0xa0] sm:$0xff]  ;;  %v361_v24 = vld [vmem:[%s4659_s24 + $0xa8] sm:$0xff] }
  0x55   : > { %v4925_v25 = vld [vmem:[#allocation2 + $0x19] sm:$0xff]  ;;  %393 = vst.msk [vmem:[#allocation2 + $0xf9] sm:$0xff] %vm373_vm2, %v359_v22  ;;  %394 = vst.msk [vmem:[#allocation2 + $0x109] sm:$0xff] %vm373_vm2, %v360_v23  ;;  %v362_v26 = vld [vmem:[%s4659_s24 + $0xb0] sm:$0xff] }
  0x56   : > { %395 = vst.msk [vmem:[#allocation2 + $0x111] sm:$0xff] %vm373_vm2, %v361_v24  ;;  %v363_v27 = vld [vmem:[%s4659_s24 + $0xb8] sm:$0xff]  ;;  %538 = vrot.lane.b32.xlu1 %v4925_v25, %s4610_s28  ;;  %396 = vst.msk [vmem:[#allocation2 + $0x121] sm:$0xff] %vm373_vm2, %v362_v26  ;;  %v4938_v29 = vld [vmem:[#allocation2 + $0x21] sm:$0xff] }
  0x57   : > { %v4934_v28 = vld [vmem:[#allocation2 + $0x31] sm:$0xff]  ;;  %397 = vst.msk [vmem:[#allocation2 + $0x129] sm:$0xff] %vm373_vm2, %v363_v27  ;;  %v4942_v30 = vld [vmem:[#allocation2 + $0x49] sm:$0xff]  ;;  %v4946_v31 = vld [vmem:[#allocation2 + $0x39] sm:$0xff] }
  0x58   : > { %542 = vrot.lane.b32.xlu0 %v4934_v28, %s4610_s28  ;;  %v4950_v32 = vld [vmem:[#allocation2 + $0x61] sm:$0xff]  ;;  %v366_v35 = vld [vmem:[%s4659_s24 + $0xd0] sm:$0xff]  ;;  %v367_v36 = vld [vmem:[%s4659_s24 + $0xd8] sm:$0xff] }
  0x59   : > { %v364_v33 = vld [vmem:[%s4659_s24 + $0xc0] sm:$0xff]  ;;  %v365_v34 = vld [vmem:[%s4659_s24 + $0xc8] sm:$0xff]  ;;  %v4959_v37 = vld [vmem:[#allocation2 + $0x51] sm:$0xff]  ;;  %400 = vst.msk [vmem:[#allocation2 + $0x151] sm:$0xff] %vm373_vm2, %v366_v35 }
  0x5a   : > { %540 = vrot.lane.b32.xlu1 %v4938_v29, %s4610_s28  ;;  %398 = vst.msk [vmem:[#allocation2 + $0x139] sm:$0xff] %vm373_vm2, %v364_v33  ;;  %399 = vst.msk [vmem:[#allocation2 + $0x141] sm:$0xff] %vm373_vm2, %v365_v34  ;;  %v368_v38 = vld [vmem:[%s4659_s24 + $0xe0] sm:$0xff]  ;;  %v369_v39 = vld [vmem:[%s4659_s24 + $0xe8] sm:$0xff] }
  0x5b   : > { %401 = vst.msk [vmem:[#allocation2 + $0x159] sm:$0xff] %vm373_vm2, %v367_v36  ;;  %v4968_v40 = vld [vmem:[#allocation2 + $0x79] sm:$0xff]  ;;  %402 = vst.msk [vmem:[#allocation2 + $0x169] sm:$0xff] %vm373_vm2, %v368_v38  ;;  %v4974_v41 = vld [vmem:[#allocation2 + $0x69] sm:$0xff] }
  0x5c   : > { %546 = vrot.lane.b32.xlu0 %v4942_v30, %s4610_s28  ;;  %403 = vst.msk [vmem:[#allocation2 + $0x171] sm:$0xff] %vm373_vm2, %v369_v39  ;;  %v4978_v42 = vld [vmem:[#allocation2 + $0x91] sm:$0xff]  ;;  %v4982_v43 = vld [vmem:[#allocation2 + $0x81] sm:$0xff]  ;;  %v4986_v44 = vld [vmem:[#allocation2 + $0xa9] sm:$0xff] }
  0x5d   : > { %v406_v45 = vld [vmem:[#allocation2] sm:$0xff]  ;;  %v4990_v46 = vld [vmem:[#allocation2 + $0x18] sm:$0xff]  ;;  %v407_v48 = vld [vmem:[#allocation2 + $0x8] sm:$0xff] }
  0x5e   : > { %544 = vrot.lane.b32.xlu1 %v4946_v31, %s4610_s28  ;;  %v4992_v47 = vld [vmem:[#allocation2 + $0x99] sm:$0xff]  ;;  %438 = vst.msk [vmem:[#allocation4] sm:$0xff] %vm373_vm2, %v406_v45  ;;  %440 = vst.msk [vmem:[#allocation4 + $0x10] sm:$0xff] %vm373_vm2, %v4990_v46  ;;  %v4999_v49 = vld [vmem:[#allocation2 + $0xc1] sm:$0xff] }
  0x5f   : > { %439 = vst.msk [vmem:[#allocation4 + $0x8] sm:$0xff] %vm373_vm2, %v407_v48  ;;  %v5002_v50 = vld [vmem:[#allocation2 + $0x20] sm:$0xff]  ;;  %v5004_v51 = vld [vmem:[#allocation2 + $0xb1] sm:$0xff]  ;;  %v5020_v55 = vld [vmem:[#allocation2 + $0x48] sm:$0xff] }
  0x60   : > { %550 = vrot.lane.b32.xlu0 %v4950_v32, %s4610_s28  ;;  %441 = vst.msk [vmem:[#allocation4 + $0x18] sm:$0xff] %vm373_vm2, %v5002_v50  ;;  %v5008_v52 = vld [vmem:[#allocation2 + $0x30] sm:$0xff]  ;;  %v5010_v53 = vld [vmem:[#allocation2 + $0x38] sm:$0xff]  ;;  %444 = vst.msk [vmem:[#allocation4 + $0x30] sm:$0xff] %vm373_vm2, %v5020_v55 }
  0x61   : > { %v5014_v54 = vld [vmem:[#allocation2 + $0xd9] sm:$0xff]  ;;  %442 = vst.msk [vmem:[#allocation4 + $0x20] sm:$0xff] %vm373_vm2, %v5008_v52  ;;  %443 = vst.msk [vmem:[#allocation4 + $0x28] sm:$0xff] %vm373_vm2, %v5010_v53  ;;  %v5022_v56 = vld [vmem:[#allocation2 + $0x50] sm:$0xff] }
  0x62   : > { %548 = vrot.lane.b32.xlu1 %v4959_v37, %s4610_s28  ;;  %445 = vst.msk [vmem:[#allocation4 + $0x38] sm:$0xff] %vm373_vm2, %v5022_v56  ;;  %v5030_v57 = vld [vmem:[#allocation2 + $0x60] sm:$0xff]  ;;  %v5032_v58 = vld [vmem:[#allocation2 + $0x68] sm:$0xff]  ;;  %v5034_v59 = vld [vmem:[#allocation2 + $0x78] sm:$0xff] }
  0x63   : > { %446 = vst.msk [vmem:[#allocation4 + $0x40] sm:$0xff] %vm373_vm2, %v5030_v57  ;;  %447 = vst.msk [vmem:[#allocation4 + $0x48] sm:$0xff] %vm373_vm2, %v5032_v58  ;;  %v5042_v60 = vld [vmem:[#allocation2 + $0x80] sm:$0xff]  ;;  %v5044_v61 = vld [vmem:[#allocation2 + $0x90] sm:$0xff] }
  0x64   : > { %554 = vrot.lane.b32.xlu0 %v4968_v40, %s4610_s28  ;;  %448 = vst.msk [vmem:[#allocation4 + $0x50] sm:$0xff] %vm373_vm2, %v5034_v59  ;;  %v5046_v62 = vld [vmem:[#allocation2 + $0x98] sm:$0xff]  ;;  %v5048_v63 = vld [vmem:[#allocation2 + $0xc9] sm:$0xff]  ;;  %449 = vst.msk [vmem:[#allocation4 + $0x58] sm:$0xff] %vm373_vm2, %v5042_v60 }
  0x65   : > { %450 = vst.msk [vmem:[#allocation4 + $0x60] sm:$0xff] %vm373_vm2, %v5044_v61  ;;  %451 = vst.msk [vmem:[#allocation4 + $0x68] sm:$0xff] %vm373_vm2, %v5046_v62  ;;  %v5056_v0 = vld [vmem:[#allocation2 + $0xa8] sm:$0xff]  ;;  %v5058_v1 = vld [vmem:[#allocation2 + $0xb0] sm:$0xff] }
  0x66   : > { %552 = vrot.lane.b32.xlu1 %v4974_v41, %s4610_s28  ;;  %v5060_v2 = vld [vmem:[#allocation2 + $0xc0] sm:$0xff]  ;;  %v5064_v3 = vld [vmem:[#allocation2 + $0xf1] sm:$0xff]  ;;  %452 = vst.msk [vmem:[#allocation4 + $0x70] sm:$0xff] %vm373_vm2, %v5056_v0  ;;  %453 = vst.msk [vmem:[#allocation4 + $0x78] sm:$0xff] %vm373_vm2, %v5058_v1 }
  0x67   : > { %454 = vst.msk [vmem:[#allocation4 + $0x80] sm:$0xff] %vm373_vm2, %v5060_v2  ;;  %v5072_v4 = vld [vmem:[#allocation2 + $0xc8] sm:$0xff]  ;;  %v5074_v5 = vld [vmem:[#allocation2 + $0xd8] sm:$0xff]  ;;  %v5076_v6 = vld [vmem:[#allocation2 + $0xe0] sm:$0xff] }
  0x68   : > { %558 = vrot.lane.b32.xlu0 %v4978_v42, %s4610_s28  ;;  %455 = vst.msk [vmem:[#allocation4 + $0x88] sm:$0xff] %vm373_vm2, %v5072_v4  ;;  %456 = vst.msk [vmem:[#allocation4 + $0x90] sm:$0xff] %vm373_vm2, %v5074_v5  ;;  %v5086_v7 = vld [vmem:[#allocation2 + $0xf0] sm:$0xff]  ;;  %v5088_v8 = vld [vmem:[#allocation2 + $0xf8] sm:$0xff] }
  0x69   : > { %457 = vst.msk [vmem:[#allocation4 + $0x98] sm:$0xff] %vm373_vm2, %v5076_v6  ;;  %v5090_v9 = vld [vmem:[#allocation2 + $0x108] sm:$0xff]  ;;  %458 = vst.msk [vmem:[#allocation4 + $0xa0] sm:$0xff] %vm373_vm2, %v5086_v7  ;;  %v5098_v10 = vld [vmem:[#allocation2 + $0x110] sm:$0xff] }
  0x6a   : > { %556 = vrot.lane.b32.xlu1 %v4982_v43, %s4610_s28  ;;  %459 = vst.msk [vmem:[#allocation4 + $0xa8] sm:$0xff] %vm373_vm2, %v5088_v8  ;;  %460 = vst.msk [vmem:[#allocation4 + $0xb0] sm:$0xff] %vm373_vm2, %v5090_v9  ;;  %v5100_v11 = vld [vmem:[#allocation2 + $0xe1] sm:$0xff]  ;;  %v5116_v14 = vld [vmem:[#allocation2 + $0x109] sm:$0xff] }
  0x6b   : > { %461 = vst.msk [vmem:[#allocation4 + $0xb8] sm:$0xff] %vm373_vm2, %v5098_v10  ;;  %v5106_v12 = vld [vmem:[#allocation2 + $0x120] sm:$0xff]  ;;  %v5108_v13 = vld [vmem:[#allocation2 + $0x128] sm:$0xff]  ;;  %v5120_v15 = vld [vmem:[#allocation2 + $0x138] sm:$0xff] }
  0x6c   : > { %562 = vrot.lane.b32.xlu0 %v4986_v44, %s4610_s28  ;;  %462 = vst.msk [vmem:[#allocation4 + $0xc0] sm:$0xff] %vm373_vm2, %v5106_v12  ;;  %463 = vst.msk [vmem:[#allocation4 + $0xc8] sm:$0xff] %vm373_vm2, %v5108_v13  ;;  %v5122_v16 = vld [vmem:[#allocation2 + $0x140] sm:$0xff]  ;;  %v5136_v19 = vld [vmem:[#allocation2 + $0x150] sm:$0xff] }
  0x6d   : > { %v5124_v17 = vld [vmem:[#allocation2 + $0xf9] sm:$0xff]  ;;  %464 = vst.msk [vmem:[#allocation4 + $0xd0] sm:$0xff] %vm373_vm2, %v5120_v15  ;;  %465 = vst.msk [vmem:[#allocation4 + $0xd8] sm:$0xff] %vm373_vm2, %v5122_v16  ;;  %v5132_v18 = vld [vmem:[#allocation2 + $0x121] sm:$0xff] }
  0x6e   : > { %560 = vrot.lane.b32.xlu1 %v4992_v47, %s4610_s28  ;;  %v5138_v20 = vld [vmem:[#allocation2 + $0x158] sm:$0xff]  ;;  %466 = vst.msk [vmem:[#allocation4 + $0xe0] sm:$0xff] %vm373_vm2, %v5136_v19  ;;  %v5152_v23 = vld [vmem:[#allocation2 + $0x168] sm:$0xff]  ;;  %v5154_v24 = vld [vmem:[#allocation2 + $0x170] sm:$0xff] }
  0x6f   : > { %v5140_v21 = vld [vmem:[#allocation2 + $0x111] sm:$0xff]  ;;  %467 = vst.msk [vmem:[#allocation4 + $0xe8] sm:$0xff] %vm373_vm2, %v5138_v20  ;;  %v5148_v22 = vld [vmem:[#allocation2 + $0x139] sm:$0xff]  ;;  %v5156_v26 = vld [vmem:[#allocation2 + $0x129] sm:$0xff] }
  0x70   : > { %566 = vrot.lane.b32.xlu0 %v4999_v49, %s4610_s28  ;;  %468 = vst.msk [vmem:[#allocation4 + $0xf0] sm:$0xff] %vm373_vm2, %v5152_v23  ;;  %469 = vst.msk [vmem:[#allocation4 + $0xf8] sm:$0xff] %vm373_vm2, %v5154_v24  ;;  %v5164_v27 = vld [vmem:[#allocation2 + $0x151] sm:$0xff]  ;;  %v5168_v33 = vld [vmem:[#allocation2 + $0x141] sm:$0xff] }
  0x71   : > { %6997 = vst [vmem:[#allocation5_spill] sm:$0xff] %v5168_v33  ;;  %v5172_v34 = vld [vmem:[#allocation2 + $0x169] sm:$0xff]  ;;  %v371_v36 = vld [vmem:[%s4659_s24 + $0xf8] sm:$0xff] }
  0x72   : > { %564 = vrot.lane.b32.xlu1 %v5004_v51, %s4610_s28  ;;  %6998 = vst [vmem:[#allocation6_spill] sm:$0xff] %v5172_v34  ;;  %v370_v35 = vld [vmem:[%s4659_s24 + $0xf0] sm:$0xff]  ;;  %405 = vst.msk [vmem:[#allocation2 + $0x189] sm:$0xff] %vm373_vm2, %v371_v36  ;;  %v5180_v38 = vld [vmem:[#allocation2 + $0x159] sm:$0xff] }
  0x73   : > { %404 = vst.msk [vmem:[#allocation2 + $0x181] sm:$0xff] %vm373_vm2, %v370_v35  ;;  %6999 = vst [vmem:[#allocation7_spill] sm:$0xff] %v5180_v38  ;;  %v663_v39 = vld [vmem:[#allocation2 + $0x2] sm:$0xff]  ;;  %v5186_v45 = vld [vmem:[#allocation2 + $0x171] sm:$0xff] }
  0x74   : > { %570 = vrot.lane.b32.xlu0 %v5014_v54, %s4610_s28  ;;  %7000 = vst [vmem:[#allocation8_spill] sm:$0xff] %v5186_v45  ;;  %v5189_v48 = vld [vmem:[#allocation2 + $0x1a] sm:$0xff]  ;;  %v664_v35 = vld [vmem:[#allocation2 + $0xa] sm:$0xff]  ;;  %v5195_v36 = vld [vmem:[#allocation2 + $0x32] sm:$0xff] }
  0x75   : > { %7001 = vst [vmem:[#allocation9_spill] sm:$0xff] %v5189_v48  ;;  %7002 = vst [vmem:[#allocation10_spill] sm:$0xff] %v5195_v36 }
  0x76   : > { %568 = vrot.lane.b32.xlu1 %v5048_v63, %s4610_s28 }
  0x78   : > { %574 = vrot.lane.b32.xlu0 %v5064_v3, %s4610_s28 }
  0x7a   : > { %572 = vrot.lane.b32.xlu1 %v5100_v11, %s4610_s28 }
  0x7c   : > { %578 = vrot.lane.b32.xlu0 %v5116_v14, %s4610_s28 }
  0x7e   : > { %576 = vrot.lane.b32.xlu1 %v5124_v17, %s4610_s28 }
  0x80   : > { %582 = vrot.lane.b32.xlu0 %v5132_v18, %s4610_s28 }
  0x82   : > { %580 = vrot.lane.b32.xlu1 %v5140_v21, %s4610_s28 }
  0x84   : > { %586 = vrot.lane.b32.xlu0 %v5148_v22, %s4610_s28 }
  0x86   : > { %584 = vrot.lane.b32.xlu1 %v5156_v26, %s4610_s28 }
  0x88   : > { %590 = vrot.lane.b32.xlu0 %v5164_v27, %s4610_s28 }
  0x8a   : > { %588 = vrot.lane.b32.xlu1 %v5168_v33, %s4610_s28 }
  0x8c   : > { %594 = vrot.lane.b32.xlu0 %v5172_v34, %s4610_s28  ;;  %v5198_v34 = vld [vmem:[#allocation2 + $0x22] sm:$0xff] }
  0x8d   : > { %7003 = vst [vmem:[#allocation11_spill] sm:$0xff] %v5198_v34 }
  0x8e   : > { %592 = vrot.lane.b32.xlu1 %v5180_v38, %s4610_s28  ;;  %v5202_v38 = vld [vmem:[#allocation2 + $0x4a] sm:$0xff] }
  0x8f   : > { %7004 = vst [vmem:[#allocation12_spill] sm:$0xff] %v5202_v38 }
  0x90   : > { %727 = vrot.lane.b32.xlu0 %v663_v39, %s4611_s29  ;;  %v5206_v39 = vld [vmem:[#allocation2 + $0x3a] sm:$0xff] }
  0x91   : > { %7005 = vst [vmem:[#allocation13_spill] sm:$0xff] %v5206_v39 }
  0x92   : > { %596 = vrot.lane.b32.xlu1 %v5186_v45, %s4610_s28  ;;  %v5282_v45 = vld [vmem:[#allocation2 + $0x13a] sm:$0xff] }
  0x94   : > { %731 = vrot.lane.b32.xlu0 %v5189_v48, %s4611_s29  ;;  %v5210_v48 = vld [vmem:[#allocation2 + $0x62] sm:$0xff] }
  0x95   : > { %7006 = vst [vmem:[#allocation14_spill] sm:$0xff] %v5210_v48 }
  0x96   : > { %729 = vrot.lane.b32.xlu1 %v664_v35, %s4611_s29  ;;  %v5214_v35 = vld [vmem:[#allocation2 + $0x52] sm:$0xff] }
  0x97   : > { %7007 = vst [vmem:[#allocation15_spill] sm:$0xff] %v5214_v35 }
  0x98   : > { %735 = vrot.lane.b32.xlu0 %v5195_v36, %s4611_s29  ;;  %v5218_v36 = vld [vmem:[#allocation2 + $0x7a] sm:$0xff] }
  0x99   : > { %7008 = vst [vmem:[#allocation16_spill] sm:$0xff] %v5218_v36 }
  0x9a   : > { %733 = vrot.lane.b32.xlu1 %v5198_v34, %s4611_s29  ;;  %v5222_v34 = vld [vmem:[#allocation2 + $0x6a] sm:$0xff] }
  0x9b   : > { %7009 = vst [vmem:[#allocation17_spill] sm:$0xff] %v5222_v34 }
  0x9c   : > { %739 = vrot.lane.b32.xlu0 %v5202_v38, %s4611_s29  ;;  %v5226_v38 = vld [vmem:[#allocation2 + $0x92] sm:$0xff] }
  0x9d   : > { %7010 = vst [vmem:[#allocation18_spill] sm:$0xff] %v5226_v38 }
  0x9e   : > { %737 = vrot.lane.b32.xlu1 %v5206_v39, %s4611_s29  ;;  %v5230_v39 = vld [vmem:[#allocation2 + $0x82] sm:$0xff] }
  0x9f   : > { %7011 = vst [vmem:[#allocation19_spill] sm:$0xff] %v5230_v39 }
  0xa0   : > { %743 = vrot.lane.b32.xlu0 %v5210_v48, %s4611_s29  ;;  %v5234_v48 = vld [vmem:[#allocation2 + $0xaa] sm:$0xff] }
  0xa1   : > { %7012 = vst [vmem:[#allocation20_spill] sm:$0xff] %v5234_v48 }
  0xa2   : > { %741 = vrot.lane.b32.xlu1 %v5214_v35, %s4611_s29  ;;  %v5238_v35 = vld [vmem:[#allocation2 + $0x9a] sm:$0xff] }
  0xa3   : > { %7013 = vst [vmem:[#allocation21_spill] sm:$0xff] %v5238_v35 }
  0xa4   : > { %747 = vrot.lane.b32.xlu0 %v5218_v36, %s4611_s29  ;;  %v5242_v36 = vld [vmem:[#allocation2 + $0xc2] sm:$0xff] }
  0xa5   : > { %7014 = vst [vmem:[#allocation22_spill] sm:$0xff] %v5242_v36 }
  0xa6   : > { %745 = vrot.lane.b32.xlu1 %v5222_v34, %s4611_s29  ;;  %v5246_v34 = vld [vmem:[#allocation2 + $0xb2] sm:$0xff] }
  0xa7   : > { %7015 = vst [vmem:[#allocation23_spill] sm:$0xff] %v5246_v34 }
  0xa8   : > { %751 = vrot.lane.b32.xlu0 %v5226_v38, %s4611_s29  ;;  %v5250_v38 = vld [vmem:[#allocation2 + $0xda] sm:$0xff] }
  0xa9   : > { %7016 = vst [vmem:[#allocation24_spill] sm:$0xff] %v5250_v38 }
  0xaa   : > { %749 = vrot.lane.b32.xlu1 %v5230_v39, %s4611_s29  ;;  %v5254_v39 = vld [vmem:[#allocation2 + $0xca] sm:$0xff] }
  0xab   : > { %7017 = vst [vmem:[#allocation25_spill] sm:$0xff] %v5254_v39 }
  0xac   : > { %755 = vrot.lane.b32.xlu0 %v5234_v48, %s4611_s29  ;;  %v5258_v48 = vld [vmem:[#allocation2 + $0xf2] sm:$0xff] }
  0xad   : > { %7018 = vst [vmem:[#allocation26_spill] sm:$0xff] %v5258_v48 }
  0xae   : > { %753 = vrot.lane.b32.xlu1 %v5238_v35, %s4611_s29  ;;  %v5262_v35 = vld [vmem:[#allocation2 + $0xe2] sm:$0xff] }
  0xaf   : > { %7019 = vst [vmem:[#allocation27_spill] sm:$0xff] %v5262_v35 }
  0xb0   : > { %759 = vrot.lane.b32.xlu0 %v5242_v36, %s4611_s29  ;;  %v5266_v36 = vld [vmem:[#allocation2 + $0x10a] sm:$0xff] }
  0xb1   : > { %7020 = vst [vmem:[#allocation28_spill] sm:$0xff] %v5266_v36 }
  0xb2   : > { %757 = vrot.lane.b32.xlu1 %v5246_v34, %s4611_s29  ;;  %v5270_v34 = vld [vmem:[#allocation2 + $0xfa] sm:$0xff] }
  0xb3   : > { %7021 = vst [vmem:[#allocation29_spill] sm:$0xff] %v5270_v34 }
  0xb4   : > { %763 = vrot.lane.b32.xlu0 %v5250_v38, %s4611_s29  ;;  %v5274_v38 = vld [vmem:[#allocation2 + $0x122] sm:$0xff] }
  0xb5   : > { %7022 = vst [vmem:[#allocation30_spill] sm:$0xff] %v5274_v38 }
  0xb6   : > { %761 = vrot.lane.b32.xlu1 %v5254_v39, %s4611_s29  ;;  %v5278_v39 = vld [vmem:[#allocation2 + $0x112] sm:$0xff] }
  0xb7   : > { %7023 = vst [vmem:[#allocation31_spill] sm:$0xff] %v5278_v39 }
  0xb8   : > { %767 = vrot.lane.b32.xlu0 %v5258_v48, %s4611_s29 }
  0xba   : > { %765 = vrot.lane.b32.xlu1 %v5262_v35, %s4611_s29  ;;  %v5291_v35 = vld [vmem:[#allocation2 + $0x152] sm:$0xff] }
  0xbb   : > { %7025 = vst [vmem:[#allocation33_spill] sm:$0xff] %v5291_v35 }
  0xbc   : > { %771 = vrot.lane.b32.xlu0 %v5266_v36, %s4611_s29  ;;  %v5287_v36 = vld [vmem:[#allocation2 + $0x12a] sm:$0xff] }
  0xbd   : > { %v535_v48 = vpop.permute.xlu0 %534  ;;  %7024 = vst [vmem:[#allocation32_spill] sm:$0xff] %v5287_v36 }
  0xbe   : > { %769 = vrot.lane.b32.xlu1 %v5270_v34, %s4611_s29  ;;  %631 = vst.msk [vmem:[#allocation4] sm:$0xff] %vm630_vm3, %v535_v48 }
  0xc0   : > { %775 = vrot.lane.b32.xlu0 %v5274_v38, %s4611_s29  ;;  %v5296_v38 = vld [vmem:[#allocation2 + $0x142] sm:$0xff] }
  0xc1   : > { %v537_v34 = vpop.permute.xlu0 %536  ;;  %7026 = vst [vmem:[#allocation34_spill] sm:$0xff] %v5296_v38 }
  0xc2   : > { %773 = vrot.lane.b32.xlu1 %v5278_v39, %s4611_s29  ;;  %632 = vst.msk [vmem:[#allocation4 + $0x8] sm:$0xff] %vm630_vm3, %v537_v34  ;;  %v5300_v39 = vld [vmem:[#allocation2 + $0x16a] sm:$0xff]  ;;  %v5306_v34 = vld [vmem:[#allocation2 + $0x15a] sm:$0xff] }
  0xc4   : > { %779 = vrot.lane.b32.xlu0 %v5282_v45, %s4611_s29 }
  0xc6   : > { %777 = vrot.lane.b32.xlu1 %v5287_v36, %s4611_s29 }
  0xc8   : > { %783 = vrot.lane.b32.xlu0 %v5291_v35, %s4611_s29  ;;  %v539_v48 = vpop.permute.xlu1 %538 }
  0xc9   : > { %633 = vst.msk [vmem:[#allocation4 + $0x10] sm:$0xff] %vm630_vm3, %v539_v48  ;;  %v5314_v48 = vld [vmem:[#allocation2 + $0x172] sm:$0xff] }
  0xca   : > { %v543_v33 = vpop.permute.xlu0 %542  ;;  %781 = vrot.lane.b32.xlu1 %v5296_v38, %s4611_s29 }
  0xcb   : > { %635 = vst.msk [vmem:[#allocation4 + $0x20] sm:$0xff] %vm630_vm3, %v543_v33 }
  0xcc   : > { %787 = vrot.lane.b32.xlu0 %v5300_v39, %s4611_s29  ;;  %v541_v36 = vpop.permute.xlu1 %540 }
  0xcd   : > { %634 = vst.msk [vmem:[#allocation4 + $0x18] sm:$0xff] %vm630_vm3, %v541_v36 }
  0xce   : > { %v547_v35 = vpop.permute.xlu0 %546  ;;  %785 = vrot.lane.b32.xlu1 %v5306_v34, %s4611_s29 }
  0xcf   : > { %637 = vst.msk [vmem:[#allocation4 + $0x30] sm:$0xff] %vm630_vm3, %v547_v35 }
  0xd0   : > { %920 = vrot.lane.b32.xlu0 %v4990_v46, %s4612_s30  ;;  %v545_v33 = vpop.permute.xlu1 %544 }
  0xd1   : > { %636 = vst.msk [vmem:[#allocation4 + $0x28] sm:$0xff] %vm630_vm3, %v545_v33 }
  0xd2   : > { %v551_v38 = vpop.permute.xlu0 %550  ;;  %789 = vrot.lane.b32.xlu1 %v5314_v48, %s4611_s29 }
  0xd3   : > { %639 = vst.msk [vmem:[#allocation4 + $0x40] sm:$0xff] %vm630_vm3, %v551_v38 }
  0xd4   : > { %924 = vrot.lane.b32.xlu0 %v5008_v52, %s4612_s30  ;;  %v549_v36 = vpop.permute.xlu1 %548 }
  0xd5   : > { %638 = vst.msk [vmem:[#allocation4 + $0x38] sm:$0xff] %vm630_vm3, %v549_v36 }
  0xd6   : > { %v555_v35 = vpop.permute.xlu0 %554  ;;  %922 = vrot.lane.b32.xlu1 %v5002_v50, %s4612_s30 }
  0xd7   : > { %641 = vst.msk [vmem:[#allocation4 + $0x50] sm:$0xff] %vm630_vm3, %v555_v35 }
  0xd8   : > { %928 = vrot.lane.b32.xlu0 %v5020_v55, %s4612_s30  ;;  %v553_v46 = vpop.permute.xlu1 %552 }
  0xd9   : > { %640 = vst.msk [vmem:[#allocation4 + $0x48] sm:$0xff] %vm630_vm3, %v553_v46 }
  0xda   : > { %v559_v33 = vpop.permute.xlu0 %558  ;;  %926 = vrot.lane.b32.xlu1 %v5010_v53, %s4612_s30 }
  0xdb   : > { %643 = vst.msk [vmem:[#allocation4 + $0x60] sm:$0xff] %vm630_vm3, %v559_v33 }
  0xdc   : > { %932 = vrot.lane.b32.xlu0 %v5030_v57, %s4612_s30  ;;  %v557_v38 = vpop.permute.xlu1 %556 }
  0xdd   : > { %642 = vst.msk [vmem:[#allocation4 + $0x58] sm:$0xff] %vm630_vm3, %v557_v38 }
  0xde   : > { %v563_v50 = vpop.permute.xlu0 %562  ;;  %930 = vrot.lane.b32.xlu1 %v5022_v56, %s4612_s30 }
  0xdf   : > { %645 = vst.msk [vmem:[#allocation4 + $0x70] sm:$0xff] %vm630_vm3, %v563_v50 }
  0xe0   : > { %936 = vrot.lane.b32.xlu0 %v5034_v59, %s4612_s30  ;;  %v561_v36 = vpop.permute.xlu1 %560 }
  0xe1   : > { %644 = vst.msk [vmem:[#allocation4 + $0x68] sm:$0xff] %vm630_vm3, %v561_v36 }
  0xe2   : > { %v567_v35 = vpop.permute.xlu0 %566  ;;  %934 = vrot.lane.b32.xlu1 %v5032_v58, %s4612_s30 }
  0xe3   : > { %647 = vst.msk [vmem:[#allocation4 + $0x80] sm:$0xff] %vm630_vm3, %v567_v35 }
  0xe4   : > { %940 = vrot.lane.b32.xlu0 %v5044_v61, %s4612_s30  ;;  %v565_v46 = vpop.permute.xlu1 %564 }
  0xe5   : > { %646 = vst.msk [vmem:[#allocation4 + $0x78] sm:$0xff] %vm630_vm3, %v565_v46 }
  0xe6   : > { %v571_v33 = vpop.permute.xlu0 %570  ;;  %938 = vrot.lane.b32.xlu1 %v5042_v60, %s4612_s30 }
  0xe7   : > { %649 = vst.msk [vmem:[#allocation4 + $0x90] sm:$0xff] %vm630_vm3, %v571_v33 }
  0xe8   : > { %944 = vrot.lane.b32.xlu0 %v5056_v0, %s4612_s30  ;;  %v569_v38 = vpop.permute.xlu1 %568 }
  0xe9   : > { %648 = vst.msk [vmem:[#allocation4 + $0x88] sm:$0xff] %vm630_vm3, %v569_v38 }
  0xea   : > { %v575_v50 = vpop.permute.xlu0 %574  ;;  %942 = vrot.lane.b32.xlu1 %v5046_v62, %s4612_s30 }
  0xeb   : > { %651 = vst.msk [vmem:[#allocation4 + $0xa0] sm:$0xff] %vm630_vm3, %v575_v50 }
  0xec   : > { %948 = vrot.lane.b32.xlu0 %v5060_v2, %s4612_s30  ;;  %v573_v36 = vpop.permute.xlu1 %572 }
  0xed   : > { %650 = vst.msk [vmem:[#allocation4 + $0x98] sm:$0xff] %vm630_vm3, %v573_v36 }
  0xee   : > { %v579_v35 = vpop.permute.xlu0 %578  ;;  %946 = vrot.lane.b32.xlu1 %v5058_v1, %s4612_s30 }
  0xef   : > { %653 = vst.msk [vmem:[#allocation4 + $0xb0] sm:$0xff] %vm630_vm3, %v579_v35 }
  0xf0   : > { %952 = vrot.lane.b32.xlu0 %v5074_v5, %s4612_s30  ;;  %v577_v46 = vpop.permute.xlu1 %576 }
  0xf1   : > { %652 = vst.msk [vmem:[#allocation4 + $0xa8] sm:$0xff] %vm630_vm3, %v577_v46 }
  0xf2   : > { %v583_v33 = vpop.permute.xlu0 %582  ;;  %950 = vrot.lane.b32.xlu1 %v5072_v4, %s4612_s30 }
  0xf3   : > { %655 = vst.msk [vmem:[#allocation4 + $0xc0] sm:$0xff] %vm630_vm3, %v583_v33 }
  0xf4   : > { %956 = vrot.lane.b32.xlu0 %v5086_v7, %s4612_s30  ;;  %v581_v38 = vpop.permute.xlu1 %580 }
  0xf5   : > { %654 = vst.msk [vmem:[#allocation4 + $0xb8] sm:$0xff] %vm630_vm3, %v581_v38 }
  0xf6   : > { %v587_v50 = vpop.permute.xlu0 %586  ;;  %954 = vrot.lane.b32.xlu1 %v5076_v6, %s4612_s30 }
  0xf7   : > { %657 = vst.msk [vmem:[#allocation4 + $0xd0] sm:$0xff] %vm630_vm3, %v587_v50 }
  0xf8   : > { %960 = vrot.lane.b32.xlu0 %v5090_v9, %s4612_s30  ;;  %v585_v36 = vpop.permute.xlu1 %584 }
  0xf9   : > { %656 = vst.msk [vmem:[#allocation4 + $0xc8] sm:$0xff] %vm630_vm3, %v585_v36 }
  0xfa   : > { %v591_v35 = vpop.permute.xlu0 %590  ;;  %958 = vrot.lane.b32.xlu1 %v5088_v8, %s4612_s30 }
  0xfb   : > { %659 = vst.msk [vmem:[#allocation4 + $0xe0] sm:$0xff] %vm630_vm3, %v591_v35 }
  0xfc   : > { %964 = vrot.lane.b32.xlu0 %v5106_v12, %s4612_s30  ;;  %v589_v46 = vpop.permute.xlu1 %588 }
  0xfd   : > { %658 = vst.msk [vmem:[#allocation4 + $0xd8] sm:$0xff] %vm630_vm3, %v589_v46 }
  0xfe   : > { %v595_v33 = vpop.permute.xlu0 %594  ;;  %962 = vrot.lane.b32.xlu1 %v5098_v10, %s4612_s30 }
  0xff   : > { %661 = vst.msk [vmem:[#allocation4 + $0xf0] sm:$0xff] %vm630_vm3, %v595_v33  ;;  %v5402_v33 = vld [vmem:[#allocation2 + $0x180] sm:$0xff] }
 0x100   : > { %968 = vrot.lane.b32.xlu0 %v5120_v15, %s4612_s30  ;;  %v593_v38 = vpop.permute.xlu1 %592 }
 0x101   : > { %660 = vst.msk [vmem:[#allocation4 + $0xe8] sm:$0xff] %vm630_vm3, %v593_v38 }
 0x102   : > { %v728_v50 = vpop.permute.xlu0 %727  ;;  %966 = vrot.lane.b32.xlu1 %v5108_v13, %s4612_s30 }
 0x103   : > { %824 = vst.msk [vmem:[#allocation4] sm:$0xff] %vm823_vm4, %v728_v50 }
 0x104   : > { %972 = vrot.lane.b32.xlu0 %v5136_v19, %s4612_s30  ;;  %v597_v36 = vpop.permute.xlu1 %596 }
 0x105   : > { %662 = vst.msk [vmem:[#allocation4 + $0xf8] sm:$0xff] %vm630_vm3, %v597_v36 }
 0x106   : > { %v732_v35 = vpop.permute.xlu0 %731  ;;  %970 = vrot.lane.b32.xlu1 %v5122_v16, %s4612_s30 }
 0x107   : > { %826 = vst.msk [vmem:[#allocation4 + $0x10] sm:$0xff] %vm823_vm4, %v732_v35  ;;  %v5414_v35 = vld [vmem:[#allocation2 + $0x188] sm:$0xff] }
 0x108   : > { %976 = vrot.lane.b32.xlu0 %v5152_v23, %s4612_s30  ;;  %v730_v46 = vpop.permute.xlu1 %729 }
 0x109   : > { %825 = vst.msk [vmem:[#allocation4 + $0x8] sm:$0xff] %vm823_vm4, %v730_v46 }
 0x10a   : > { %v736_v38 = vpop.permute.xlu0 %735  ;;  %974 = vrot.lane.b32.xlu1 %v5138_v20, %s4612_s30 }
 0x10b   : > { %828 = vst.msk [vmem:[#allocation4 + $0x20] sm:$0xff] %vm823_vm4, %v736_v38 }
 0x10c   : > { %980 = vrot.lane.b32.xlu0 %v5402_v33, %s4612_s30  ;;  %v734_v50 = vpop.permute.xlu1 %733 }
 0x10d   : > { %827 = vst.msk [vmem:[#allocation4 + $0x18] sm:$0xff] %vm823_vm4, %v734_v50 }
 0x10e   : > { %v740_v36 = vpop.permute.xlu0 %739  ;;  %978 = vrot.lane.b32.xlu1 %v5154_v24, %s4612_s30 }
 0x10f   : > { %830 = vst.msk [vmem:[#allocation4 + $0x30] sm:$0xff] %vm823_vm4, %v740_v36 }
 0x110   : > { %1113 = vrot.lane.b32.xlu0 %v4925_v25, %s4613_s6  ;;  %v738_v46 = vpop.permute.xlu1 %737 }
 0x111   : > { %829 = vst.msk [vmem:[#allocation4 + $0x28] sm:$0xff] %vm823_vm4, %v738_v46 }
 0x112   : > { %v744_v38 = vpop.permute.xlu0 %743  ;;  %982 = vrot.lane.b32.xlu1 %v5414_v35, %s4612_s30 }
 0x113   : > { %832 = vst.msk [vmem:[#allocation4 + $0x40] sm:$0xff] %vm823_vm4, %v744_v38  ;;  %v7027_v38 = vld [vmem:[#allocation5_spill] sm:$0xff] }
 0x114   : > { %1117 = vrot.lane.b32.xlu0 %v4934_v28, %s4613_s6  ;;  %v742_v50 = vpop.permute.xlu1 %741 }
 0x115   : > { %831 = vst.msk [vmem:[#allocation4 + $0x38] sm:$0xff] %vm823_vm4, %v742_v50 }
 0x116   : > { %v748_v36 = vpop.permute.xlu0 %747  ;;  %1115 = vrot.lane.b32.xlu1 %v4938_v29, %s4613_s6 }
 0x117   : > { %834 = vst.msk [vmem:[#allocation4 + $0x50] sm:$0xff] %vm823_vm4, %v748_v36  ;;  %v5502_v36 = vld [vmem:[#allocation2 + $0x181] sm:$0xff] }
 0x118   : > { %1121 = vrot.lane.b32.xlu0 %v4942_v30, %s4613_s6  ;;  %v746_v25 = vpop.permute.xlu1 %745 }
 0x119   : > { %833 = vst.msk [vmem:[#allocation4 + $0x48] sm:$0xff] %vm823_vm4, %v746_v25 }
 0x11a   : > { %v752_v46 = vpop.permute.xlu0 %751  ;;  %1119 = vrot.lane.b32.xlu1 %v4946_v31, %s4613_s6 }
 0x11b   : > { %836 = vst.msk [vmem:[#allocation4 + $0x60] sm:$0xff] %vm823_vm4, %v752_v46 }
 0x11c   : > { %1125 = vrot.lane.b32.xlu0 %v4950_v32, %s4613_s6  ;;  %v750_v28 = vpop.permute.xlu1 %749 }
 0x11d   : > { %835 = vst.msk [vmem:[#allocation4 + $0x58] sm:$0xff] %vm823_vm4, %v750_v28  ;;  %v7030_v28 = vld [vmem:[#allocation8_spill] sm:$0xff] }
 0x11e   : > { %v756_v29 = vpop.permute.xlu0 %755  ;;  %1123 = vrot.lane.b32.xlu1 %v4959_v37, %s4613_s6 }
 0x11f   : > { %838 = vst.msk [vmem:[#allocation4 + $0x70] sm:$0xff] %vm823_vm4, %v756_v29  ;;  %v5514_v29 = vld [vmem:[#allocation2 + $0x189] sm:$0xff] }
 0x120   : > { %1129 = vrot.lane.b32.xlu0 %v4968_v40, %s4613_s6  ;;  %v754_v30 = vpop.permute.xlu1 %753 }
 0x121   : > { %837 = vst.msk [vmem:[#allocation4 + $0x68] sm:$0xff] %vm823_vm4, %v754_v30  ;;  %v7031_v30 = vld [vmem:[#allocation9_spill] sm:$0xff] }
 0x122   : > { %v760_v31 = vpop.permute.xlu0 %759  ;;  %1127 = vrot.lane.b32.xlu1 %v4974_v41, %s4613_s6 }
 0x123   : > { %840 = vst.msk [vmem:[#allocation4 + $0x80] sm:$0xff] %vm823_vm4, %v760_v31 }
 0x124   : > { %1133 = vrot.lane.b32.xlu0 %v4978_v42, %s4613_s6  ;;  %v758_v32 = vpop.permute.xlu1 %757 }
 0x125   : > { %839 = vst.msk [vmem:[#allocation4 + $0x78] sm:$0xff] %vm823_vm4, %v758_v32 }
 0x126   : > { %v764_v37 = vpop.permute.xlu0 %763  ;;  %1131 = vrot.lane.b32.xlu1 %v4982_v43, %s4613_s6 }
 0x127   : > { %842 = vst.msk [vmem:[#allocation4 + $0x90] sm:$0xff] %vm823_vm4, %v764_v37  ;;  %v7032_v37 = vld [vmem:[#allocation10_spill] sm:$0xff] }
 0x128   : > { %1137 = vrot.lane.b32.xlu0 %v4986_v44, %s4613_s6  ;;  %v762_v40 = vpop.permute.xlu1 %761 }
 0x129   : > { %841 = vst.msk [vmem:[#allocation4 + $0x88] sm:$0xff] %vm823_vm4, %v762_v40 }
 0x12a   : > { %v768_v41 = vpop.permute.xlu0 %767  ;;  %1135 = vrot.lane.b32.xlu1 %v4992_v47, %s4613_s6 }
 0x12b   : > { %844 = vst.msk [vmem:[#allocation4 + $0xa0] sm:$0xff] %vm823_vm4, %v768_v41 }
 0x12c   : > { %1141 = vrot.lane.b32.xlu0 %v4999_v49, %s4613_s6  ;;  %v766_v42 = vpop.permute.xlu1 %765 }
 0x12d   : > { %843 = vst.msk [vmem:[#allocation4 + $0x98] sm:$0xff] %vm823_vm4, %v766_v42  ;;  %v7033_v42 = vld [vmem:[#allocation11_spill] sm:$0xff] }
 0x12e   : > { %v772_v43 = vpop.permute.xlu0 %771  ;;  %1139 = vrot.lane.b32.xlu1 %v5004_v51, %s4613_s6 }
 0x12f   : > { %846 = vst.msk [vmem:[#allocation4 + $0xb0] sm:$0xff] %vm823_vm4, %v772_v43  ;;  %v7034_v43 = vld [vmem:[#allocation12_spill] sm:$0xff] }
 0x130   : > { %1145 = vrot.lane.b32.xlu0 %v5014_v54, %s4613_s6  ;;  %v770_v44 = vpop.permute.xlu1 %769 }
 0x131   : > { %845 = vst.msk [vmem:[#allocation4 + $0xa8] sm:$0xff] %vm823_vm4, %v770_v44 }
 0x132   : > { %v776_v47 = vpop.permute.xlu0 %775  ;;  %1143 = vrot.lane.b32.xlu1 %v5048_v63, %s4613_s6 }
 0x133   : > { %848 = vst.msk [vmem:[#allocation4 + $0xc0] sm:$0xff] %vm823_vm4, %v776_v47 }
 0x134   : > { %1149 = vrot.lane.b32.xlu0 %v5064_v3, %s4613_s6  ;;  %v774_v49 = vpop.permute.xlu1 %773 }
 0x135   : > { %847 = vst.msk [vmem:[#allocation4 + $0xb8] sm:$0xff] %vm823_vm4, %v774_v49  ;;  %v7035_v49 = vld [vmem:[#allocation13_spill] sm:$0xff] }
 0x136   : > { %v780_v51 = vpop.permute.xlu0 %779  ;;  %1147 = vrot.lane.b32.xlu1 %v5100_v11, %s4613_s6 }
 0x137   : > { %850 = vst.msk [vmem:[#allocation4 + $0xd0] sm:$0xff] %vm823_vm4, %v780_v51  ;;  %v7036_v51 = vld [vmem:[#allocation14_spill] sm:$0xff] }
 0x138   : > { %1153 = vrot.lane.b32.xlu0 %v5116_v14, %s4613_s6  ;;  %v778_v54 = vpop.permute.xlu1 %777 }
 0x139   : > { %849 = vst.msk [vmem:[#allocation4 + $0xc8] sm:$0xff] %vm823_vm4, %v778_v54 }
 0x13a   : > { %v784_v63 = vpop.permute.xlu0 %783  ;;  %1151 = vrot.lane.b32.xlu1 %v5124_v17, %s4613_s6 }
 0x13b   : > { %852 = vst.msk [vmem:[#allocation4 + $0xe0] sm:$0xff] %vm823_vm4, %v784_v63 }
 0x13c   : > { %1157 = vrot.lane.b32.xlu0 %v5132_v18, %s4613_s6  ;;  %v782_v3 = vpop.permute.xlu1 %781 }
 0x13d   : > { %851 = vst.msk [vmem:[#allocation4 + $0xd8] sm:$0xff] %vm823_vm4, %v782_v3  ;;  %v7037_v3 = vld [vmem:[#allocation15_spill] sm:$0xff] }
 0x13e   : > { %v788_v11 = vpop.permute.xlu0 %787  ;;  %1155 = vrot.lane.b32.xlu1 %v5140_v21, %s4613_s6 }
 0x13f   : > { %854 = vst.msk [vmem:[#allocation4 + $0xf0] sm:$0xff] %vm823_vm4, %v788_v11  ;;  %v7038_v11 = vld [vmem:[#allocation16_spill] sm:$0xff] }
 0x140   : > { %1161 = vrot.lane.b32.xlu0 %v5148_v22, %s4613_s6  ;;  %v786_v14 = vpop.permute.xlu1 %785  ;;  %v7028_v22 = vld [vmem:[#allocation6_spill] sm:$0xff] }
 0x141   : > { %853 = vst.msk [vmem:[#allocation4 + $0xe8] sm:$0xff] %vm823_vm4, %v786_v14 }
 0x142   : > { %v921_v17 = vpop.permute.xlu0 %920  ;;  %1159 = vrot.lane.b32.xlu1 %v5156_v26, %s4613_s6 }
 0x143   : > { %1017 = vst.msk [vmem:[#allocation4] sm:$0xff] %vm1016_vm5, %v921_v17 }
 0x144   : > { %1165 = vrot.lane.b32.xlu0 %v5164_v27, %s4613_s6  ;;  %v790_v18 = vpop.permute.xlu1 %789  ;;  %v7029_v27 = vld [vmem:[#allocation7_spill] sm:$0xff] }
 0x145   : > { %855 = vst.msk [vmem:[#allocation4 + $0xf8] sm:$0xff] %vm823_vm4, %v790_v18  ;;  %v7039_v18 = vld [vmem:[#allocation17_spill] sm:$0xff] }
 0x146   : > { %v925_v21 = vpop.permute.xlu0 %924  ;;  %1163 = vrot.lane.b32.xlu1 %v7027_v38, %s4613_s6 }
 0x147   : > { %1019 = vst.msk [vmem:[#allocation4 + $0x10] sm:$0xff] %vm1016_vm5, %v925_v21  ;;  %v7040_v21 = vld [vmem:[#allocation18_spill] sm:$0xff] }
 0x148   : > { %1169 = vrot.lane.b32.xlu0 %v7028_v22, %s4613_s6  ;;  %v923_v50 = vpop.permute.xlu1 %922 }
 0x149   : > { %1018 = vst.msk [vmem:[#allocation4 + $0x8] sm:$0xff] %vm1016_vm5, %v923_v50  ;;  %v7041_v50 = vld [vmem:[#allocation19_spill] sm:$0xff] }
 0x14a   : > { %v929_v26 = vpop.permute.xlu0 %928  ;;  %1167 = vrot.lane.b32.xlu1 %v7029_v27, %s4613_s6 }
 0x14b   : > { %1021 = vst.msk [vmem:[#allocation4 + $0x20] sm:$0xff] %vm1016_vm5, %v929_v26  ;;  %v7042_v26 = vld [vmem:[#allocation20_spill] sm:$0xff] }
 0x14c   : > { %1173 = vrot.lane.b32.xlu0 %v5502_v36, %s4613_s6  ;;  %v927_v25 = vpop.permute.xlu1 %926 }
 0x14d   : > { %1020 = vst.msk [vmem:[#allocation4 + $0x18] sm:$0xff] %vm1016_vm5, %v927_v25 }
 0x14e   : > { %v933_v46 = vpop.permute.xlu0 %932  ;;  %1171 = vrot.lane.b32.xlu1 %v7030_v28, %s4613_s6  ;;  %v7044_v28 = vld [vmem:[#allocation22_spill] sm:$0xff] }
 0x14f   : > { %1023 = vst.msk [vmem:[#allocation4 + $0x30] sm:$0xff] %vm1016_vm5, %v933_v46  ;;  %v7043_v46 = vld [vmem:[#allocation21_spill] sm:$0xff] }
 0x150   : > { %1306 = vrot.lane.b32.xlu0 %v7031_v30, %s4614_s7  ;;  %v931_v31 = vpop.permute.xlu1 %930 }
 0x151   : > { %1022 = vst.msk [vmem:[#allocation4 + $0x28] sm:$0xff] %vm1016_vm5, %v931_v31 }
 0x152   : > { %v937_v32 = vpop.permute.xlu0 %936  ;;  %1175 = vrot.lane.b32.xlu1 %v5514_v29, %s4613_s6 }
 0x153   : > { %1025 = vst.msk [vmem:[#allocation4 + $0x40] sm:$0xff] %vm1016_vm5, %v937_v32  ;;  %v7045_v32 = vld [vmem:[#allocation23_spill] sm:$0xff] }
 0x154   : > { %1310 = vrot.lane.b32.xlu0 %v7032_v37, %s4614_s7  ;;  %v935_v40 = vpop.permute.xlu1 %934  ;;  %v7046_v37 = vld [vmem:[#allocation24_spill] sm:$0xff] }
 0x155   : > { %1024 = vst.msk [vmem:[#allocation4 + $0x38] sm:$0xff] %vm1016_vm5, %v935_v40 }
 0x156   : > { %v941_v41 = vpop.permute.xlu0 %940  ;;  %1308 = vrot.lane.b32.xlu1 %v7033_v42, %s4614_s7  ;;  %v7047_v42 = vld [vmem:[#allocation25_spill] sm:$0xff] }
 0x157   : > { %1027 = vst.msk [vmem:[#allocation4 + $0x50] sm:$0xff] %vm1016_vm5, %v941_v41 }
 0x158   : > { %1314 = vrot.lane.b32.xlu0 %v7034_v43, %s4614_s7  ;;  %v939_v44 = vpop.permute.xlu1 %938  ;;  %v7048_v43 = vld [vmem:[#allocation26_spill] sm:$0xff] }
 0x159   : > { %1026 = vst.msk [vmem:[#allocation4 + $0x48] sm:$0xff] %vm1016_vm5, %v939_v44 }
 0x15a   : > { %v945_v47 = vpop.permute.xlu0 %944  ;;  %1312 = vrot.lane.b32.xlu1 %v7035_v49, %s4614_s7  ;;  %v7049_v49 = vld [vmem:[#allocation27_spill] sm:$0xff] }
 0x15b   : > { %1029 = vst.msk [vmem:[#allocation4 + $0x60] sm:$0xff] %vm1016_vm5, %v945_v47 }
 0x15c   : > { %1318 = vrot.lane.b32.xlu0 %v7036_v51, %s4614_s7  ;;  %v943_v54 = vpop.permute.xlu1 %942  ;;  %v7050_v51 = vld [vmem:[#allocation28_spill] sm:$0xff] }
 0x15d   : > { %1028 = vst.msk [vmem:[#allocation4 + $0x58] sm:$0xff] %vm1016_vm5, %v943_v54 }
 0x15e   : > { %v949_v63 = vpop.permute.xlu0 %948  ;;  %1316 = vrot.lane.b32.xlu1 %v7037_v3, %s4614_s7  ;;  %v7051_v3 = vld [vmem:[#allocation29_spill] sm:$0xff] }
 0x15f   : > { %1031 = vst.msk [vmem:[#allocation4 + $0x70] sm:$0xff] %vm1016_vm5, %v949_v63 }
 0x160   : > { %1322 = vrot.lane.b32.xlu0 %v7038_v11, %s4614_s7  ;;  %v947_v14 = vpop.permute.xlu1 %946  ;;  %v7052_v11 = vld [vmem:[#allocation30_spill] sm:$0xff] }
 0x161   : > { %1030 = vst.msk [vmem:[#allocation4 + $0x68] sm:$0xff] %vm1016_vm5, %v947_v14 }
 0x162   : > { %v953_v17 = vpop.permute.xlu0 %952  ;;  %1320 = vrot.lane.b32.xlu1 %v7039_v18, %s4614_s7  ;;  %v7053_v18 = vld [vmem:[#allocation31_spill] sm:$0xff] }
 0x163   : > { %1033 = vst.msk [vmem:[#allocation4 + $0x80] sm:$0xff] %vm1016_vm5, %v953_v17 }
 0x164   : > { %1326 = vrot.lane.b32.xlu0 %v7040_v21, %s4614_s7  ;;  %v951_v38 = vpop.permute.xlu1 %950 }
 0x165   : > { %1032 = vst.msk [vmem:[#allocation4 + $0x78] sm:$0xff] %vm1016_vm5, %v951_v38 }
 0x166   : > { %v957_v22 = vpop.permute.xlu0 %956  ;;  %1324 = vrot.lane.b32.xlu1 %v7041_v50, %s4614_s7  ;;  %v7055_v50 = vld [vmem:[#allocation33_spill] sm:$0xff] }
 0x167   : > { %1035 = vst.msk [vmem:[#allocation4 + $0x90] sm:$0xff] %vm1016_vm5, %v957_v22  ;;  %v7054_v22 = vld [vmem:[#allocation32_spill] sm:$0xff] }
 0x168   : > { %1330 = vrot.lane.b32.xlu0 %v7042_v26, %s4614_s7  ;;  %v955_v27 = vpop.permute.xlu1 %954 }
 0x169   : > { %1034 = vst.msk [vmem:[#allocation4 + $0x88] sm:$0xff] %vm1016_vm5, %v955_v27 }
 0x16a   : > { %v961_v25 = vpop.permute.xlu0 %960  ;;  %1328 = vrot.lane.b32.xlu1 %v7043_v46, %s4614_s7  ;;  %v5602_v46 = vld [vmem:[#allocation2 + $0x182] sm:$0xff] }
 0x16b   : > { %1037 = vst.msk [vmem:[#allocation4 + $0xa0] sm:$0xff] %vm1016_vm5, %v961_v25  ;;  %v7056_v25 = vld [vmem:[#allocation34_spill] sm:$0xff] }
 0x16c   : > { %1334 = vrot.lane.b32.xlu0 %v7044_v28, %s4614_s7  ;;  %v959_v30 = vpop.permute.xlu1 %958 }
 0x16d   : > { %1036 = vst.msk [vmem:[#allocation4 + $0x98] sm:$0xff] %vm1016_vm5, %v959_v30 }
 0x16e   : > { %v965_v31 = vpop.permute.xlu0 %964  ;;  %1332 = vrot.lane.b32.xlu1 %v7045_v32, %s4614_s7 }
 0x16f   : > { %1039 = vst.msk [vmem:[#allocation4 + $0xb0] sm:$0xff] %vm1016_vm5, %v965_v31 }
 0x170   : > { %1338 = vrot.lane.b32.xlu0 %v7046_v37, %s4614_s7  ;;  %v963_v40 = vpop.permute.xlu1 %962 }
 0x171   : > { %1038 = vst.msk [vmem:[#allocation4 + $0xa8] sm:$0xff] %vm1016_vm5, %v963_v40 }
 0x172   : > { %v969_v41 = vpop.permute.xlu0 %968  ;;  %1336 = vrot.lane.b32.xlu1 %v7047_v42, %s4614_s7  ;;  %v1629_v42 = vld [vmem:[#allocation2 + $0x31] sm:$0xff] }
 0x173   : > { %1041 = vst.msk [vmem:[#allocation4 + $0xc0] sm:$0xff] %vm1016_vm5, %v969_v41  ;;  %v1466_v41 = vld [vmem:[#allocation2 + $0x198] sm:$0xff] }
 0x174   : > { %1342 = vrot.lane.b32.xlu0 %v7048_v43, %s4614_s7  ;;  %v967_v44 = vpop.permute.xlu1 %966 }
 0x175   : > { %1040 = vst.msk [vmem:[#allocation4 + $0xb8] sm:$0xff] %vm1016_vm5, %v967_v44 }
 0x176   : > { %v973_v47 = vpop.permute.xlu0 %972  ;;  %1340 = vrot.lane.b32.xlu1 %v7049_v49, %s4614_s7 }
 0x177   : > { %1043 = vst.msk [vmem:[#allocation4 + $0xd0] sm:$0xff] %vm1016_vm5, %v973_v47  ;;  %v1630_v47 = vld [vmem:[#allocation2 + $0x39] sm:$0xff] }
 0x178   : > { %1346 = vrot.lane.b32.xlu0 %v7050_v51, %s4614_s7  ;;  %v971_v54 = vpop.permute.xlu1 %970 }
 0x179   : > { %1042 = vst.msk [vmem:[#allocation4 + $0xc8] sm:$0xff] %vm1016_vm5, %v971_v54  ;;  %v1632_v54 = vld [vmem:[#allocation2 + $0x51] sm:$0xff] }
 0x17a   : > { %v977_v63 = vpop.permute.xlu0 %976  ;;  %1344 = vrot.lane.b32.xlu1 %v7051_v3, %s4614_s7  ;;  %v1635_v3 = vld [vmem:[#allocation2 + $0x79] sm:$0xff] }
 0x17b   : > { %1045 = vst.msk [vmem:[#allocation4 + $0xe0] sm:$0xff] %vm1016_vm5, %v977_v63 }
 0x17c   : > { %1350 = vrot.lane.b32.xlu0 %v7052_v11, %s4614_s7  ;;  %v975_v14 = vpop.permute.xlu1 %974 }
 0x17d   : > { %1044 = vst.msk [vmem:[#allocation4 + $0xd8] sm:$0xff] %vm1016_vm5, %v975_v14  ;;  %v1634_v14 = vld [vmem:[#allocation2 + $0x69] sm:$0xff] }
 0x17e   : > { %v981_v17 = vpop.permute.xlu0 %980  ;;  %1348 = vrot.lane.b32.xlu1 %v7053_v18, %s4614_s7  ;;  %v1637_v18 = vld [vmem:[#allocation2 + $0x91] sm:$0xff] }
 0x17f   : > { %1047 = vst.msk [vmem:[#allocation4 + $0xf0] sm:$0xff] %vm1016_vm5, %v981_v17 }
 0x180   : > { %1354 = vrot.lane.b32.xlu0 %v5282_v45, %s4614_s7  ;;  %v979_v21 = vpop.permute.xlu1 %978 }
 0x181   : > { %1046 = vst.msk [vmem:[#allocation4 + $0xe8] sm:$0xff] %vm1016_vm5, %v979_v21 }
 0x182   : > { %v1114_v38 = vpop.permute.xlu0 %1113  ;;  %1352 = vrot.lane.b32.xlu1 %v7054_v22, %s4614_s7 }
 0x183   : > { %1210 = vst.msk [vmem:[#allocation4] sm:$0xff] %vm1209_vm6, %v1114_v38  ;;  %v1636_v38 = vld [vmem:[#allocation2 + $0x81] sm:$0xff] }
 0x184   : > { %1358 = vrot.lane.b32.xlu0 %v7055_v50, %s4614_s7  ;;  %v983_v26 = vpop.permute.xlu1 %982  ;;  %v1639_v50 = vld [vmem:[#allocation2 + $0xa9] sm:$0xff] }
 0x185   : > { %1048 = vst.msk [vmem:[#allocation4 + $0xf8] sm:$0xff] %vm1016_vm5, %v983_v26 }
 0x186   : > { %v1118_v27 = vpop.permute.xlu0 %1117  ;;  %1356 = vrot.lane.b32.xlu1 %v7056_v25, %s4614_s7  ;;  %v1638_v25 = vld [vmem:[#allocation2 + $0x99] sm:$0xff] }
 0x187   : > { %1212 = vst.msk [vmem:[#allocation4 + $0x10] sm:$0xff] %vm1209_vm6, %v1118_v27  ;;  %v4595_v27 = vld [vmem:[%s6962_s1 + $0x10] ss:$0 sps:$4 sm:$0x33]  }
 0x188   : > { %1362 = vrot.lane.b32.xlu0 %v5300_v39, %s4614_s7  ;;  %v1116_v45 = vpop.permute.xlu1 %1115  ;;  %v5614_v39 = vld [vmem:[#allocation2 + $0x18a] sm:$0xff]  ;;  %4576 = vmatprep.subr.msk.bf16.mxu0 %vm2139_vm8, %v4595_v27 }
 0x189   : > { %1211 = vst.msk [vmem:[#allocation4 + $0x8] sm:$0xff] %vm1209_vm6, %v1116_v45  ;;  %v2141_v45 = vsel %vm2139_vm8, %v4595_v27, 0  ;;  %v1839_v27 = vld [vmem:[#allocation2 + $0xfa] sm:$0xff] }
 0x18a   : > { %v1122_v28 = vpop.permute.xlu0 %1121  ;;  %1360 = vrot.lane.b32.xlu1 %v5306_v34, %s4614_s7  ;;  %4501 = vmatpush3.bf16.msra.mxu0 %v2141_v45  ;;  %v1649_v45 = vld [vmem:[#allocation2 + $0x121] sm:$0xff] }
 0x18b   : > { %1214 = vst.msk [vmem:[#allocation4 + $0x20] sm:$0xff] %vm1209_vm6, %v1122_v28 }
 0x18c   : > { %1366 = vrot.lane.b32.xlu0 %v5602_v46, %s4614_s7  ;;  %v1120_v30 = vpop.permute.xlu1 %1119 }
 0x18d   : > { %1213 = vst.msk [vmem:[#allocation4 + $0x18] sm:$0xff] %vm1209_vm6, %v1120_v30  ;;  %v1822_v30 = vld [vmem:[#allocation2 + $0x32] sm:$0xff] }
 0x18e   : > { %v1126_v31 = vpop.permute.xlu0 %1125  ;;  %1364 = vrot.lane.b32.xlu1 %v5314_v48, %s4614_s7 }
 0x18f   : > { %1216 = vst.msk [vmem:[#allocation4 + $0x30] sm:$0xff] %vm1209_vm6, %v1126_v31 }
 0x190   : > { %1500 = vrot.lane.b32.xlu0 %v5008_v52, %s4615_s8  ;;  %v1124_v34 = vpop.permute.xlu1 %1123 }
 0x191   : > { %1215 = vst.msk [vmem:[#allocation4 + $0x28] sm:$0xff] %vm1209_vm6, %v1124_v34  ;;  %v4596_v34 = vld [vmem:[%s6962_s1 + $0x8] sm:$0xff]  }
 0x192   : > { %v1130_v32 = vpop.permute.xlu0 %1129  ;;  %1368 = vrot.lane.b32.xlu1 %v5614_v39, %s4614_s7  ;;  %4502 = vmatprep.subr.bf16.mxu0 %v4596_v34 }
 0x193   : > { %1218 = vst.msk [vmem:[#allocation4 + $0x40] sm:$0xff] %vm1209_vm6, %v1130_v32  ;;  %v1640_v32 = vld [vmem:[#allocation2 + $0xb1] sm:$0xff]  ;;  %4503 = vmatpush3.bf16.msra.mxu0 %v4596_v34  ;;  %v1651_v34 = vld [vmem:[#allocation2 + $0x139] sm:$0xff] }
 0x194   : > { %1504 = vrot.lane.b32.xlu0 %v5020_v55, %s4615_s8  ;;  %v1128_v48 = vpop.permute.xlu1 %1127 }
 0x195   : > { %1217 = vst.msk [vmem:[#allocation4 + $0x38] sm:$0xff] %vm1209_vm6, %v1128_v48 }
 0x196   : > { %v1134_v37 = vpop.permute.xlu0 %1133  ;;  %1502 = vrot.lane.b32.xlu1 %v5010_v53, %s4615_s8 }
 0x197   : > { %1220 = vst.msk [vmem:[#allocation4 + $0x50] sm:$0xff] %vm1209_vm6, %v1134_v37  ;;  %v1824_v37 = vld [vmem:[#allocation2 + $0x4a] sm:$0xff] }
 0x198   : > { %1508 = vrot.lane.b32.xlu0 %v5030_v57, %s4615_s8  ;;  %v1132_v52 = vpop.permute.xlu1 %1131 }
 0x199   : > { %1219 = vst.msk [vmem:[#allocation4 + $0x48] sm:$0xff] %vm1209_vm6, %v1132_v52 }
 0x19a   : > { %v1138_v40 = vpop.permute.xlu0 %1137  ;;  %1506 = vrot.lane.b32.xlu1 %v5022_v56, %s4615_s8 }
 0x19b   : > { %1222 = vst.msk [vmem:[#allocation4 + $0x60] sm:$0xff] %vm1209_vm6, %v1138_v40  ;;  %v4597_v40 = vld [vmem:[%s6962_s1] sm:$0xff]  }
 0x19c   : > { %1512 = vrot.lane.b32.xlu0 %v5034_v59, %s4615_s8  ;;  %v1136_v55 = vpop.permute.xlu1 %1135  ;;  %4504 = vmatprep.subr.bf16.mxu0 %v4597_v40 }
 0x19d   : > { %1221 = vst.msk [vmem:[#allocation4 + $0x58] sm:$0xff] %vm1209_vm6, %v1136_v55  ;;  %v1823_v55 = vld [vmem:[#allocation2 + $0x3a] sm:$0xff]  ;;  %4505 = vmatpush3.bf16.msra.mxu0 %v4597_v40 }
 0x19e   : > { %v1142_v53 = vpop.permute.xlu0 %1141  ;;  %1510 = vrot.lane.b32.xlu1 %v5032_v58, %s4615_s8 }
 0x19f   : > { %1224 = vst.msk [vmem:[#allocation4 + $0x70] sm:$0xff] %vm1209_vm6, %v1142_v53 }
 0x1a0   : > { %1516 = vrot.lane.b32.xlu0 %v5044_v61, %s4615_s8  ;;  %v1140_v57 = vpop.permute.xlu1 %1139 }
 0x1a1   : > { %1223 = vst.msk [vmem:[#allocation4 + $0x68] sm:$0xff] %vm1209_vm6, %v1140_v57  ;;  %v1826_v57 = vld [vmem:[#allocation2 + $0x62] sm:$0xff] }
 0x1a2   : > { %v1146_v56 = vpop.permute.xlu0 %1145  ;;  %1514 = vrot.lane.b32.xlu1 %v5042_v60, %s4615_s8 }
 0x1a3   : > { %1226 = vst.msk [vmem:[#allocation4 + $0x80] sm:$0xff] %vm1209_vm6, %v1146_v56 }
 0x1a4   : > { %1520 = vrot.lane.b32.xlu0 %v5056_v0, %s4615_s8  ;;  %v1144_v59 = vpop.permute.xlu1 %1143 }
 0x1a5   : > { %1225 = vst.msk [vmem:[#allocation4 + $0x78] sm:$0xff] %vm1209_vm6, %v1144_v59  ;;  %v1825_v59 = vld [vmem:[#allocation2 + $0x52] sm:$0xff] }
 0x1a6   : > { %v1150_v58 = vpop.permute.xlu0 %1149  ;;  %1518 = vrot.lane.b32.xlu1 %v5046_v62, %s4615_s8 }
 0x1a7   : > { %1228 = vst.msk [vmem:[#allocation4 + $0x90] sm:$0xff] %vm1209_vm6, %v1150_v58 }
 0x1a8   : > { %1524 = vrot.lane.b32.xlu0 %v5060_v2, %s4615_s8  ;;  %v1148_v61 = vpop.permute.xlu1 %1147 }
 0x1a9   : > { %1227 = vst.msk [vmem:[#allocation4 + $0x88] sm:$0xff] %vm1209_vm6, %v1148_v61  ;;  %v1828_v61 = vld [vmem:[#allocation2 + $0x7a] sm:$0xff] }
 0x1aa   : > { %v1154_v60 = vpop.permute.xlu0 %1153  ;;  %1522 = vrot.lane.b32.xlu1 %v5058_v1, %s4615_s8 }
 0x1ab   : > { %1230 = vst.msk [vmem:[#allocation4 + $0xa0] sm:$0xff] %vm1209_vm6, %v1154_v60 }
 0x1ac   : > { %1528 = vrot.lane.b32.xlu0 %v5074_v5, %s4615_s8  ;;  %v1152_v0 = vpop.permute.xlu1 %1151 }
 0x1ad   : > { %1229 = vst.msk [vmem:[#allocation4 + $0x98] sm:$0xff] %vm1209_vm6, %v1152_v0  ;;  %v1827_v0 = vld [vmem:[#allocation2 + $0x6a] sm:$0xff] }
 0x1ae   : > { %v1158_v62 = vpop.permute.xlu0 %1157  ;;  %1526 = vrot.lane.b32.xlu1 %v5072_v4, %s4615_s8 }
 0x1af   : > { %1232 = vst.msk [vmem:[#allocation4 + $0xb0] sm:$0xff] %vm1209_vm6, %v1158_v62 }
 0x1b0   : > { %1532 = vrot.lane.b32.xlu0 %v5086_v7, %s4615_s8  ;;  %v1156_v2 = vpop.permute.xlu1 %1155 }
 0x1b1   : > { %1231 = vst.msk [vmem:[#allocation4 + $0xa8] sm:$0xff] %vm1209_vm6, %v1156_v2  ;;  %v1830_v2 = vld [vmem:[#allocation2 + $0x92] sm:$0xff] }
 0x1b2   : > { %v1162_v1 = vpop.permute.xlu0 %1161  ;;  %1530 = vrot.lane.b32.xlu1 %v5076_v6, %s4615_s8 }
 0x1b3   : > { %1234 = vst.msk [vmem:[#allocation4 + $0xc0] sm:$0xff] %vm1209_vm6, %v1162_v1 }
 0x1b4   : > { %1536 = vrot.lane.b32.xlu0 %v5090_v9, %s4615_s8  ;;  %v1160_v5 = vpop.permute.xlu1 %1159 }
 0x1b5   : > { %1233 = vst.msk [vmem:[#allocation4 + $0xb8] sm:$0xff] %vm1209_vm6, %v1160_v5  ;;  %v1829_v5 = vld [vmem:[#allocation2 + $0x82] sm:$0xff] }
 0x1b6   : > { %v1166_v4 = vpop.permute.xlu0 %1165  ;;  %1534 = vrot.lane.b32.xlu1 %v5088_v8, %s4615_s8 }
 0x1b7   : > { %1236 = vst.msk [vmem:[#allocation4 + $0xd0] sm:$0xff] %vm1209_vm6, %v1166_v4 }
 0x1b8   : > { %1540 = vrot.lane.b32.xlu0 %v5106_v12, %s4615_s8  ;;  %v1164_v7 = vpop.permute.xlu1 %1163 }
 0x1b9   : > { %1235 = vst.msk [vmem:[#allocation4 + $0xc8] sm:$0xff] %vm1209_vm6, %v1164_v7  ;;  %v1832_v7 = vld [vmem:[#allocation2 + $0xaa] sm:$0xff] }
 0x1ba   : > { %v1170_v6 = vpop.permute.xlu0 %1169  ;;  %1538 = vrot.lane.b32.xlu1 %v5098_v10, %s4615_s8 }
 0x1bb   : > { %1238 = vst.msk [vmem:[#allocation4 + $0xe0] sm:$0xff] %vm1209_vm6, %v1170_v6 }
 0x1bc   : > { %1544 = vrot.lane.b32.xlu0 %v5120_v15, %s4615_s8  ;;  %v1168_v9 = vpop.permute.xlu1 %1167 }
 0x1bd   : > { %1237 = vst.msk [vmem:[#allocation4 + $0xd8] sm:$0xff] %vm1209_vm6, %v1168_v9  ;;  %v1831_v9 = vld [vmem:[#allocation2 + $0x9a] sm:$0xff] }
 0x1be   : > { %v1174_v8 = vpop.permute.xlu0 %1173  ;;  %1542 = vrot.lane.b32.xlu1 %v5108_v13, %s4615_s8 }
 0x1bf   : > { %1240 = vst.msk [vmem:[#allocation4 + $0xf0] sm:$0xff] %vm1209_vm6, %v1174_v8 }
 0x1c0   : > { %1548 = vrot.lane.b32.xlu0 %v5136_v19, %s4615_s8  ;;  %v1172_v12 = vpop.permute.xlu1 %1171 }
 0x1c1   : > { %1239 = vst.msk [vmem:[#allocation4 + $0xe8] sm:$0xff] %vm1209_vm6, %v1172_v12  ;;  %v1641_v12 = vld [vmem:[#allocation2 + $0xc1] sm:$0xff] }
 0x1c2   : > { %v1307_v10 = vpop.permute.xlu0 %1306  ;;  %1546 = vrot.lane.b32.xlu1 %v5122_v16, %s4615_s8 }
 0x1c3   : > { %1403 = vst.msk [vmem:[#allocation4] sm:$0xff] %vm1402_vm7, %v1307_v10 }
 0x1c4   : > { %1552 = vrot.lane.b32.xlu0 %v5152_v23, %s4615_s8  ;;  %v1176_v15 = vpop.permute.xlu1 %1175 }
 0x1c5   : > { %1241 = vst.msk [vmem:[#allocation4 + $0xf8] sm:$0xff] %vm1209_vm6, %v1176_v15  ;;  %v1833_v15 = vld [vmem:[#allocation2 + $0xb2] sm:$0xff] }
 0x1c6   : > { %v1311_v13 = vpop.permute.xlu0 %1310  ;;  %1550 = vrot.lane.b32.xlu1 %v5138_v20, %s4615_s8 }
 0x1c7   : > { %1405 = vst.msk [vmem:[#allocation4 + $0x10] sm:$0xff] %vm1402_vm7, %v1311_v13 }
 0x1c8   : > { %1556 = vrot.lane.b32.xlu0 %v5402_v33, %s4615_s8  ;;  %v1309_v19 = vpop.permute.xlu1 %1308  ;;  %v1467_v33 = vld [vmem:[#allocation2 + $0x1a0] sm:$0xff] }
 0x1c9   : > { %1404 = vst.msk [vmem:[#allocation4 + $0x8] sm:$0xff] %vm1402_vm7, %v1309_v19  ;;  %v1643_v19 = vld [vmem:[#allocation2 + $0xd9] sm:$0xff] }
 0x1ca   : > { %v1315_v16 = vpop.permute.xlu0 %1314  ;;  %1554 = vrot.lane.b32.xlu1 %v5154_v24, %s4615_s8  ;;  %v1631_v24 = vld [vmem:[#allocation2 + $0x49] sm:$0xff] }
 0x1cb   : > { %1407 = vst.msk [vmem:[#allocation4 + $0x20] sm:$0xff] %vm1402_vm7, %v1315_v16  ;;  %v1642_v16 = vld [vmem:[#allocation2 + $0xc9] sm:$0xff] }
 0x1cc   : > { %1560 = vrot.lane.b32.xlu0 %v1466_v41, %s4615_s8  ;;  %v1313_v23 = vpop.permute.xlu1 %1312 }
 0x1cd   : > { %1406 = vst.msk [vmem:[#allocation4 + $0x18] sm:$0xff] %vm1402_vm7, %v1313_v23 }
 0x1ce   : > { %v1319_v20 = vpop.permute.xlu0 %1318  ;;  %1558 = vrot.lane.b32.xlu1 %v5414_v35, %s4615_s8  ;;  %v1633_v35 = vld [vmem:[#allocation2 + $0x61] sm:$0xff] }
 0x1cf   : > { %1409 = vst.msk [vmem:[#allocation4 + $0x30] sm:$0xff] %vm1402_vm7, %v1319_v20 }
 0x1d0   : > { %1693 = vrot.lane.b32.xlu0 %v1629_v42, %s4616_s9  ;;  %v1317_v43 = vpop.permute.xlu1 %1316  ;;  %v1834_v42 = vld [vmem:[#allocation2 + $0xc2] sm:$0xff] }
 0x1d1   : > { %1408 = vst.msk [vmem:[#allocation4 + $0x28] sm:$0xff] %vm1402_vm7, %v1317_v43 }
 0x1d2   : > { %v1323_v44 = vpop.permute.xlu0 %1322  ;;  %1562 = vrot.lane.b32.xlu1 %v1467_v33, %s4615_s8  ;;  %v1644_v33 = vld [vmem:[#allocation2 + $0xe1] sm:$0xff] }
 0x1d3   : > { %1411 = vst.msk [vmem:[#allocation4 + $0x40] sm:$0xff] %vm1402_vm7, %v1323_v44 }
 0x1d4   : > { %1697 = vrot.lane.b32.xlu0 %v1631_v24, %s4616_s9  ;;  %v1321_v49 = vpop.permute.xlu1 %1320  ;;  %v1836_v24 = vld [vmem:[#allocation2 + $0xda] sm:$0xff] }
 0x1d5   : > { %1410 = vst.msk [vmem:[#allocation4 + $0x38] sm:$0xff] %vm1402_vm7, %v1321_v49 }
 0x1d6   : > { %v1327_v51 = vpop.permute.xlu0 %1326  ;;  %1695 = vrot.lane.b32.xlu1 %v1630_v47, %s4616_s9  ;;  %v1835_v47 = vld [vmem:[#allocation2 + $0xca] sm:$0xff] }
 0x1d7   : > { %1413 = vst.msk [vmem:[#allocation4 + $0x50] sm:$0xff] %vm1402_vm7, %v1327_v51 }
 0x1d8   : > { %1701 = vrot.lane.b32.xlu0 %v1633_v35, %s4616_s9  ;;  %v1325_v63 = vpop.permute.xlu1 %1324  ;;  %v1645_v35 = vld [vmem:[#allocation2 + $0xf1] sm:$0xff] }
 0x1d9   : > { %1412 = vst.msk [vmem:[#allocation4 + $0x48] sm:$0xff] %vm1402_vm7, %v1325_v63 }
 0x1da   : > { %v1331_v11 = vpop.permute.xlu0 %1330  ;;  %1699 = vrot.lane.b32.xlu1 %v1632_v54, %s4616_s9  ;;  %v1837_v54 = vld [vmem:[#allocation2 + $0xe2] sm:$0xff] }
 0x1db   : > { %1415 = vst.msk [vmem:[#allocation4 + $0x60] sm:$0xff] %vm1402_vm7, %v1331_v11 }
 0x1dc   : > { %1705 = vrot.lane.b32.xlu0 %v1635_v3, %s4616_s9  ;;  %v1329_v17 = vpop.permute.xlu1 %1328  ;;  %v1647_v3 = vld [vmem:[#allocation2 + $0x109] sm:$0xff] }
 0x1dd   : > { %1414 = vst.msk [vmem:[#allocation4 + $0x58] sm:$0xff] %vm1402_vm7, %v1329_v17 }
 0x1de   : > { %v1335_v21 = vpop.permute.xlu0 %1334  ;;  %1703 = vrot.lane.b32.xlu1 %v1634_v14, %s4616_s9  ;;  %v1646_v14 = vld [vmem:[#allocation2 + $0xf9] sm:$0xff] }
 0x1df   : > { %1417 = vst.msk [vmem:[#allocation4 + $0x70] sm:$0xff] %vm1402_vm7, %v1335_v21 }
 0x1e0   : > { %1709 = vrot.lane.b32.xlu0 %v1637_v18, %s4616_s9  ;;  %v1333_v22 = vpop.permute.xlu1 %1332  ;;  %v1838_v18 = vld [vmem:[#allocation2 + $0xf2] sm:$0xff] }
 0x1e1   : > { %1416 = vst.msk [vmem:[#allocation4 + $0x68] sm:$0xff] %vm1402_vm7, %v1333_v22 }
 0x1e2   : > { %v1339_v26 = vpop.permute.xlu0 %1338  ;;  %1707 = vrot.lane.b32.xlu1 %v1636_v38, %s4616_s9  ;;  %v1648_v38 = vld [vmem:[#allocation2 + $0x111] sm:$0xff] }
 0x1e3   : > { %1419 = vst.msk [vmem:[#allocation4 + $0x80] sm:$0xff] %vm1402_vm7, %v1339_v26 }
 0x1e4   : > { %1713 = vrot.lane.b32.xlu0 %v1639_v50, %s4616_s9  ;;  %v1337_v28 = vpop.permute.xlu1 %1336  ;;  %v1840_v50 = vld [vmem:[#allocation2 + $0x10a] sm:$0xff] }
 0x1e5   : > { %1418 = vst.msk [vmem:[#allocation4 + $0x78] sm:$0xff] %vm1402_vm7, %v1337_v28 }
 0x1e6   : > { %v1343_v31 = vpop.permute.xlu0 %1342  ;;  %1711 = vrot.lane.b32.xlu1 %v1638_v25, %s4616_s9 }
 0x1e7   : > { %1421 = vst.msk [vmem:[#allocation4 + $0x90] sm:$0xff] %vm1402_vm7, %v1343_v31 }
 0x1e8   : > { %1886 = vrot.lane.b32.xlu0 %v1822_v30, %s4617_s14  ;;  %v1341_v48 = vpop.permute.xlu1 %1340  ;;  %v1841_v30 = vld [vmem:[#allocation2 + $0x112] sm:$0xff] }
 0x1e9   : > { %1420 = vst.msk [vmem:[#allocation4 + $0x88] sm:$0xff] %vm1402_vm7, %v1341_v48  ;;  %v1650_v48 = vld [vmem:[#allocation2 + $0x129] sm:$0xff] }
 0x1ea   : > { %v1347_v52 = vpop.permute.xlu0 %1346  ;;  %1715 = vrot.lane.b32.xlu1 %v1640_v32, %s4616_s9 }
 0x1eb   : > { %1423 = vst.msk [vmem:[#allocation4 + $0xa0] sm:$0xff] %vm1402_vm7, %v1347_v52  ;;  %v1842_v52 = vld [vmem:[#allocation2 + $0x122] sm:$0xff] }
 0x1ec   : > { %1890 = vrot.lane.b32.xlu0 %v1824_v37, %s4617_s14  ;;  %v1345_v53 = vpop.permute.xlu1 %1344 }
 0x1ed   : > { %1422 = vst.msk [vmem:[#allocation4 + $0x98] sm:$0xff] %vm1402_vm7, %v1345_v53 }
 0x1ee   : > { %v1351_v56 = vpop.permute.xlu0 %1350  ;;  %1888 = vrot.lane.b32.xlu1 %v1823_v55, %s4617_s14  ;;  %v1652_v55 = vld [vmem:[#allocation2 + $0x141] sm:$0xff] }
 0x1ef   : > { %1425 = vst.msk [vmem:[#allocation4 + $0xb0] sm:$0xff] %vm1402_vm7, %v1351_v56 }
 0x1f0   : > { %1894 = vrot.lane.b32.xlu0 %v1826_v57, %s4617_s14  ;;  %v1349_v58 = vpop.permute.xlu1 %1348  ;;  %v1844_v57 = vld [vmem:[#allocation2 + $0x13a] sm:$0xff] }
 0x1f1   : > { %1424 = vst.msk [vmem:[#allocation4 + $0xa8] sm:$0xff] %vm1402_vm7, %v1349_v58 }
 0x1f2   : > { %v1355_v60 = vpop.permute.xlu0 %1354  ;;  %1892 = vrot.lane.b32.xlu1 %v1825_v59, %s4617_s14  ;;  %v1843_v59 = vld [vmem:[#allocation2 + $0x12a] sm:$0xff] }
 0x1f3   : > { %1427 = vst.msk [vmem:[#allocation4 + $0xc0] sm:$0xff] %vm1402_vm7, %v1355_v60 }
 0x1f4   : > { %1898 = vrot.lane.b32.xlu0 %v1828_v61, %s4617_s14  ;;  %v1353_v62 = vpop.permute.xlu1 %1352  ;;  %v1653_v61 = vld [vmem:[#allocation2 + $0x151] sm:$0xff] }
 0x1f5   : > { %1426 = vst.msk [vmem:[#allocation4 + $0xb8] sm:$0xff] %vm1402_vm7, %v1353_v62 }
 0x1f6   : > { %v1359_v1 = vpop.permute.xlu0 %1358  ;;  %1896 = vrot.lane.b32.xlu1 %v1827_v0, %s4617_s14  ;;  %v1845_v0 = vld [vmem:[#allocation2 + $0x142] sm:$0xff] }
 0x1f7   : > { %1429 = vst.msk [vmem:[#allocation4 + $0xd0] sm:$0xff] %vm1402_vm7, %v1359_v1 }
 0x1f8   : > { %1902 = vrot.lane.b32.xlu0 %v1830_v2, %s4617_s14  ;;  %v1357_v4 = vpop.permute.xlu1 %1356  ;;  %v1655_v2 = vld [vmem:[#allocation2 + $0x169] sm:$0xff] }
 0x1f9   : > { %1428 = vst.msk [vmem:[#allocation4 + $0xc8] sm:$0xff] %vm1402_vm7, %v1357_v4 }
 0x1fa   : > { %v1363_v6 = vpop.permute.xlu0 %1362  ;;  %1900 = vrot.lane.b32.xlu1 %v1829_v5, %s4617_s14  ;;  %v1654_v5 = vld [vmem:[#allocation2 + $0x159] sm:$0xff] }
 0x1fb   : > { %1431 = vst.msk [vmem:[#allocation4 + $0xe0] sm:$0xff] %vm1402_vm7, %v1363_v6 }
 0x1fc   : > { %1906 = vrot.lane.b32.xlu0 %v1832_v7, %s4617_s14  ;;  %v1361_v8 = vpop.permute.xlu1 %1360  ;;  %v1846_v7 = vld [vmem:[#allocation2 + $0x152] sm:$0xff] }
 0x1fd   : > { %1430 = vst.msk [vmem:[#allocation4 + $0xd8] sm:$0xff] %vm1402_vm7, %v1361_v8 }
 0x1fe   : > { %v1367_v10 = vpop.permute.xlu0 %1366  ;;  %1904 = vrot.lane.b32.xlu1 %v1831_v9, %s4617_s14  ;;  %v1656_v9 = vld [vmem:[#allocation2 + $0x171] sm:$0xff] }
 0x1ff   : > { %1433 = vst.msk [vmem:[#allocation4 + $0xf0] sm:$0xff] %vm1402_vm7, %v1367_v10 }
 0x200   : > { %1717 = vrot.lane.b32.xlu0 %v1641_v12, %s4616_s9  ;;  %v1365_v13 = vpop.permute.xlu1 %1364  ;;  %v1848_v12 = vld [vmem:[#allocation2 + $0x16a] sm:$0xff] }
 0x201   : > { %1432 = vst.msk [vmem:[#allocation4 + $0xe8] sm:$0xff] %vm1402_vm7, %v1365_v13 }
 0x202   : > { %v1501_v41 = vpop.permute.xlu0 %1500  ;;  %1908 = vrot.lane.b32.xlu1 %v1833_v15, %s4617_s14  ;;  %v1847_v15 = vld [vmem:[#allocation2 + $0x15a] sm:$0xff] }
 0x203   : > { %1597 = vst.msk [vmem:[#allocation4] sm:$0xff] %vm1596_vm9, %v1501_v41  ;;  %v1849_v41 = vld [vmem:[#allocation2 + $0x172] sm:$0xff] }
 0x204   : > { %1721 = vrot.lane.b32.xlu0 %v1643_v19, %s4616_s9  ;;  %v1369_v23 = vpop.permute.xlu1 %1368 }
 0x205   : > { %1434 = vst.msk [vmem:[#allocation4 + $0xf8] sm:$0xff] %vm1402_vm7, %v1369_v23  ;;  %v1659_v23 = vld [vmem:[#allocation2 + $0x199] sm:$0xff] }
 0x206   : > { %v1505_v20 = vpop.permute.xlu0 %1504  ;;  %1719 = vrot.lane.b32.xlu1 %v1642_v16, %s4616_s9 }
 0x207   : > { %1599 = vst.msk [vmem:[#allocation4 + $0x10] sm:$0xff] %vm1596_vm9, %v1505_v20 }
 0x208   : > { %1910 = vrot.lane.b32.xlu0 %v1834_v42, %s4617_s14  ;;  %v1503_v43 = vpop.permute.xlu1 %1502 }
 0x209   : > { %1598 = vst.msk [vmem:[#allocation4 + $0x8] sm:$0xff] %vm1596_vm9, %v1503_v43 }
 0x20a   : > { %v1509_v44 = vpop.permute.xlu0 %1508  ;;  %1723 = vrot.lane.b32.xlu1 %v1644_v33, %s4616_s9 }
 0x20b   : > { %1601 = vst.msk [vmem:[#allocation4 + $0x20] sm:$0xff] %vm1596_vm9, %v1509_v44 }
 0x20c   : > { %1914 = vrot.lane.b32.xlu0 %v1836_v24, %s4617_s14  ;;  %v1507_v49 = vpop.permute.xlu1 %1506  ;;  %v1852_v24 = vld [vmem:[#allocation2 + $0x19a] sm:$0xff] }
 0x20d   : > { %1600 = vst.msk [vmem:[#allocation4 + $0x18] sm:$0xff] %vm1596_vm9, %v1507_v49 }
 0x20e   : > { %v1513_v51 = vpop.permute.xlu0 %1512  ;;  %1912 = vrot.lane.b32.xlu1 %v1835_v47, %s4617_s14 }
 0x20f   : > { %1603 = vst.msk [vmem:[#allocation4 + $0x30] sm:$0xff] %vm1596_vm9, %v1513_v51 }
 0x210   : > { %1725 = vrot.lane.b32.xlu0 %v1645_v35, %s4616_s9  ;;  %v1511_v63 = vpop.permute.xlu1 %1510 }
 0x211   : > { %1602 = vst.msk [vmem:[#allocation4 + $0x28] sm:$0xff] %vm1596_vm9, %v1511_v63 }
 0x212   : > { %v1517_v11 = vpop.permute.xlu0 %1516  ;;  %1916 = vrot.lane.b32.xlu1 %v1837_v54, %s4617_s14 }
 0x213   : > { %1605 = vst.msk [vmem:[#allocation4 + $0x40] sm:$0xff] %vm1596_vm9, %v1517_v11 }
 0x214   : > { %1729 = vrot.lane.b32.xlu0 %v1647_v3, %s4616_s9  ;;  %v1515_v17 = vpop.permute.xlu1 %1514 }
 0x215   : > { %1604 = vst.msk [vmem:[#allocation4 + $0x38] sm:$0xff] %vm1596_vm9, %v1515_v17 }
 0x216   : > { %v1521_v21 = vpop.permute.xlu0 %1520  ;;  %1727 = vrot.lane.b32.xlu1 %v1646_v14, %s4616_s9 }
 0x217   : > { %1607 = vst.msk [vmem:[#allocation4 + $0x50] sm:$0xff] %vm1596_vm9, %v1521_v21 }
 0x218   : > { %1918 = vrot.lane.b32.xlu0 %v1838_v18, %s4617_s14  ;;  %v1519_v22 = vpop.permute.xlu1 %1518 }
 0x219   : > { %1606 = vst.msk [vmem:[#allocation4 + $0x48] sm:$0xff] %vm1596_vm9, %v1519_v22 }
 0x21a   : > { %v1525_v26 = vpop.permute.xlu0 %1524  ;;  %1731 = vrot.lane.b32.xlu1 %v1648_v38, %s4616_s9 }
 0x21b   : > { %1609 = vst.msk [vmem:[#allocation4 + $0x60] sm:$0xff] %vm1596_vm9, %v1525_v26 }
 0x21c   : > { %1922 = vrot.lane.b32.xlu0 %v1840_v50, %s4617_s14  ;;  %v1523_v25 = vpop.permute.xlu1 %1522 }
 0x21d   : > { %1608 = vst.msk [vmem:[#allocation4 + $0x58] sm:$0xff] %vm1596_vm9, %v1523_v25 }
 0x21e   : > { %v1529_v28 = vpop.permute.xlu0 %1528  ;;  %1920 = vrot.lane.b32.xlu1 %v1839_v27, %s4617_s14 }
 0x21f   : > { %1611 = vst.msk [vmem:[#allocation4 + $0x70] sm:$0xff] %vm1596_vm9, %v1529_v28 }
 0x220   : > { %1733 = vrot.lane.b32.xlu0 %v1649_v45, %s4616_s9  ;;  %v1527_v31 = vpop.permute.xlu1 %1526 }
 0x221   : > { %1610 = vst.msk [vmem:[#allocation4 + $0x68] sm:$0xff] %vm1596_vm9, %v1527_v31 }
 0x222   : > { %v1533_v32 = vpop.permute.xlu0 %1532  ;;  %1924 = vrot.lane.b32.xlu1 %v1841_v30, %s4617_s14 }
 0x223   : > { %1613 = vst.msk [vmem:[#allocation4 + $0x80] sm:$0xff] %vm1596_vm9, %v1533_v32 }
 0x224   : > { %1737 = vrot.lane.b32.xlu0 %v1651_v34, %s4616_s9  ;;  %v1531_v37 = vpop.permute.xlu1 %1530 }
 0x225   : > { %1612 = vst.msk [vmem:[#allocation4 + $0x78] sm:$0xff] %vm1596_vm9, %v1531_v37 }
 0x226   : > { %v1537_v40 = vpop.permute.xlu0 %1536  ;;  %1735 = vrot.lane.b32.xlu1 %v1650_v48, %s4616_s9 }
 0x227   : > { %1615 = vst.msk [vmem:[#allocation4 + $0x90] sm:$0xff] %vm1596_vm9, %v1537_v40 }
 0x228   : > { %1926 = vrot.lane.b32.xlu0 %v1842_v52, %s4617_s14  ;;  %v1535_v53 = vpop.permute.xlu1 %1534 }
 0x229   : > { %1614 = vst.msk [vmem:[#allocation4 + $0x88] sm:$0xff] %vm1596_vm9, %v1535_v53 }
 0x22a   : > { %v1541_v56 = vpop.permute.xlu0 %1540  ;;  %1739 = vrot.lane.b32.xlu1 %v1652_v55, %s4616_s9 }
 0x22b   : > { %1617 = vst.msk [vmem:[#allocation4 + $0xa0] sm:$0xff] %vm1596_vm9, %v1541_v56 }
 0x22c   : > { %1930 = vrot.lane.b32.xlu0 %v1844_v57, %s4617_s14  ;;  %v1539_v58 = vpop.permute.xlu1 %1538 }
 0x22d   : > { %1616 = vst.msk [vmem:[#allocation4 + $0x98] sm:$0xff] %vm1596_vm9, %v1539_v58 }
 0x22e   : > { %v1545_v60 = vpop.permute.xlu0 %1544  ;;  %1928 = vrot.lane.b32.xlu1 %v1843_v59, %s4617_s14 }
 0x22f   : > { %1619 = vst.msk [vmem:[#allocation4 + $0xb0] sm:$0xff] %vm1596_vm9, %v1545_v60 }
 0x230   : > { %1741 = vrot.lane.b32.xlu0 %v1653_v61, %s4616_s9  ;;  %v1543_v62 = vpop.permute.xlu1 %1542 }
 0x231   : > { %1618 = vst.msk [vmem:[#allocation4 + $0xa8] sm:$0xff] %vm1596_vm9, %v1543_v62 }
 0x232   : > { %v1549_v1 = vpop.permute.xlu0 %1548  ;;  %1932 = vrot.lane.b32.xlu1 %v1845_v0, %s4617_s14 }
 0x233   : > { %1621 = vst.msk [vmem:[#allocation4 + $0xc0] sm:$0xff] %vm1596_vm9, %v1549_v1 }
 0x234   : > { %1745 = vrot.lane.b32.xlu0 %v1655_v2, %s4616_s9  ;;  %v1547_v4 = vpop.permute.xlu1 %1546 }
 0x235   : > { %1620 = vst.msk [vmem:[#allocation4 + $0xb8] sm:$0xff] %vm1596_vm9, %v1547_v4 }
 0x236   : > { %v1553_v6 = vpop.permute.xlu0 %1552  ;;  %1743 = vrot.lane.b32.xlu1 %v1654_v5, %s4616_s9 }
 0x237   : > { %1623 = vst.msk [vmem:[#allocation4 + $0xd0] sm:$0xff] %vm1596_vm9, %v1553_v6 }
 0x238   : > { %1934 = vrot.lane.b32.xlu0 %v1846_v7, %s4617_s14  ;;  %v1551_v8 = vpop.permute.xlu1 %1550 }
 0x239   : > { %1622 = vst.msk [vmem:[#allocation4 + $0xc8] sm:$0xff] %vm1596_vm9, %v1551_v8 }
 0x23a   : > { %v1557_v10 = vpop.permute.xlu0 %1556  ;;  %1747 = vrot.lane.b32.xlu1 %v1656_v9, %s4616_s9 }
 0x23b   : > { %1625 = vst.msk [vmem:[#allocation4 + $0xe0] sm:$0xff] %vm1596_vm9, %v1557_v10 }
 0x23c   : > { %1938 = vrot.lane.b32.xlu0 %v1848_v12, %s4617_s14  ;;  %v1555_v13 = vpop.permute.xlu1 %1554 }
 0x23d   : > { %1624 = vst.msk [vmem:[#allocation4 + $0xd8] sm:$0xff] %vm1596_vm9, %v1555_v13 }
 0x23e   : > { %v1561_v19 = vpop.permute.xlu0 %1560  ;;  %1936 = vrot.lane.b32.xlu1 %v1847_v15, %s4617_s14 }
 0x23f   : > { %1627 = vst.msk [vmem:[#allocation4 + $0xf0] sm:$0xff] %vm1596_vm9, %v1561_v19 }
 0x240   : > { %1749 = vrot.lane.b32.xlu0 %v5502_v36, %s4616_s9  ;;  %v1559_v16 = vpop.permute.xlu1 %1558  ;;  %v1660_v36 = vld [vmem:[#allocation2 + $0x1a1] sm:$0xff] }
 0x241   : > { %1626 = vst.msk [vmem:[#allocation4 + $0xe8] sm:$0xff] %vm1596_vm9, %v1559_v16 }
 0x242   : > { %v1694_v42 = vpop.permute.xlu0 %1693  ;;  %1940 = vrot.lane.b32.xlu1 %v1849_v41, %s4617_s14 }
 0x243   : > { %1790 = vst.msk [vmem:[#allocation4] sm:$0xff] %vm1789_vm10, %v1694_v42 }
 0x244   : > { %1753 = vrot.lane.b32.xlu0 %v1659_v23, %s4616_s9  ;;  %v1563_v20 = vpop.permute.xlu1 %1562 }
 0x245   : > { %1628 = vst.msk [vmem:[#allocation4 + $0xf8] sm:$0xff] %vm1596_vm9, %v1563_v20 }
 0x246   : > { %v1698_v33 = vpop.permute.xlu0 %1697  ;;  %1751 = vrot.lane.b32.xlu1 %v5514_v29, %s4616_s9 }
 0x247   : > { %1792 = vst.msk [vmem:[#allocation4 + $0x10] sm:$0xff] %vm1789_vm10, %v1698_v33 }
 0x248   : > { %1942 = vrot.lane.b32.xlu0 %v5602_v46, %s4617_s14  ;;  %v1696_v43 = vpop.permute.xlu1 %1695  ;;  %v1853_v46 = vld [vmem:[#allocation2 + $0x1a2] sm:$0xff] }
 0x249   : > { %1791 = vst.msk [vmem:[#allocation4 + $0x8] sm:$0xff] %vm1789_vm10, %v1696_v43 }
 0x24a   : > { %v1702_v44 = vpop.permute.xlu0 %1701  ;;  %1755 = vrot.lane.b32.xlu1 %v1660_v36, %s4616_s9 }
 0x24b   : > { %1794 = vst.msk [vmem:[#allocation4 + $0x20] sm:$0xff] %vm1789_vm10, %v1702_v44 }
 0x24c   : > { %1946 = vrot.lane.b32.xlu0 %v1852_v24, %s4617_s14  ;;  %v1700_v47 = vpop.permute.xlu1 %1699 }
 0x24d   : > { %1793 = vst.msk [vmem:[#allocation4 + $0x18] sm:$0xff] %vm1789_vm10, %v1700_v47 }
 0x24e   : > { %v1706_v29 = vpop.permute.xlu0 %1705  ;;  %1944 = vrot.lane.b32.xlu1 %v5614_v39, %s4617_s14 }
 0x24f   : > { %1796 = vst.msk [vmem:[#allocation4 + $0x30] sm:$0xff] %vm1789_vm10, %v1706_v29 }
 0x250   : > { %v1704_v49 = vpop.permute.xlu1 %1703 }
 0x251   : > { %1795 = vst.msk [vmem:[#allocation4 + $0x28] sm:$0xff] %vm1789_vm10, %v1704_v49 }
 0x252   : > { %v1710_v35 = vpop.permute.xlu0 %1709  ;;  %1948 = vrot.lane.b32.xlu1 %v1853_v46, %s4617_s14 }
 0x253   : > { %1798 = vst.msk [vmem:[#allocation4 + $0x40] sm:$0xff] %vm1789_vm10, %v1710_v35 }
 0x254   : > { %v1708_v51 = vpop.permute.xlu1 %1707 }
 0x255   : > { %1797 = vst.msk [vmem:[#allocation4 + $0x38] sm:$0xff] %vm1789_vm10, %v1708_v51 }
 0x256   : > { %v1714_v54 = vpop.permute.xlu0 %1713 }
 0x257   : > { %1800 = vst.msk [vmem:[#allocation4 + $0x50] sm:$0xff] %vm1789_vm10, %v1714_v54 }
 0x258   : > { %v1712_v63 = vpop.permute.xlu1 %1711 }
 0x259   : > { %1799 = vst.msk [vmem:[#allocation4 + $0x48] sm:$0xff] %vm1789_vm10, %v1712_v63 }
 0x25a   : > { %v1887_v39 = vpop.permute.xlu0 %1886 }
 0x25b   : > { %1983 = vst.msk [vmem:[#allocation4] sm:$0xff] %vm1982_vm11, %v1887_v39 }
 0x25c   : > { %v1716_v3 = vpop.permute.xlu1 %1715 }
 0x25d   : > { %1801 = vst.msk [vmem:[#allocation4 + $0x58] sm:$0xff] %vm1789_vm10, %v1716_v3 }
 0x25e   : > { %v1891_v11 = vpop.permute.xlu0 %1890 }
 0x25f   : > { %1985 = vst.msk [vmem:[#allocation4 + $0x10] sm:$0xff] %vm1982_vm11, %v1891_v11 }
 0x260   : > { %v1889_v14 = vpop.permute.xlu1 %1888 }
 0x261   : > { %1984 = vst.msk [vmem:[#allocation4 + $0x8] sm:$0xff] %vm1982_vm11, %v1889_v14 }
 0x262   : > { %v1895_v17 = vpop.permute.xlu0 %1894  ;;  %v2015_v38 = vld [vmem:[#allocation4] sm:$0xff] }
 0x263   : > { %1987 = vst.msk [vmem:[#allocation4 + $0x20] sm:$0xff] %vm1982_vm11, %v1895_v17 }
 0x264   : > { %v1893_v18 = vpop.permute.xlu1 %1892 }
 0x265   : > { %1986 = vst.msk [vmem:[#allocation4 + $0x18] sm:$0xff] %vm1982_vm11, %v1893_v18 }
 0x266   : > { %v1899_v21 = vpop.permute.xlu0 %1898  ;;  %v2017_v25 = vld [vmem:[#allocation4 + $0x10] sm:$0xff] }
 0x267   : > { %1989 = vst.msk [vmem:[#allocation4 + $0x30] sm:$0xff] %vm1982_vm11, %v1899_v21 }
 0x268   : > { %v1897_v22 = vpop.permute.xlu1 %1896  ;;  %v2016_v50 = vld [vmem:[#allocation4 + $0x8] sm:$0xff] }
 0x269   : > { %1988 = vst.msk [vmem:[#allocation4 + $0x28] sm:$0xff] %vm1982_vm11, %v1897_v22  ;;  %v2047_v26 = vpack.c.bf16 %v2016_v50, %v2015_v38 }
 0x26a   : > { %v1903_v27 = vpop.permute.xlu0 %1902  ;;  %v2019_v34 = vld [vmem:[#allocation4 + $0x20] sm:$0xff] }
 0x26b   : > { %1991 = vst.msk [vmem:[#allocation4 + $0x40] sm:$0xff] %vm1982_vm11, %v1903_v27  ;;  %4506 = vmatprep.mubr.msk.bf16.mxu0 %vm2090_vm12, %v2047_v26 }
 0x26c   : > { %v1901_v45 = vpop.permute.xlu1 %1900  ;;  %v2018_v28 = vld [vmem:[#allocation4 + $0x18] sm:$0xff] }
 0x26d   : > { %1990 = vst.msk [vmem:[#allocation4 + $0x38] sm:$0xff] %vm1982_vm11, %v1901_v45  ;;  %v2048_v30 = vpack.c.bf16 %v2018_v28, %v2017_v25 }
 0x26e   : > { %v1907_v31 = vpop.permute.xlu0 %1906  ;;  %v2021_v40 = vld [vmem:[#allocation4 + $0x30] sm:$0xff] }
 0x26f   : > { %1993 = vst.msk [vmem:[#allocation4 + $0x50] sm:$0xff] %vm1982_vm11, %v1907_v31  ;;  %4507 = vmatmul.mubr.msk.bf16.vlgmr.msra.gmra.mxu0 %vm2090_vm12, %v2048_v30 }
 0x270   : > { %v1905_v32 = vpop.permute.xlu1 %1904  ;;  %v2020_v48 = vld [vmem:[#allocation4 + $0x28] sm:$0xff] }
 0x271   : > { %1992 = vst.msk [vmem:[#allocation4 + $0x48] sm:$0xff] %vm1982_vm11, %v1905_v32  ;;  %v2049_v37 = vpack.c.bf16 %v2020_v48, %v2019_v34 }
 0x272   : > { %v1718_v52 = vpop.permute.xlu0 %1717  ;;  %v2023_v59 = vld [vmem:[#allocation4 + $0x40] sm:$0xff] }
 0x273   : > { %1802 = vst.msk [vmem:[#allocation4 + $0x60] sm:$0xff] %vm1789_vm10, %v1718_v52  ;;  %4510 = vmatprep.mubr.msk.bf16.mxu0 %vm2090_vm12, %v2049_v37 }
 0x274   : > { %v1909_v55 = vpop.permute.xlu1 %1908  ;;  %v2022_v53 = vld [vmem:[#allocation4 + $0x38] sm:$0xff] }
 0x275   : > { %1994 = vst.msk [vmem:[#allocation4 + $0x58] sm:$0xff] %vm1982_vm11, %v1909_v55  ;;  %v2050_v57 = vpack.c.bf16 %v2022_v53, %v2021_v40  ;;  %v2433_v53 = vld [vmem:[#allocation3 + $0x1] sm:$0xff] }
 0x276   : > { %v1722_v56 = vpop.permute.xlu0 %1721  ;;  %v2025_v62 = vld [vmem:[#allocation4 + $0x50] sm:$0xff]  ;;  %2497 = vrot.lane.b32.xlu0 %v2433_v53, %s4610_s28 }
 0x277   : > { %1804 = vst.msk [vmem:[#allocation4 + $0x70] sm:$0xff] %vm1789_vm10, %v1722_v56  ;;  %4511 = vmatmul.mubr.msk.bf16.gmra.mxu0 %vm2090_vm12, %v2050_v57 }
 0x278   : > { %v1720_v58 = vpop.permute.xlu1 %1719  ;;  %v2024_v61 = vld [vmem:[#allocation4 + $0x48] sm:$0xff] }
 0x279   : > { %1803 = vst.msk [vmem:[#allocation4 + $0x68] sm:$0xff] %vm1789_vm10, %v1720_v58  ;;  %v2051_v60 = vpack.c.bf16 %v2024_v61, %v2023_v59 }
 0x27a   : > { %v1911_v0 = vpop.permute.xlu0 %1910 }
 0x27b   : > { %1995 = vst.msk [vmem:[#allocation4 + $0x60] sm:$0xff] %vm1982_vm11, %v1911_v0  ;;  %4514 = vmatprep.mubr.msk.bf16.mxu0 %vm2090_vm12, %v2051_v60  ;;  %v2434_v60 = vld [vmem:[#allocation3 + $0x9] sm:$0xff] }
 0x27c   : > { %v1724_v2 = vpop.permute.xlu1 %1723  ;;  %v2026_v1 = vld [vmem:[#allocation4 + $0x58] sm:$0xff]  ;;  %2499 = vrot.lane.b32.xlu1 %v2434_v60, %s4610_s28 }
 0x27d   : > { %1805 = vst.msk [vmem:[#allocation4 + $0x78] sm:$0xff] %vm1789_vm10, %v1724_v2  ;;  %v2052_v5 = vpack.c.bf16 %v2026_v1, %v2025_v62 }
 0x27e   : > { %v1915_v4 = vpop.permute.xlu0 %1914 }
 0x27f   : > { %1997 = vst.msk [vmem:[#allocation4 + $0x70] sm:$0xff] %vm1982_vm11, %v1915_v4  ;;  %4515 = vmatmul.mubr.msk.bf16.gmra.mxu0 %vm2090_vm12, %v2052_v5 }
 0x280   : > { %v1913_v7 = vpop.permute.xlu1 %1912 }
 0x281   : > { %1996 = vst.msk [vmem:[#allocation4 + $0x68] sm:$0xff] %vm1982_vm11, %v1913_v7 }
 0x282   : > { %v1726_v6 = vpop.permute.xlu0 %1725  ;;  %v2027_v12 = vld [vmem:[#allocation4 + $0x60] sm:$0xff] }
 0x283   : > { %1806 = vst.msk [vmem:[#allocation4 + $0x80] sm:$0xff] %vm1789_vm10, %v1726_v6 }
 0x284   : > { %v1917_v9 = vpop.permute.xlu1 %1916 }
 0x285   : > { %1998 = vst.msk [vmem:[#allocation4 + $0x78] sm:$0xff] %vm1982_vm11, %v1917_v9  ;;  %v2369_v9 = vld [vmem:[#allocation3] sm:$0xff] }
 0x286   : > { %v1730_v8 = vpop.permute.xlu0 %1729  ;;  %v2029_v41 = vld [vmem:[#allocation4 + $0x70] sm:$0xff]  ;;  %2401 = vst.msk [vmem:[#allocation4] sm:$0xff] %vm373_vm2, %v2369_v9 }
 0x287   : > { %1808 = vst.msk [vmem:[#allocation4 + $0x90] sm:$0xff] %vm1789_vm10, %v1730_v8 }
 0x288   : > { %v1728_v10 = vpop.permute.xlu1 %1727  ;;  %v2028_v15 = vld [vmem:[#allocation4 + $0x68] sm:$0xff] }
 0x289   : > { %1807 = vst.msk [vmem:[#allocation4 + $0x88] sm:$0xff] %vm1789_vm10, %v1728_v10  ;;  %v2053_v13 = vpack.c.bf16 %v2028_v15, %v2027_v12  ;;  %v5935_v12 = vld [vmem:[%s6963_s2] ss:$0 sm:$0xff]  ;;  %v2370_v10 = vld [vmem:[#allocation3 + $0x8] sm:$0xff] }
 0x28a   : > { %v1919_v19 = vpop.permute.xlu0 %1918  ;;  %2402 = vst.msk [vmem:[#allocation4 + $0x8] sm:$0xff] %vm373_vm2, %v2370_v10 }
 0x28b   : > { %1999 = vst.msk [vmem:[#allocation4 + $0x80] sm:$0xff] %vm1982_vm11, %v1919_v19  ;;  %4518 = vmatprep.mubr.msk.bf16.mxu0 %vm2090_vm12, %v2053_v13 }
 0x28c   : > { %v1732_v16 = vpop.permute.xlu1 %1731  ;;  %v2030_v23 = vld [vmem:[#allocation4 + $0x78] sm:$0xff] }
 0x28d   : > { %1809 = vst.msk [vmem:[#allocation4 + $0x98] sm:$0xff] %vm1789_vm10, %v1732_v16  ;;  %v2054_v42 = vpack.c.bf16 %v2030_v23, %v2029_v41 }
 0x28e   : > { %v1923_v20 = vpop.permute.xlu0 %1922 }
 0x28f   : > { %2001 = vst.msk [vmem:[#allocation4 + $0x90] sm:$0xff] %vm1982_vm11, %v1923_v20  ;;  %4519 = vmatmul.mubr.msk.bf16.gmra.mxu0 %vm2090_vm12, %v2054_v42 }
 0x290   : > { %v1921_v33 = vpop.permute.xlu1 %1920 }
 0x291   : > { %2000 = vst.msk [vmem:[#allocation4 + $0x88] sm:$0xff] %vm1982_vm11, %v1921_v33 }
 0x292   : > { %v1734_v36 = vpop.permute.xlu0 %1733  ;;  %v2031_v44 = vld [vmem:[#allocation4 + $0x80] sm:$0xff] }
 0x293   : > { %1810 = vst.msk [vmem:[#allocation4 + $0xa0] sm:$0xff] %vm1789_vm10, %v1734_v36 }
 0x294   : > { %v1925_v43 = vpop.permute.xlu1 %1924 }
 0x295   : > { %2002 = vst.msk [vmem:[#allocation4 + $0x98] sm:$0xff] %vm1982_vm11, %v1925_v43 }
 0x296   : > { %v1738_v24 = vpop.permute.xlu0 %1737  ;;  %v2033_v35 = vld [vmem:[#allocation4 + $0x90] sm:$0xff] }
 0x297   : > { %1812 = vst.msk [vmem:[#allocation4 + $0xb0] sm:$0xff] %vm1789_vm10, %v1738_v24 }
 0x298   : > { %v1736_v47 = vpop.permute.xlu1 %1735  ;;  %v2032_v29 = vld [vmem:[#allocation4 + $0x88] sm:$0xff] }
 0x299   : > { %1811 = vst.msk [vmem:[#allocation4 + $0xa8] sm:$0xff] %vm1789_vm10, %v1736_v47  ;;  %v2055_v46 = vpack.c.bf16 %v2032_v29, %v2031_v44 }
 0x29a   : > { %v1927_v49 = vpop.permute.xlu0 %1926 }
 0x29b   : > { %2003 = vst.msk [vmem:[#allocation4 + $0xa0] sm:$0xff] %vm1982_vm11, %v1927_v49  ;;  %4522 = vmatprep.mubr.msk.bf16.mxu0 %vm2090_vm12, %v2055_v46 }
 0x29c   : > { %v1740_v51 = vpop.permute.xlu1 %1739  ;;  %v2034_v54 = vld [vmem:[#allocation4 + $0x98] sm:$0xff] }
 0x29d   : > { %1813 = vst.msk [vmem:[#allocation4 + $0xb8] sm:$0xff] %vm1789_vm10, %v1740_v51  ;;  %v2056_v63 = vpack.c.bf16 %v2034_v54, %v2033_v35 }
 0x29e   : > { %v1931_v39 = vpop.permute.xlu0 %1930 }
 0x29f   : > { %2005 = vst.msk [vmem:[#allocation4 + $0xb0] sm:$0xff] %vm1982_vm11, %v1931_v39  ;;  %4523 = vmatmul.mubr.msk.bf16.gmra.mxu0 %vm2090_vm12, %v2056_v63 }
 0x2a0   : > { %v1929_v3 = vpop.permute.xlu1 %1928 }
 0x2a1   : > { %2004 = vst.msk [vmem:[#allocation4 + $0xa8] sm:$0xff] %vm1982_vm11, %v1929_v3 }
 0x2a2   : > { %v1742_v11 = vpop.permute.xlu0 %1741  ;;  %v2035_v18 = vld [vmem:[#allocation4 + $0xa0] sm:$0xff] }
 0x2a3   : > { %1814 = vst.msk [vmem:[#allocation4 + $0xc0] sm:$0xff] %vm1789_vm10, %v1742_v11 }
 0x2a4   : > { %v1933_v14 = vpop.permute.xlu1 %1932 }
 0x2a5   : > { %2006 = vst.msk [vmem:[#allocation4 + $0xb8] sm:$0xff] %vm1982_vm11, %v1933_v14 }
 0x2a6   : > { %v1746_v17 = vpop.permute.xlu0 %1745  ;;  %v2037_v26 = vld [vmem:[#allocation4 + $0xb0] sm:$0xff] }
 0x2a7   : > { %1816 = vst.msk [vmem:[#allocation4 + $0xd0] sm:$0xff] %vm1789_vm10, %v1746_v17 }
 0x2a8   : > { %v1744_v21 = vpop.permute.xlu1 %1743  ;;  %v2036_v38 = vld [vmem:[#allocation4 + $0xa8] sm:$0xff] }
 0x2a9   : > { %1815 = vst.msk [vmem:[#allocation4 + $0xc8] sm:$0xff] %vm1789_vm10, %v1744_v21  ;;  %v2057_v22 = vpack.c.bf16 %v2036_v38, %v2035_v18 }
 0x2aa   : > { %v1935_v50 = vpop.permute.xlu0 %1934 }
 0x2ab   : > { %2007 = vst.msk [vmem:[#allocation4 + $0xc0] sm:$0xff] %vm1982_vm11, %v1935_v50  ;;  %4526 = vmatprep.mubr.msk.bf16.mxu0 %vm2090_vm12, %v2057_v22 }
 0x2ac   : > { %v1748_v27 = vpop.permute.xlu1 %1747  ;;  %v2038_v25 = vld [vmem:[#allocation4 + $0xb8] sm:$0xff] }
 0x2ad   : > { %1817 = vst.msk [vmem:[#allocation4 + $0xd8] sm:$0xff] %vm1789_vm10, %v1748_v27  ;;  %v2058_v45 = vpack.c.bf16 %v2038_v25, %v2037_v26 }
 0x2ae   : > { %v1939_v28 = vpop.permute.xlu0 %1938 }
 0x2af   : > { %2009 = vst.msk [vmem:[#allocation4 + $0xd0] sm:$0xff] %vm1982_vm11, %v1939_v28  ;;  %4527 = vmatmul.mubr.msk.bf16.gmra.mxu0 %vm2090_vm12, %v2058_v45 }
 0x2b0   : > { %v1937_v30 = vpop.permute.xlu1 %1936 }
 0x2b1   : > { %2008 = vst.msk [vmem:[#allocation4 + $0xc8] sm:$0xff] %vm1982_vm11, %v1937_v30 }
 0x2b2   : > { %v1750_v31 = vpop.permute.xlu0 %1749  ;;  %v2039_v48 = vld [vmem:[#allocation4 + $0xc0] sm:$0xff] }
 0x2b3   : > { %1818 = vst.msk [vmem:[#allocation4 + $0xe0] sm:$0xff] %vm1789_vm10, %v1750_v31 }
 0x2b4   : > { %v1941_v34 = vpop.permute.xlu1 %1940 }
 0x2b5   : > { %2010 = vst.msk [vmem:[#allocation4 + $0xd8] sm:$0xff] %vm1982_vm11, %v1941_v34 }
 0x2b6   : > { %v1754_v32 = vpop.permute.xlu0 %1753  ;;  %v2041_v57 = vld [vmem:[#allocation4 + $0xd0] sm:$0xff] }
 0x2b7   : > { %1820 = vst.msk [vmem:[#allocation4 + $0xf0] sm:$0xff] %vm1789_vm10, %v1754_v32 }
 0x2b8   : > { %v1752_v37 = vpop.permute.xlu1 %1751  ;;  %v2040_v52 = vld [vmem:[#allocation4 + $0xc8] sm:$0xff] }
 0x2b9   : > { %1819 = vst.msk [vmem:[#allocation4 + $0xe8] sm:$0xff] %vm1789_vm10, %v1752_v37  ;;  %v2059_v40 = vpack.c.bf16 %v2040_v52, %v2039_v48 }
 0x2ba   : > { %v1943_v55 = vpop.permute.xlu0 %1942 }
 0x2bb   : > { %2011 = vst.msk [vmem:[#allocation4 + $0xe0] sm:$0xff] %vm1982_vm11, %v1943_v55  ;;  %4530 = vmatprep.mubr.msk.bf16.mxu0 %vm2090_vm12, %v2059_v40 }
 0x2bc   : > { %v1756_v56 = vpop.permute.xlu1 %1755  ;;  %v2042_v59 = vld [vmem:[#allocation4 + $0xd8] sm:$0xff] }
 0x2bd   : > { %1821 = vst.msk [vmem:[#allocation4 + $0xf8] sm:$0xff] %vm1789_vm10, %v1756_v56  ;;  %v2060_v58 = vpack.c.bf16 %v2042_v59, %v2041_v57 }
 0x2be   : > { %v1947_v61 = vpop.permute.xlu0 %1946 }
 0x2bf   : > { %2013 = vst.msk [vmem:[#allocation4 + $0xf0] sm:$0xff] %vm1982_vm11, %v1947_v61  ;;  %4531 = vmatmul.mubr.msk.bf16.gmra.mxu0 %vm2090_vm12, %v2060_v58 }
 0x2c0   : > { %v1945_v0 = vpop.permute.xlu1 %1944 }
 0x2c1   : > { %2012 = vst.msk [vmem:[#allocation4 + $0xe8] sm:$0xff] %vm1982_vm11, %v1945_v0 }
 0x2c2   : > { %v2043_v2 = vld [vmem:[#allocation4 + $0xe0] sm:$0xff] }
 0x2c4   : > { %v1949_v62 = vpop.permute.xlu1 %1948 }
 0x2c5   : > { %2014 = vst.msk [vmem:[#allocation4 + $0xf8] sm:$0xff] %vm1982_vm11, %v1949_v62 }
 0x2c6   : > { %v2045_v4 = vld [vmem:[#allocation4 + $0xf0] sm:$0xff] }
 0x2c8   : > { %v2044_v1 = vld [vmem:[#allocation4 + $0xe8] sm:$0xff] }
 0x2c9   : > { %v2061_v5 = vpack.c.bf16 %v2044_v1, %v2043_v2 }
 0x2cb   : > { %4534 = vmatprep.mubr.msk.bf16.mxu0 %vm2090_vm12, %v2061_v5 }
 0x2cc   : > { %v2046_v7 = vld [vmem:[#allocation4 + $0xf8] sm:$0xff] }
 0x2cd   : > { %v2062_v6 = vpack.c.bf16 %v2046_v7, %v2045_v4 }
 0x2cf   : > { %4535 = vmatmul.mubr.msk.bf16.gmra.mxu0 %vm2090_vm12, %v2062_v6 }
 0x2e8   : > { %v2498_v8 = vpop.permute.xlu0 %2497 }
 0x2e9   : > { %2593 = vst.msk [vmem:[#allocation4] sm:$0xff] %vm630_vm3, %v2498_v8 }
 0x2ee   : > { %v2500_v19 = vpop.permute.xlu1 %2499 }
 0x2ef   : > { %2594 = vst.msk [vmem:[#allocation4 + $0x8] sm:$0xff] %vm630_vm3, %v2500_v19 }
 0x32f   : > { %v4508_v15 = vpop.f32.mrf.mxu0 }
 0x330   : > { %v2186_v13 = vadd.f32 %v4508_v15, %v5935_v12 }
 0x331   : > { %v2177_v41 = vpop.f32.mrf.mxu0 }
 0x332   : > { %v2306_v16 = vmax.f32 %v2186_v13, 0.0  ;;  %v2178_v23 = vadd.f32 %v5935_v12, %v2177_v41 }
 0x333   : > { %v4509_v42 = vpop.f32.mrf.mxu0 }
 0x334   : > { %2339 = vst.msk [vmem:[#allocation3 + $0x31] sm:$0xff] %vm373_vm2, %v2306_v16  ;;  %v2304_v20 = vmax.f32 %v2178_v23, 0.0  ;;  %v2189_v33 = vadd.f32 %v4509_v42, %v5935_v12 }
 0x335   : > { %v2180_v36 = vpop.f32.mrf.mxu0 }
 0x336   : > { %2337 = vst.msk [vmem:[#allocation3 + $0x19] sm:$0xff] %vm373_vm2, %v2304_v20  ;;  %v2307_v43 = vmax.f32 %v2189_v33, 0.0  ;;  %v2181_v24 = vadd.f32 %v5935_v12, %v2180_v36 }
 0x337   : > { %v4512_v44 = vpop.f32.mrf.mxu0 }
 0x338   : > { %2340 = vst.msk [vmem:[#allocation3 + $0x39] sm:$0xff] %vm373_vm2, %v2307_v43  ;;  %v2305_v47 = vmax.f32 %v2181_v24, 0.0  ;;  %v2202_v29 = vadd.f32 %v4512_v44, %v5935_v12 }
 0x339   : > { %v2193_v46 = vpop.f32.mrf.mxu0 }
 0x33a   : > { %2338 = vst.msk [vmem:[#allocation3 + $0x21] sm:$0xff] %vm373_vm2, %v2305_v47  ;;  %v2310_v49 = vmax.f32 %v2202_v29, 0.0  ;;  %v2194_v35 = vadd.f32 %v5935_v12, %v2193_v46 }
 0x33b   : > { %v4513_v51 = vpop.f32.mrf.mxu0  ;;  %v5950_v54 = vld [vmem:[#allocation3 + $0x30] sm:$0xff] }
 0x33c   : > { %2343 = vst.msk [vmem:[#allocation3 + $0x61] sm:$0xff] %vm373_vm2, %v2310_v49  ;;  %v2308_v63 = vmax.f32 %v2194_v35, 0.0  ;;  %v2205_v39 = vadd.f32 %v4513_v51, %v5935_v12  ;;  %2405 = vst.msk [vmem:[#allocation4 + $0x20] sm:$0xff] %vm373_vm2, %v5950_v54  ;;  %v5972_v25 = vld [vmem:[#allocation3 + $0x31] sm:$0xff] }
 0x33d   : > { %v2196_v3 = vpop.f32.mrf.mxu0  ;;  %v5956_v11 = vld [vmem:[#allocation3 + $0x19] sm:$0xff] }
 0x33e   : > { %v5958_v14 = vld [vmem:[#allocation3 + $0x18] sm:$0xff]  ;;  %2341 = vst.msk [vmem:[#allocation3 + $0x49] sm:$0xff] %vm373_vm2, %v2308_v63  ;;  %v2311_v17 = vmax.f32 %v2205_v39, 0.0  ;;  %v2197_v18 = vadd.f32 %v5935_v12, %v2196_v3  ;;  %2501 = vrot.lane.b32.xlu0 %v5956_v11, %s4610_s28 }
 0x33f   : > { %2403 = vst.msk [vmem:[#allocation4 + $0x10] sm:$0xff] %vm373_vm2, %v5958_v14  ;;  %v4516_v21 = vpop.f32.mrf.mxu0  ;;  %v5968_v50 = vld [vmem:[#allocation3 + $0x38] sm:$0xff] }
 0x340   : > { %2344 = vst.msk [vmem:[#allocation3 + $0x69] sm:$0xff] %vm373_vm2, %v2311_v17  ;;  %v2309_v38 = vmax.f32 %v2197_v18, 0.0  ;;  %v2218_v22 = vadd.f32 %v4516_v21, %v5935_v12  ;;  %2406 = vst.msk [vmem:[#allocation4 + $0x28] sm:$0xff] %vm373_vm2, %v5968_v50  ;;  %v5992_v52 = vld [vmem:[#allocation3 + $0x39] sm:$0xff] }
 0x341   : > { %v2209_v26 = vpop.f32.mrf.mxu0  ;;  %v5970_v27 = vld [vmem:[#allocation3 + $0x21] sm:$0xff] }
 0x342   : > { %2342 = vst.msk [vmem:[#allocation3 + $0x51] sm:$0xff] %vm373_vm2, %v2309_v38  ;;  %v2314_v45 = vmax.f32 %v2218_v22, 0.0  ;;  %v2210_v28 = vadd.f32 %v5935_v12, %v2209_v26  ;;  %2503 = vrot.lane.b32.xlu1 %v5970_v27, %s4610_s28  ;;  %2505 = vrot.lane.b32.xlu0 %v5972_v25, %s4610_s28  ;;  %v5982_v30 = vld [vmem:[#allocation3 + $0x20] sm:$0xff] }
 0x343   : > { %v4517_v31 = vpop.f32.mrf.mxu0  ;;  %2404 = vst.msk [vmem:[#allocation4 + $0x18] sm:$0xff] %vm373_vm2, %v5982_v30  ;;  %v5986_v34 = vld [vmem:[#allocation3 + $0x60] sm:$0xff] }
 0x344   : > { %2347 = vst.msk [vmem:[#allocation3 + $0x91] sm:$0xff] %vm373_vm2, %v2314_v45  ;;  %v2312_v32 = vmax.f32 %v2210_v28, 0.0  ;;  %v2221_v48 = vadd.f32 %v4517_v31, %v5935_v12  ;;  %2409 = vst.msk [vmem:[#allocation4 + $0x40] sm:$0xff] %vm373_vm2, %v5986_v34  ;;  %v6011_v61 = vld [vmem:[#allocation3 + $0x61] sm:$0xff] }
 0x345   : > { %v2212_v37 = vpop.f32.mrf.mxu0  ;;  %v5994_v40 = vld [vmem:[#allocation3 + $0x49] sm:$0xff] }
 0x346   : > { %v5996_v55 = vld [vmem:[#allocation3 + $0x48] sm:$0xff]  ;;  %2345 = vst.msk [vmem:[#allocation3 + $0x79] sm:$0xff] %vm373_vm2, %v2312_v32  ;;  %v2315_v53 = vmax.f32 %v2221_v48, 0.0  ;;  %v2213_v57 = vadd.f32 %v5935_v12, %v2212_v37  ;;  %2507 = vrot.lane.b32.xlu1 %v5992_v52, %s4610_s28  ;;  %2509 = vrot.lane.b32.xlu0 %v5994_v40, %s4610_s28 }
 0x347   : > { %2407 = vst.msk [vmem:[#allocation4 + $0x30] sm:$0xff] %vm373_vm2, %v5996_v55  ;;  %v6007_v59 = vld [vmem:[#allocation3 + $0x68] sm:$0xff] }
 0x348   : > { %2348 = vst.msk [vmem:[#allocation3 + $0x99] sm:$0xff] %vm373_vm2, %v2315_v53  ;;  %v2313_v56 = vmax.f32 %v2213_v57, 0.0  ;;  %2410 = vst.msk [vmem:[#allocation4 + $0x48] sm:$0xff] %vm373_vm2, %v6007_v59  ;;  %v6028_v62 = vld [vmem:[#allocation3 + $0x69] sm:$0xff] }
 0x349   : > { %v6009_v58 = vld [vmem:[#allocation3 + $0x51] sm:$0xff] }
 0x34a   : > { %2346 = vst.msk [vmem:[#allocation3 + $0x81] sm:$0xff] %vm373_vm2, %v2313_v56  ;;  %2511 = vrot.lane.b32.xlu1 %v6009_v58, %s4610_s28  ;;  %2513 = vrot.lane.b32.xlu0 %v6011_v61, %s4610_s28  ;;  %v6020_v60 = vld [vmem:[#allocation3 + $0x50] sm:$0xff] }
 0x34b   : > { %2408 = vst.msk [vmem:[#allocation4 + $0x38] sm:$0xff] %vm373_vm2, %v6020_v60  ;;  %v6024_v0 = vld [vmem:[#allocation3 + $0x90] sm:$0xff] }
 0x34c   : > { %2413 = vst.msk [vmem:[#allocation4 + $0x60] sm:$0xff] %vm373_vm2, %v6024_v0  ;;  %v2445_v8 = vld [vmem:[#allocation3 + $0x91] sm:$0xff] }
 0x34d   : > { %v6030_v2 = vld [vmem:[#allocation3 + $0x79] sm:$0xff] }
 0x34e   : > { %v6032_v1 = vld [vmem:[#allocation3 + $0x78] sm:$0xff]  ;;  %2515 = vrot.lane.b32.xlu1 %v6028_v62, %s4610_s28  ;;  %2517 = vrot.lane.b32.xlu0 %v6030_v2, %s4610_s28 }
 0x34f   : > { %2411 = vst.msk [vmem:[#allocation4 + $0x50] sm:$0xff] %vm373_vm2, %v6032_v1  ;;  %v4520_v5 = vpop.f32.mrf.mxu0  ;;  %v6041_v7 = vld [vmem:[#allocation3 + $0x98] sm:$0xff] }
 0x350   : > { %v2234_v4 = vadd.f32 %v4520_v5, %v5935_v12  ;;  %2414 = vst.msk [vmem:[#allocation4 + $0x68] sm:$0xff] %vm373_vm2, %v6041_v7  ;;  %v2446_v42 = vld [vmem:[#allocation3 + $0x99] sm:$0xff] }
 0x351   : > { %v2225_v6 = vpop.f32.mrf.mxu0  ;;  %v6043_v9 = vld [vmem:[#allocation3 + $0x81] sm:$0xff] }
 0x352   : > { %v2318_v10 = vmax.f32 %v2234_v4, 0.0  ;;  %v2226_v15 = vadd.f32 %v5935_v12, %v2225_v6  ;;  %2519 = vrot.lane.b32.xlu1 %v6043_v9, %s4610_s28  ;;  %2521 = vrot.lane.b32.xlu0 %v2445_v8, %s4610_s28  ;;  %v6051_v13 = vld [vmem:[#allocation3 + $0x80] sm:$0xff] }
 0x353   : > { %v4521_v19 = vpop.f32.mrf.mxu0  ;;  %2412 = vst.msk [vmem:[#allocation4 + $0x58] sm:$0xff] %vm373_vm2, %v6051_v13 }
 0x354   : > { %2351 = vst.msk [vmem:[#allocation3 + $0xc1] sm:$0xff] %vm373_vm2, %v2318_v10  ;;  %v2316_v41 = vmax.f32 %v2226_v15, 0.0  ;;  %v2237_v16 = vadd.f32 %v4521_v19, %v5935_v12 }
 0x355   : > { %v2228_v23 = vpop.f32.mrf.mxu0 }
 0x356   : > { %2349 = vst.msk [vmem:[#allocation3 + $0xa9] sm:$0xff] %vm373_vm2, %v2316_v41  ;;  %v2319_v20 = vmax.f32 %v2237_v16, 0.0  ;;  %v2229_v33 = vadd.f32 %v5935_v12, %v2228_v23  ;;  %2523 = vrot.lane.b32.xlu1 %v2446_v42, %s4610_s28 }
 0x358   : > { %2352 = vst.msk [vmem:[#allocation3 + $0xc9] sm:$0xff] %vm373_vm2, %v2319_v20  ;;  %v2317_v36 = vmax.f32 %v2229_v33, 0.0 }
 0x35a   : > { %2350 = vst.msk [vmem:[#allocation3 + $0xb1] sm:$0xff] %vm373_vm2, %v2317_v36 }
 0x35b   : > { %v6062_v43 = vld [vmem:[#allocation3 + $0xc0] sm:$0xff] }
 0x35c   : > { %2417 = vst.msk [vmem:[#allocation4 + $0x80] sm:$0xff] %vm373_vm2, %v6062_v43  ;;  %v2449_v51 = vld [vmem:[#allocation3 + $0xc1] sm:$0xff] }
 0x35d   : > { %v2447_v24 = vld [vmem:[#allocation3 + $0xa9] sm:$0xff] }
 0x35e   : > { %v6066_v44 = vld [vmem:[#allocation3 + $0xa8] sm:$0xff]  ;;  %2525 = vrot.lane.b32.xlu0 %v2447_v24, %s4610_s28 }
 0x35f   : > { %2415 = vst.msk [vmem:[#allocation4 + $0x70] sm:$0xff] %vm373_vm2, %v6066_v44  ;;  %v4524_v47 = vpop.f32.mrf.mxu0  ;;  %v6072_v46 = vld [vmem:[#allocation3 + $0xc8] sm:$0xff] }
 0x360   : > { %v2250_v29 = vadd.f32 %v4524_v47, %v5935_v12  ;;  %2418 = vst.msk [vmem:[#allocation4 + $0x88] sm:$0xff] %vm373_vm2, %v6072_v46  ;;  %v2450_v22 = vld [vmem:[#allocation3 + $0xc9] sm:$0xff] }
 0x361   : > { %v2241_v49 = vpop.f32.mrf.mxu0  ;;  %v2448_v35 = vld [vmem:[#allocation3 + $0xb1] sm:$0xff] }
 0x362   : > { %v2322_v63 = vmax.f32 %v2250_v29, 0.0  ;;  %v2242_v39 = vadd.f32 %v5935_v12, %v2241_v49  ;;  %2527 = vrot.lane.b32.xlu1 %v2448_v35, %s4610_s28  ;;  %2529 = vrot.lane.b32.xlu0 %v2449_v51, %s4610_s28  ;;  %v6079_v3 = vld [vmem:[#allocation3 + $0xb0] sm:$0xff] }
 0x363   : > { %v4525_v17 = vpop.f32.mrf.mxu0  ;;  %2416 = vst.msk [vmem:[#allocation4 + $0x78] sm:$0xff] %vm373_vm2, %v6079_v3 }
 0x364   : > { %2355 = vst.msk [vmem:[#allocation3 + $0xf1] sm:$0xff] %vm373_vm2, %v2322_v63  ;;  %v2320_v18 = vmax.f32 %v2242_v39, 0.0  ;;  %v2253_v21 = vadd.f32 %v4525_v17, %v5935_v12 }
 0x365   : > { %v2244_v38 = vpop.f32.mrf.mxu0 }
 0x366   : > { %2353 = vst.msk [vmem:[#allocation3 + $0xd9] sm:$0xff] %vm373_vm2, %v2320_v18  ;;  %v2323_v26 = vmax.f32 %v2253_v21, 0.0  ;;  %v2245_v45 = vadd.f32 %v5935_v12, %v2244_v38  ;;  %2531 = vrot.lane.b32.xlu1 %v2450_v22, %s4610_s28 }
 0x368   : > { %2356 = vst.msk [vmem:[#allocation3 + $0xf9] sm:$0xff] %vm373_vm2, %v2323_v26  ;;  %v2321_v28 = vmax.f32 %v2245_v45, 0.0 }
 0x36a   : > { %2354 = vst.msk [vmem:[#allocation3 + $0xe1] sm:$0xff] %vm373_vm2, %v2321_v28 }
 0x36b   : > { %v6090_v31 = vld [vmem:[#allocation3 + $0xf0] sm:$0xff] }
 0x36c   : > { %2421 = vst.msk [vmem:[#allocation4 + $0xa0] sm:$0xff] %vm373_vm2, %v6090_v31  ;;  %v2453_v4 = vld [vmem:[#allocation3 + $0xf1] sm:$0xff] }
 0x36d   : > { %v2451_v32 = vld [vmem:[#allocation3 + $0xd9] sm:$0xff] }
 0x36e   : > { %v6094_v48 = vld [vmem:[#allocation3 + $0xd8] sm:$0xff]  ;;  %2533 = vrot.lane.b32.xlu0 %v2451_v32, %s4610_s28 }
 0x36f   : > { %2419 = vst.msk [vmem:[#allocation4 + $0x90] sm:$0xff] %vm373_vm2, %v6094_v48  ;;  %v4528_v37 = vpop.f32.mrf.mxu0  ;;  %v6100_v57 = vld [vmem:[#allocation3 + $0xf8] sm:$0xff] }
 0x370   : > { %v2266_v53 = vadd.f32 %v4528_v37, %v5935_v12  ;;  %2422 = vst.msk [vmem:[#allocation4 + $0xa8] sm:$0xff] %vm373_vm2, %v6100_v57  ;;  %v2454_v23 = vld [vmem:[#allocation3 + $0xf9] sm:$0xff] }
 0x371   : > { %v2257_v56 = vpop.f32.mrf.mxu0  ;;  %v2452_v5 = vld [vmem:[#allocation3 + $0xe1] sm:$0xff] }
 0x372   : > { %v2326_v6 = vmax.f32 %v2266_v53, 0.0  ;;  %v2258_v8 = vadd.f32 %v5935_v12, %v2257_v56  ;;  %2535 = vrot.lane.b32.xlu1 %v2452_v5, %s4610_s28  ;;  %2537 = vrot.lane.b32.xlu0 %v2453_v4, %s4610_s28  ;;  %v6107_v10 = vld [vmem:[#allocation3 + $0xe0] sm:$0xff] }
 0x373   : > { %v4529_v15 = vpop.f32.mrf.mxu0  ;;  %2420 = vst.msk [vmem:[#allocation4 + $0x98] sm:$0xff] %vm373_vm2, %v6107_v10 }
 0x374   : > { %2359 = vst.msk [vmem:[#allocation3 + $0x121] sm:$0xff] %vm373_vm2, %v2326_v6  ;;  %v2324_v19 = vmax.f32 %v2258_v8, 0.0  ;;  %v2269_v41 = vadd.f32 %v4529_v15, %v5935_v12 }
 0x375   : > { %v2260_v16 = vpop.f32.mrf.mxu0 }
 0x376   : > { %2357 = vst.msk [vmem:[#allocation3 + $0x109] sm:$0xff] %vm373_vm2, %v2324_v19  ;;  %v2327_v42 = vmax.f32 %v2269_v41, 0.0  ;;  %v2261_v20 = vadd.f32 %v5935_v12, %v2260_v16  ;;  %2539 = vrot.lane.b32.xlu1 %v2454_v23, %s4610_s28 }
 0x378   : > { %2360 = vst.msk [vmem:[#allocation3 + $0x129] sm:$0xff] %vm373_vm2, %v2327_v42  ;;  %v2325_v33 = vmax.f32 %v2261_v20, 0.0 }
 0x37a   : > { %2358 = vst.msk [vmem:[#allocation3 + $0x111] sm:$0xff] %vm373_vm2, %v2325_v33 }
 0x37b   : > { %v6118_v36 = vld [vmem:[#allocation3 + $0x120] sm:$0xff] }
 0x37c   : > { %2425 = vst.msk [vmem:[#allocation4 + $0xc0] sm:$0xff] %vm373_vm2, %v6118_v36  ;;  %v2457_v39 = vld [vmem:[#allocation3 + $0x121] sm:$0xff] }
 0x37d   : > { %v2455_v24 = vld [vmem:[#allocation3 + $0x109] sm:$0xff] }
 0x37e   : > { %v6122_v47 = vld [vmem:[#allocation3 + $0x108] sm:$0xff]  ;;  %2541 = vrot.lane.b32.xlu0 %v2455_v24, %s4610_s28 }
 0x37f   : > { %2423 = vst.msk [vmem:[#allocation4 + $0xb0] sm:$0xff] %vm373_vm2, %v6122_v47  ;;  %v4532_v29 = vpop.f32.mrf.mxu0  ;;  %v6128_v35 = vld [vmem:[#allocation3 + $0x128] sm:$0xff] }
 0x380   : > { %v2282_v49 = vadd.f32 %v4532_v29, %v5935_v12  ;;  %2426 = vst.msk [vmem:[#allocation4 + $0xc8] sm:$0xff] %vm373_vm2, %v6128_v35  ;;  %v2458_v28 = vld [vmem:[#allocation3 + $0x129] sm:$0xff] }
 0x381   : > { %v2273_v51 = vpop.f32.mrf.mxu0  ;;  %v2456_v63 = vld [vmem:[#allocation3 + $0x111] sm:$0xff] }
 0x382   : > { %v2330_v17 = vmax.f32 %v2282_v49, 0.0  ;;  %v2274_v18 = vadd.f32 %v5935_v12, %v2273_v51  ;;  %2543 = vrot.lane.b32.xlu1 %v2456_v63, %s4610_s28  ;;  %2545 = vrot.lane.b32.xlu0 %v2457_v39, %s4610_s28  ;;  %v6135_v21 = vld [vmem:[#allocation3 + $0x110] sm:$0xff] }
 0x383   : > { %v4533_v38 = vpop.f32.mrf.mxu0  ;;  %2424 = vst.msk [vmem:[#allocation4 + $0xb8] sm:$0xff] %vm373_vm2, %v6135_v21 }
 0x384   : > { %2363 = vst.msk [vmem:[#allocation3 + $0x151] sm:$0xff] %vm373_vm2, %v2330_v17  ;;  %v2328_v22 = vmax.f32 %v2274_v18, 0.0  ;;  %v2285_v26 = vadd.f32 %v4533_v38, %v5935_v12 }
 0x385   : > { %v2276_v45 = vpop.f32.mrf.mxu0 }
 0x386   : > { %2361 = vst.msk [vmem:[#allocation3 + $0x139] sm:$0xff] %vm373_vm2, %v2328_v22  ;;  %v2331_v32 = vmax.f32 %v2285_v26, 0.0  ;;  %v2277_v37 = vadd.f32 %v5935_v12, %v2276_v45  ;;  %2547 = vrot.lane.b32.xlu1 %v2458_v28, %s4610_s28  ;;  %v2625_v22 = vld [vmem:[#allocation3 + $0x2] sm:$0xff]  ;;  %v2626_v45 = vld [vmem:[#allocation3 + $0xa] sm:$0xff]  ;;  %v6173_v28 = vld [vmem:[#allocation3 + $0x1a] sm:$0xff] }
 0x388   : > { %2364 = vst.msk [vmem:[#allocation3 + $0x159] sm:$0xff] %vm373_vm2, %v2331_v32  ;;  %v2329_v53 = vmax.f32 %v2277_v37, 0.0  ;;  %v6178_v32 = vld [vmem:[#allocation3 + $0x22] sm:$0xff]  ;;  %v6180_v37 = vld [vmem:[#allocation3 + $0x32] sm:$0xff] }
 0x38a   : > { %2362 = vst.msk [vmem:[#allocation3 + $0x141] sm:$0xff] %vm373_vm2, %v2329_v53  ;;  %v6186_v53 = vld [vmem:[#allocation3 + $0x3a] sm:$0xff] }
 0x38b   : > { %v2397_v56 = vld [vmem:[#allocation3 + $0x150] sm:$0xff] }
 0x38c   : > { %2429 = vst.msk [vmem:[#allocation4 + $0xe0] sm:$0xff] %vm373_vm2, %v2397_v56  ;;  %v2461_v16 = vld [vmem:[#allocation3 + $0x151] sm:$0xff] }
 0x38d   : > { %v2459_v5 = vld [vmem:[#allocation3 + $0x139] sm:$0xff]  ;;  %v6188_v56 = vld [vmem:[#allocation3 + $0x4a] sm:$0xff] }
 0x38e   : > { %v6147_v4 = vld [vmem:[#allocation3 + $0x138] sm:$0xff]  ;;  %2549 = vrot.lane.b32.xlu0 %v2459_v5, %s4610_s28 }
 0x38f   : > { %2427 = vst.msk [vmem:[#allocation4 + $0xd0] sm:$0xff] %vm373_vm2, %v6147_v4  ;;  %v4536_v6 = vpop.f32.mrf.mxu0  ;;  %v2398_v15 = vld [vmem:[#allocation3 + $0x158] sm:$0xff] }
 0x390   : > { %v2298_v8 = vadd.f32 %v4536_v6, %v5935_v12  ;;  %2430 = vst.msk [vmem:[#allocation4 + $0xe8] sm:$0xff] %vm373_vm2, %v2398_v15  ;;  %v2462_v51 = vld [vmem:[#allocation3 + $0x159] sm:$0xff] }
 0x391   : > { %v2289_v19 = vpop.f32.mrf.mxu0  ;;  %v2460_v41 = vld [vmem:[#allocation3 + $0x141] sm:$0xff]  ;;  %v6195_v6 = vld [vmem:[#allocation3 + $0x52] sm:$0xff] }
 0x392   : > { %v2334_v23 = vmax.f32 %v2298_v8, 0.0  ;;  %v2290_v42 = vadd.f32 %v5935_v12, %v2289_v19  ;;  %2551 = vrot.lane.b32.xlu1 %v2460_v41, %s4610_s28  ;;  %2553 = vrot.lane.b32.xlu0 %v2461_v16, %s4610_s28  ;;  %v6157_v20 = vld [vmem:[#allocation3 + $0x140] sm:$0xff]  ;;  %v6205_v41 = vld [vmem:[#allocation3 + $0x6a] sm:$0xff] }
 0x393   : > { %v4537_v33 = vpop.f32.mrf.mxu0  ;;  %2428 = vst.msk [vmem:[#allocation4 + $0xd8] sm:$0xff] %vm373_vm2, %v6157_v20  ;;  %v6197_v8 = vld [vmem:[#allocation3 + $0x62] sm:$0xff]  ;;  %v6207_v16 = vld [vmem:[#allocation3 + $0x7a] sm:$0xff] }
 0x394   : > { %2367 = vst.msk [vmem:[#allocation3 + $0x181] sm:$0xff] %vm373_vm2, %v2334_v23  ;;  %v2332_v24 = vmax.f32 %v2290_v42, 0.0  ;;  %v2301_v29 = vadd.f32 %v4537_v33, %v5935_v12  ;;  %v6215_v33 = vld [vmem:[#allocation3 + $0x82] sm:$0xff] }
 0x395   : > { %v2292_v49 = vpop.f32.mrf.mxu0 }
 0x396   : > { %2365 = vst.msk [vmem:[#allocation3 + $0x169] sm:$0xff] %vm373_vm2, %v2332_v24  ;;  %v2335_v63 = vmax.f32 %v2301_v29, 0.0  ;;  %v2293_v39 = vadd.f32 %v5935_v12, %v2292_v49  ;;  %2555 = vrot.lane.b32.xlu1 %v2462_v51, %s4610_s28  ;;  %v6217_v24 = vld [vmem:[#allocation3 + $0x92] sm:$0xff]  ;;  %v6225_v51 = vld [vmem:[#allocation3 + $0x9a] sm:$0xff] }
 0x398   : > { %2368 = vst.msk [vmem:[#allocation3 + $0x189] sm:$0xff] %vm373_vm2, %v2335_v63  ;;  %v2333_v17 = vmax.f32 %v2293_v39, 0.0  ;;  %v6227_v63 = vld [vmem:[#allocation3 + $0xaa] sm:$0xff] }
 0x39a   : > { %2366 = vst.msk [vmem:[#allocation3 + $0x171] sm:$0xff] %vm373_vm2, %v2333_v17 }
 0x39d   : > { %v2463_v18 = vld [vmem:[#allocation3 + $0x169] sm:$0xff] }
 0x39e   : > { %v2399_v38 = vld [vmem:[#allocation3 + $0x168] sm:$0xff]  ;;  %2557 = vrot.lane.b32.xlu0 %v2463_v18, %s4610_s28  ;;  %v6235_v18 = vld [vmem:[#allocation3 + $0xb2] sm:$0xff] }
 0x39f   : > { %2431 = vst.msk [vmem:[#allocation4 + $0xf0] sm:$0xff] %vm373_vm2, %v2399_v38  ;;  %v6237_v38 = vld [vmem:[#allocation3 + $0xc2] sm:$0xff] }
 0x3a1   : > { %v2464_v26 = vld [vmem:[#allocation3 + $0x171] sm:$0xff] }
 0x3a2   : > { %2559 = vrot.lane.b32.xlu1 %v2464_v26, %s4610_s28  ;;  %2689 = vrot.lane.b32.xlu0 %v2625_v22, %s4611_s29  ;;  %v2400_v12 = vld [vmem:[#allocation3 + $0x170] sm:$0xff] }
 0x3a3   : > { %2432 = vst.msk [vmem:[#allocation4 + $0xf8] sm:$0xff] %vm373_vm2, %v2400_v12  ;;  %v6245_v12 = vld [vmem:[#allocation3 + $0xca] sm:$0xff] }
 0x3a6   : > { %2691 = vrot.lane.b32.xlu1 %v2626_v45, %s4611_s29  ;;  %2693 = vrot.lane.b32.xlu0 %v6173_v28, %s4611_s29  ;;  %v6247_v45 = vld [vmem:[#allocation3 + $0xda] sm:$0xff] }
 0x3aa   : > { %2695 = vrot.lane.b32.xlu1 %v6178_v32, %s4611_s29  ;;  %2697 = vrot.lane.b32.xlu0 %v6180_v37, %s4611_s29 }
 0x3ae   : > { %2699 = vrot.lane.b32.xlu1 %v6186_v53, %s4611_s29  ;;  %2701 = vrot.lane.b32.xlu0 %v6188_v56, %s4611_s29 }
 0x3b0   : > { %v2502_v5 = vpop.permute.xlu0 %2501 }
 0x3b1   : > { %2595 = vst.msk [vmem:[#allocation4 + $0x10] sm:$0xff] %vm630_vm3, %v2502_v5 }
 0x3b2   : > { %2703 = vrot.lane.b32.xlu1 %v6195_v6, %s4611_s29  ;;  %2705 = vrot.lane.b32.xlu0 %v6197_v8, %s4611_s29 }
 0x3b4   : > { %v2504_v15 = vpop.permute.xlu1 %2503  ;;  %v2506_v19 = vpop.permute.xlu0 %2505 }
 0x3b5   : > { %2596 = vst.msk [vmem:[#allocation4 + $0x18] sm:$0xff] %vm630_vm3, %v2504_v15  ;;  %2597 = vst.msk [vmem:[#allocation4 + $0x20] sm:$0xff] %vm630_vm3, %v2506_v19  ;;  %v6254_v15 = vld [vmem:[#allocation3 + $0xe2] sm:$0xff]  ;;  %v2645_v19 = vld [vmem:[#allocation3 + $0xf2] sm:$0xff] }
 0x3b6   : > { %2707 = vrot.lane.b32.xlu1 %v6205_v41, %s4611_s29  ;;  %2709 = vrot.lane.b32.xlu0 %v6207_v16, %s4611_s29 }
 0x3b8   : > { %v2508_v23 = vpop.permute.xlu1 %2507  ;;  %v2510_v42 = vpop.permute.xlu0 %2509 }
 0x3b9   : > { %2598 = vst.msk [vmem:[#allocation4 + $0x28] sm:$0xff] %vm630_vm3, %v2508_v23  ;;  %2599 = vst.msk [vmem:[#allocation4 + $0x30] sm:$0xff] %vm630_vm3, %v2510_v42  ;;  %v2646_v23 = vld [vmem:[#allocation3 + $0xfa] sm:$0xff]  ;;  %v2647_v42 = vld [vmem:[#allocation3 + $0x10a] sm:$0xff] }
 0x3ba   : > { %2711 = vrot.lane.b32.xlu1 %v6215_v33, %s4611_s29  ;;  %2713 = vrot.lane.b32.xlu0 %v6217_v24, %s4611_s29 }
 0x3bc   : > { %v2512_v29 = vpop.permute.xlu1 %2511  ;;  %v2514_v49 = vpop.permute.xlu0 %2513 }
 0x3bd   : > { %2600 = vst.msk [vmem:[#allocation4 + $0x38] sm:$0xff] %vm630_vm3, %v2512_v29  ;;  %2601 = vst.msk [vmem:[#allocation4 + $0x40] sm:$0xff] %vm630_vm3, %v2514_v49  ;;  %v2648_v49 = vld [vmem:[#allocation3 + $0x112] sm:$0xff] }
 0x3be   : > { %2715 = vrot.lane.b32.xlu1 %v6225_v51, %s4611_s29  ;;  %2717 = vrot.lane.b32.xlu0 %v6227_v63, %s4611_s29 }
 0x3c0   : > { %v2516_v39 = vpop.permute.xlu1 %2515  ;;  %v2518_v17 = vpop.permute.xlu0 %2517 }
 0x3c1   : > { %2602 = vst.msk [vmem:[#allocation4 + $0x48] sm:$0xff] %vm630_vm3, %v2516_v39  ;;  %2603 = vst.msk [vmem:[#allocation4 + $0x50] sm:$0xff] %vm630_vm3, %v2518_v17  ;;  %v2649_v39 = vld [vmem:[#allocation3 + $0x122] sm:$0xff] }
 0x3c2   : > { %2719 = vrot.lane.b32.xlu1 %v6235_v18, %s4611_s29  ;;  %2721 = vrot.lane.b32.xlu0 %v6237_v38, %s4611_s29 }
 0x3c4   : > { %v2520_v22 = vpop.permute.xlu1 %2519  ;;  %v2522_v26 = vpop.permute.xlu0 %2521 }
 0x3c5   : > { %2604 = vst.msk [vmem:[#allocation4 + $0x58] sm:$0xff] %vm630_vm3, %v2520_v22  ;;  %2605 = vst.msk [vmem:[#allocation4 + $0x60] sm:$0xff] %vm630_vm3, %v2522_v26  ;;  %v2650_v26 = vld [vmem:[#allocation3 + $0x12a] sm:$0xff] }
 0x3c6   : > { %2723 = vrot.lane.b32.xlu1 %v6245_v12, %s4611_s29  ;;  %2725 = vrot.lane.b32.xlu0 %v6247_v45, %s4611_s29 }
 0x3c8   : > { %v2524_v5 = vpop.permute.xlu1 %2523 }
 0x3c9   : > { %2606 = vst.msk [vmem:[#allocation4 + $0x68] sm:$0xff] %vm630_vm3, %v2524_v5  ;;  %v2651_v5 = vld [vmem:[#allocation3 + $0x13a] sm:$0xff] }
 0x3ca   : > { %2727 = vrot.lane.b32.xlu1 %v6254_v15, %s4611_s29  ;;  %2729 = vrot.lane.b32.xlu0 %v2645_v19, %s4611_s29 }
 0x3ce   : > { %2731 = vrot.lane.b32.xlu1 %v2646_v23, %s4611_s29  ;;  %2733 = vrot.lane.b32.xlu0 %v2647_v42, %s4611_s29  ;;  %v2652_v23 = vld [vmem:[#allocation3 + $0x142] sm:$0xff]  ;;  %v2653_v42 = vld [vmem:[#allocation3 + $0x152] sm:$0xff] }
 0x3d0   : > { %v2526_v29 = vpop.permute.xlu0 %2525 }
 0x3d1   : > { %2607 = vst.msk [vmem:[#allocation4 + $0x70] sm:$0xff] %vm630_vm3, %v2526_v29  ;;  %v2654_v29 = vld [vmem:[#allocation3 + $0x15a] sm:$0xff] }
 0x3d2   : > { %2735 = vrot.lane.b32.xlu1 %v2648_v49, %s4611_s29  ;;  %2737 = vrot.lane.b32.xlu0 %v2649_v39, %s4611_s29  ;;  %v2655_v49 = vld [vmem:[#allocation3 + $0x16a] sm:$0xff] }
 0x3d4   : > { %v2528_v17 = vpop.permute.xlu1 %2527  ;;  %v2530_v22 = vpop.permute.xlu0 %2529 }
 0x3d5   : > { %2608 = vst.msk [vmem:[#allocation4 + $0x78] sm:$0xff] %vm630_vm3, %v2528_v17  ;;  %2609 = vst.msk [vmem:[#allocation4 + $0x80] sm:$0xff] %vm630_vm3, %v2530_v22  ;;  %v2656_v17 = vld [vmem:[#allocation3 + $0x172] sm:$0xff] }
 0x3d6   : > { %2739 = vrot.lane.b32.xlu1 %v2650_v26, %s4611_s29  ;;  %2741 = vrot.lane.b32.xlu0 %v2651_v5, %s4611_s29 }
 0x3d8   : > { %v2532_v19 = vpop.permute.xlu1 %2531 }
 0x3d9   : > { %2610 = vst.msk [vmem:[#allocation4 + $0x88] sm:$0xff] %vm630_vm3, %v2532_v19 }
 0x3da   : > { %2743 = vrot.lane.b32.xlu1 %v2652_v23, %s4611_s29  ;;  %2745 = vrot.lane.b32.xlu0 %v2653_v42, %s4611_s29 }
 0x3de   : > { %2747 = vrot.lane.b32.xlu1 %v2654_v29, %s4611_s29  ;;  %2749 = vrot.lane.b32.xlu0 %v2655_v49, %s4611_s29 }
 0x3e0   : > { %v2534_v39 = vpop.permute.xlu0 %2533 }
 0x3e1   : > { %2611 = vst.msk [vmem:[#allocation4 + $0x90] sm:$0xff] %vm630_vm3, %v2534_v39 }
 0x3e2   : > { %2751 = vrot.lane.b32.xlu1 %v2656_v17, %s4611_s29  ;;  %2881 = vrot.lane.b32.xlu0 %v5958_v14, %s4612_s30 }
 0x3e4   : > { %v2536_v22 = vpop.permute.xlu1 %2535  ;;  %v2538_v26 = vpop.permute.xlu0 %2537 }
 0x3e5   : > { %2612 = vst.msk [vmem:[#allocation4 + $0x98] sm:$0xff] %vm630_vm3, %v2536_v22  ;;  %2613 = vst.msk [vmem:[#allocation4 + $0xa0] sm:$0xff] %vm630_vm3, %v2538_v26 }
 0x3e6   : > { %2883 = vrot.lane.b32.xlu1 %v5982_v30, %s4612_s30  ;;  %2885 = vrot.lane.b32.xlu0 %v5950_v54, %s4612_s30 }
 0x3e8   : > { %v2540_v5 = vpop.permute.xlu1 %2539 }
 0x3e9   : > { %2614 = vst.msk [vmem:[#allocation4 + $0xa8] sm:$0xff] %vm630_vm3, %v2540_v5 }
 0x3ea   : > { %2887 = vrot.lane.b32.xlu1 %v5968_v50, %s4612_s30  ;;  %2889 = vrot.lane.b32.xlu0 %v5996_v55, %s4612_s30 }
 0x3ee   : > { %2891 = vrot.lane.b32.xlu1 %v6020_v60, %s4612_s30  ;;  %2893 = vrot.lane.b32.xlu0 %v5986_v34, %s4612_s30 }
 0x3f0   : > { %v2542_v14 = vpop.permute.xlu0 %2541 }
 0x3f1   : > { %2615 = vst.msk [vmem:[#allocation4 + $0xb0] sm:$0xff] %vm630_vm3, %v2542_v14 }
 0x3f2   : > { %2895 = vrot.lane.b32.xlu1 %v6007_v59, %s4612_s30  ;;  %2897 = vrot.lane.b32.xlu0 %v6032_v1, %s4612_s30 }
 0x3f4   : > { %v2544_v30 = vpop.permute.xlu1 %2543  ;;  %v2546_v19 = vpop.permute.xlu0 %2545 }
 0x3f5   : > { %2616 = vst.msk [vmem:[#allocation4 + $0xb8] sm:$0xff] %vm630_vm3, %v2544_v30  ;;  %2617 = vst.msk [vmem:[#allocation4 + $0xc0] sm:$0xff] %vm630_vm3, %v2546_v19 }
 0x3f6   : > { %2899 = vrot.lane.b32.xlu1 %v6051_v13, %s4612_s30  ;;  %2901 = vrot.lane.b32.xlu0 %v6024_v0, %s4612_s30 }
 0x3f8   : > { %v2548_v23 = vpop.permute.xlu1 %2547 }
 0x3f9   : > { %2618 = vst.msk [vmem:[#allocation4 + $0xc8] sm:$0xff] %vm630_vm3, %v2548_v23 }
 0x3fa   : > { %2903 = vrot.lane.b32.xlu1 %v6041_v7, %s4612_s30  ;;  %2905 = vrot.lane.b32.xlu0 %v6066_v44, %s4612_s30 }
 0x3fe   : > { %2907 = vrot.lane.b32.xlu1 %v6079_v3, %s4612_s30  ;;  %2909 = vrot.lane.b32.xlu0 %v6062_v43, %s4612_s30 }
 0x400   : > { %v2550_v42 = vpop.permute.xlu0 %2549 }
 0x401   : > { %2619 = vst.msk [vmem:[#allocation4 + $0xd0] sm:$0xff] %vm630_vm3, %v2550_v42 }
 0x402   : > { %2911 = vrot.lane.b32.xlu1 %v6072_v46, %s4612_s30  ;;  %2913 = vrot.lane.b32.xlu0 %v6094_v48, %s4612_s30 }
 0x404   : > { %v2552_v29 = vpop.permute.xlu1 %2551  ;;  %v2554_v49 = vpop.permute.xlu0 %2553 }
 0x405   : > { %2620 = vst.msk [vmem:[#allocation4 + $0xd8] sm:$0xff] %vm630_vm3, %v2552_v29  ;;  %2621 = vst.msk [vmem:[#allocation4 + $0xe0] sm:$0xff] %vm630_vm3, %v2554_v49 }
 0x406   : > { %2915 = vrot.lane.b32.xlu1 %v6107_v10, %s4612_s30  ;;  %2917 = vrot.lane.b32.xlu0 %v6090_v31, %s4612_s30 }
 0x408   : > { %v2556_v39 = vpop.permute.xlu1 %2555 }
 0x409   : > { %2622 = vst.msk [vmem:[#allocation4 + $0xe8] sm:$0xff] %vm630_vm3, %v2556_v39 }
 0x40a   : > { %2919 = vrot.lane.b32.xlu1 %v6100_v57, %s4612_s30  ;;  %2921 = vrot.lane.b32.xlu0 %v6122_v47, %s4612_s30 }
 0x40e   : > { %2923 = vrot.lane.b32.xlu1 %v6135_v21, %s4612_s30  ;;  %2925 = vrot.lane.b32.xlu0 %v6118_v36, %s4612_s30 }
 0x410   : > { %v2558_v17 = vpop.permute.xlu0 %2557 }
 0x411   : > { %2623 = vst.msk [vmem:[#allocation4 + $0xf0] sm:$0xff] %vm630_vm3, %v2558_v17 }
 0x412   : > { %2927 = vrot.lane.b32.xlu1 %v6128_v35, %s4612_s30  ;;  %2929 = vrot.lane.b32.xlu0 %v6147_v4, %s4612_s30 }
 0x414   : > { %v2560_v22 = vpop.permute.xlu1 %2559  ;;  %v2690_v26 = vpop.permute.xlu0 %2689 }
 0x415   : > { %2624 = vst.msk [vmem:[#allocation4 + $0xf8] sm:$0xff] %vm630_vm3, %v2560_v22 }
 0x416   : > { %2785 = vst.msk [vmem:[#allocation4] sm:$0xff] %vm823_vm4, %v2690_v26  ;;  %2931 = vrot.lane.b32.xlu1 %v6157_v20, %s4612_s30  ;;  %3073 = vrot.lane.b32.xlu0 %v5956_v11, %s4613_s6 }
 0x418   : > { %v2692_v36 = vpop.permute.xlu1 %2691  ;;  %v2694_v5 = vpop.permute.xlu0 %2693 }
 0x419   : > { %2786 = vst.msk [vmem:[#allocation4 + $0x8] sm:$0xff] %vm823_vm4, %v2692_v36  ;;  %2787 = vst.msk [vmem:[#allocation4 + $0x10] sm:$0xff] %vm823_vm4, %v2694_v5 }
 0x41a   : > { %3075 = vrot.lane.b32.xlu1 %v5970_v27, %s4613_s6  ;;  %3077 = vrot.lane.b32.xlu0 %v5972_v25, %s4613_s6 }
 0x41c   : > { %v2696_v35 = vpop.permute.xlu1 %2695  ;;  %v2698_v4 = vpop.permute.xlu0 %2697 }
 0x41d   : > { %2788 = vst.msk [vmem:[#allocation4 + $0x18] sm:$0xff] %vm823_vm4, %v2696_v35  ;;  %2789 = vst.msk [vmem:[#allocation4 + $0x20] sm:$0xff] %vm823_vm4, %v2698_v4 }
 0x41e   : > { %3079 = vrot.lane.b32.xlu1 %v5992_v52, %s4613_s6  ;;  %3265 = vrot.lane.b32.xlu0 %v6173_v28, %s4614_s7 }
 0x420   : > { %v2700_v11 = vpop.permute.xlu1 %2699  ;;  %v2702_v20 = vpop.permute.xlu0 %2701 }
 0x421   : > { %2790 = vst.msk [vmem:[#allocation4 + $0x28] sm:$0xff] %vm823_vm4, %v2700_v11  ;;  %2791 = vst.msk [vmem:[#allocation4 + $0x30] sm:$0xff] %vm823_vm4, %v2702_v20 }
 0x422   : > { %3267 = vrot.lane.b32.xlu1 %v6178_v32, %s4614_s7  ;;  %3269 = vrot.lane.b32.xlu0 %v6180_v37, %s4614_s7 }
 0x424   : > { %v2704_v27 = vpop.permute.xlu1 %2703  ;;  %v2706_v14 = vpop.permute.xlu0 %2705 }
 0x425   : > { %2792 = vst.msk [vmem:[#allocation4 + $0x38] sm:$0xff] %vm823_vm4, %v2704_v27  ;;  %2793 = vst.msk [vmem:[#allocation4 + $0x40] sm:$0xff] %vm823_vm4, %v2706_v14  ;;  %v3019_v27 = vld [vmem:[#allocation3 + $0x91] sm:$0xff] }
 0x426   : > { %3271 = vrot.lane.b32.xlu1 %v6186_v53, %s4614_s7  ;;  %3458 = vrot.lane.b32.xlu0 %v5950_v54, %s4615_s8  ;;  %v4598_v54 = vld [vmem:[%s6964_s3 + $0x10] ss:$0 sps:$4 sm:$0x33]  }
 0x427   : > { %4577 = vmatprep.subr.msk.bf16.mxu1 %vm2139_vm8, %v4598_v54 }
 0x428   : > { %v2708_v28 = vpop.permute.xlu1 %2707  ;;  %v2710_v30 = vpop.permute.xlu0 %2709 }
 0x429   : > { %2794 = vst.msk [vmem:[#allocation4 + $0x48] sm:$0xff] %vm823_vm4, %v2708_v28  ;;  %2795 = vst.msk [vmem:[#allocation4 + $0x50] sm:$0xff] %vm823_vm4, %v2710_v30  ;;  %v3020_v30 = vld [vmem:[#allocation3 + $0x99] sm:$0xff] }
 0x42a   : > { %3460 = vrot.lane.b32.xlu1 %v5968_v50, %s4615_s8  ;;  %3462 = vrot.lane.b32.xlu0 %v5996_v55, %s4615_s8  ;;  %v4094_v55 = vsel %vm2139_vm8, %v4598_v54, 0 }
 0x42b   : > { %4539 = vmatpush3.bf16.msra.mxu1 %v4094_v55 }
 0x42c   : > { %v2712_v32 = vpop.permute.xlu1 %2711  ;;  %v2714_v19 = vpop.permute.xlu0 %2713 }
 0x42d   : > { %2796 = vst.msk [vmem:[#allocation4 + $0x58] sm:$0xff] %vm823_vm4, %v2712_v32  ;;  %2797 = vst.msk [vmem:[#allocation4 + $0x60] sm:$0xff] %vm823_vm4, %v2714_v19 }
 0x42e   : > { %3464 = vrot.lane.b32.xlu1 %v6020_v60, %s4615_s8  ;;  %3650 = vrot.lane.b32.xlu0 %v5972_v25, %s4616_s9  ;;  %v4599_v25 = vld [vmem:[%s6964_s3 + $0x8] sm:$0xff]  }
 0x42f   : > { %4540 = vmatprep.subr.bf16.mxu1 %v4599_v25 }
 0x430   : > { %v2716_v50 = vpop.permute.xlu1 %2715  ;;  %v2718_v23 = vpop.permute.xlu0 %2717  ;;  %4541 = vmatpush3.bf16.msra.mxu1 %v4599_v25 }
 0x431   : > { %2798 = vst.msk [vmem:[#allocation4 + $0x68] sm:$0xff] %vm823_vm4, %v2716_v50  ;;  %2799 = vst.msk [vmem:[#allocation4 + $0x70] sm:$0xff] %vm823_vm4, %v2718_v23 }
 0x432   : > { %3652 = vrot.lane.b32.xlu1 %v5992_v52, %s4616_s9  ;;  %3654 = vrot.lane.b32.xlu0 %v5994_v40, %s4616_s9  ;;  %v4600_v52 = vld [vmem:[%s6964_s3] sm:$0xff]  }
 0x433   : > { %4542 = vmatprep.subr.bf16.mxu1 %v4600_v52 }
 0x434   : > { %v2720_v60 = vpop.permute.xlu1 %2719  ;;  %v2722_v42 = vpop.permute.xlu0 %2721  ;;  %4543 = vmatpush3.bf16.msra.mxu1 %v4600_v52 }
 0x435   : > { %2800 = vst.msk [vmem:[#allocation4 + $0x78] sm:$0xff] %vm823_vm4, %v2720_v60  ;;  %2801 = vst.msk [vmem:[#allocation4 + $0x80] sm:$0xff] %vm823_vm4, %v2722_v42 }
 0x436   : > { %3656 = vrot.lane.b32.xlu1 %v6009_v58, %s4616_s9  ;;  %3842 = vrot.lane.b32.xlu0 %v6180_v37, %s4617_s14 }
 0x438   : > { %v2724_v29 = vpop.permute.xlu1 %2723  ;;  %v2726_v49 = vpop.permute.xlu0 %2725 }
 0x439   : > { %2802 = vst.msk [vmem:[#allocation4 + $0x88] sm:$0xff] %vm823_vm4, %v2724_v29  ;;  %2803 = vst.msk [vmem:[#allocation4 + $0x90] sm:$0xff] %vm823_vm4, %v2726_v49 }
 0x43a   : > { %3844 = vrot.lane.b32.xlu1 %v6186_v53, %s4617_s14  ;;  %3846 = vrot.lane.b32.xlu0 %v6188_v56, %s4617_s14 }
 0x43c   : > { %v2728_v39 = vpop.permute.xlu1 %2727  ;;  %v2730_v37 = vpop.permute.xlu0 %2729 }
 0x43d   : > { %2804 = vst.msk [vmem:[#allocation4 + $0x98] sm:$0xff] %vm823_vm4, %v2728_v39  ;;  %2805 = vst.msk [vmem:[#allocation4 + $0xa0] sm:$0xff] %vm823_vm4, %v2730_v37 }
 0x43e   : > { %3848 = vrot.lane.b32.xlu1 %v6195_v6, %s4617_s14  ;;  %3081 = vrot.lane.b32.xlu0 %v5994_v40, %s4613_s6 }
 0x440   : > { %v2732_v17 = vpop.permute.xlu1 %2731  ;;  %v2734_v22 = vpop.permute.xlu0 %2733 }
 0x441   : > { %2806 = vst.msk [vmem:[#allocation4 + $0xa8] sm:$0xff] %vm823_vm4, %v2732_v17  ;;  %2807 = vst.msk [vmem:[#allocation4 + $0xb0] sm:$0xff] %vm823_vm4, %v2734_v22  ;;  %v3024_v22 = vld [vmem:[#allocation3 + $0xc9] sm:$0xff] }
 0x442   : > { %3083 = vrot.lane.b32.xlu1 %v6009_v58, %s4613_s6  ;;  %3085 = vrot.lane.b32.xlu0 %v6011_v61, %s4613_s6 }
 0x444   : > { %v2736_v53 = vpop.permute.xlu1 %2735  ;;  %v2738_v26 = vpop.permute.xlu0 %2737 }
 0x445   : > { %2808 = vst.msk [vmem:[#allocation4 + $0xb8] sm:$0xff] %vm823_vm4, %v2736_v53  ;;  %2809 = vst.msk [vmem:[#allocation4 + $0xc0] sm:$0xff] %vm823_vm4, %v2738_v26 }
 0x446   : > { %3087 = vrot.lane.b32.xlu1 %v6028_v62, %s4613_s6  ;;  %3273 = vrot.lane.b32.xlu0 %v6188_v56, %s4614_s7 }
 0x448   : > { %v2740_v40 = vpop.permute.xlu1 %2739  ;;  %v2742_v36 = vpop.permute.xlu0 %2741 }
 0x449   : > { %2810 = vst.msk [vmem:[#allocation4 + $0xc8] sm:$0xff] %vm823_vm4, %v2740_v40  ;;  %2811 = vst.msk [vmem:[#allocation4 + $0xd0] sm:$0xff] %vm823_vm4, %v2742_v36 }
 0x44a   : > { %3275 = vrot.lane.b32.xlu1 %v6195_v6, %s4614_s7  ;;  %3277 = vrot.lane.b32.xlu0 %v6197_v8, %s4614_s7 }
 0x44c   : > { %v2744_v58 = vpop.permute.xlu1 %2743  ;;  %v2746_v5 = vpop.permute.xlu0 %2745 }
 0x44d   : > { %2812 = vst.msk [vmem:[#allocation4 + $0xd8] sm:$0xff] %vm823_vm4, %v2744_v58  ;;  %2813 = vst.msk [vmem:[#allocation4 + $0xe0] sm:$0xff] %vm823_vm4, %v2746_v5 }
 0x44e   : > { %3279 = vrot.lane.b32.xlu1 %v6205_v41, %s4614_s7  ;;  %3466 = vrot.lane.b32.xlu0 %v5986_v34, %s4615_s8 }
 0x450   : > { %v2748_v56 = vpop.permute.xlu1 %2747  ;;  %v2750_v35 = vpop.permute.xlu0 %2749 }
 0x451   : > { %2814 = vst.msk [vmem:[#allocation4 + $0xe8] sm:$0xff] %vm823_vm4, %v2748_v56  ;;  %2815 = vst.msk [vmem:[#allocation4 + $0xf0] sm:$0xff] %vm823_vm4, %v2750_v35 }
 0x452   : > { %3468 = vrot.lane.b32.xlu1 %v6007_v59, %s4615_s8  ;;  %3470 = vrot.lane.b32.xlu0 %v6032_v1, %s4615_s8 }
 0x454   : > { %v2752_v6 = vpop.permute.xlu1 %2751  ;;  %v2882_v4 = vpop.permute.xlu0 %2881 }
 0x455   : > { %2816 = vst.msk [vmem:[#allocation4 + $0xf8] sm:$0xff] %vm823_vm4, %v2752_v6 }
 0x456   : > { %2977 = vst.msk [vmem:[#allocation4] sm:$0xff] %vm1016_vm5, %v2882_v4  ;;  %3472 = vrot.lane.b32.xlu1 %v6051_v13, %s4615_s8  ;;  %3658 = vrot.lane.b32.xlu0 %v6011_v61, %s4616_s9 }
 0x458   : > { %v2884_v34 = vpop.permute.xlu1 %2883  ;;  %v2886_v11 = vpop.permute.xlu0 %2885 }
 0x459   : > { %2978 = vst.msk [vmem:[#allocation4 + $0x8] sm:$0xff] %vm1016_vm5, %v2884_v34  ;;  %2979 = vst.msk [vmem:[#allocation4 + $0x10] sm:$0xff] %vm1016_vm5, %v2886_v11 }
 0x45a   : > { %3660 = vrot.lane.b32.xlu1 %v6028_v62, %s4616_s9  ;;  %3662 = vrot.lane.b32.xlu0 %v6030_v2, %s4616_s9 }
 0x45c   : > { %v2888_v59 = vpop.permute.xlu1 %2887  ;;  %v2890_v1 = vpop.permute.xlu0 %2889 }
 0x45d   : > { %2980 = vst.msk [vmem:[#allocation4 + $0x18] sm:$0xff] %vm1016_vm5, %v2888_v59  ;;  %2981 = vst.msk [vmem:[#allocation4 + $0x20] sm:$0xff] %vm1016_vm5, %v2890_v1 }
 0x45e   : > { %3664 = vrot.lane.b32.xlu1 %v6043_v9, %s4616_s9  ;;  %3850 = vrot.lane.b32.xlu0 %v6197_v8, %s4617_s14  ;;  %v3017_v9 = vld [vmem:[#allocation3 + $0x79] sm:$0xff] }
 0x460   : > { %v2892_v61 = vpop.permute.xlu1 %2891  ;;  %v2894_v13 = vpop.permute.xlu0 %2893 }
 0x461   : > { %2982 = vst.msk [vmem:[#allocation4 + $0x28] sm:$0xff] %vm1016_vm5, %v2892_v61  ;;  %2983 = vst.msk [vmem:[#allocation4 + $0x30] sm:$0xff] %vm1016_vm5, %v2894_v13 }
 0x462   : > { %3852 = vrot.lane.b32.xlu1 %v6205_v41, %s4617_s14  ;;  %3854 = vrot.lane.b32.xlu0 %v6207_v16, %s4617_s14  ;;  %v3018_v41 = vld [vmem:[#allocation3 + $0x81] sm:$0xff] }
 0x464   : > { %v2896_v62 = vpop.permute.xlu1 %2895  ;;  %v2898_v2 = vpop.permute.xlu0 %2897 }
 0x465   : > { %2984 = vst.msk [vmem:[#allocation4 + $0x38] sm:$0xff] %vm1016_vm5, %v2896_v62  ;;  %2985 = vst.msk [vmem:[#allocation4 + $0x40] sm:$0xff] %vm1016_vm5, %v2898_v2  ;;  %v3027_v62 = vld [vmem:[#allocation3 + $0xf1] sm:$0xff] }
 0x466   : > { %3856 = vrot.lane.b32.xlu1 %v6215_v33, %s4617_s14  ;;  %3089 = vrot.lane.b32.xlu0 %v3017_v9, %s4613_s6 }
 0x468   : > { %v2900_v8 = vpop.permute.xlu1 %2899  ;;  %v2902_v20 = vpop.permute.xlu0 %2901 }
 0x469   : > { %2986 = vst.msk [vmem:[#allocation4 + $0x48] sm:$0xff] %vm1016_vm5, %v2900_v8  ;;  %2987 = vst.msk [vmem:[#allocation4 + $0x50] sm:$0xff] %vm1016_vm5, %v2902_v20  ;;  %v3028_v8 = vld [vmem:[#allocation3 + $0xf9] sm:$0xff] }
 0x46a   : > { %3091 = vrot.lane.b32.xlu1 %v3018_v41, %s4613_s6  ;;  %3093 = vrot.lane.b32.xlu0 %v3019_v27, %s4613_s6  ;;  %v3217_v20 = vld [vmem:[#allocation3 + $0xda] sm:$0xff] }
 0x46c   : > { %v2904_v14 = vpop.permute.xlu1 %2903  ;;  %v2906_v28 = vpop.permute.xlu0 %2905 }
 0x46d   : > { %2988 = vst.msk [vmem:[#allocation4 + $0x58] sm:$0xff] %vm1016_vm5, %v2904_v14  ;;  %2989 = vst.msk [vmem:[#allocation4 + $0x60] sm:$0xff] %vm1016_vm5, %v2906_v28  ;;  %v3218_v14 = vld [vmem:[#allocation3 + $0xe2] sm:$0xff]  ;;  %v3219_v28 = vld [vmem:[#allocation3 + $0xf2] sm:$0xff] }
 0x46e   : > { %3095 = vrot.lane.b32.xlu1 %v3020_v30, %s4613_s6  ;;  %3281 = vrot.lane.b32.xlu0 %v6207_v16, %s4614_s7 }
 0x470   : > { %v2908_v32 = vpop.permute.xlu1 %2907  ;;  %v2910_v19 = vpop.permute.xlu0 %2909 }
 0x471   : > { %2990 = vst.msk [vmem:[#allocation4 + $0x68] sm:$0xff] %vm1016_vm5, %v2908_v32  ;;  %2991 = vst.msk [vmem:[#allocation4 + $0x70] sm:$0xff] %vm1016_vm5, %v2910_v19  ;;  %v3220_v19 = vld [vmem:[#allocation3 + $0xfa] sm:$0xff] }
 0x472   : > { %3283 = vrot.lane.b32.xlu1 %v6215_v33, %s4614_s7  ;;  %3285 = vrot.lane.b32.xlu0 %v6217_v24, %s4614_s7 }
 0x474   : > { %v2912_v54 = vpop.permute.xlu1 %2911  ;;  %v2914_v50 = vpop.permute.xlu0 %2913 }
 0x475   : > { %2992 = vst.msk [vmem:[#allocation4 + $0x78] sm:$0xff] %vm1016_vm5, %v2912_v54  ;;  %2993 = vst.msk [vmem:[#allocation4 + $0x80] sm:$0xff] %vm1016_vm5, %v2914_v50 }
 0x476   : > { %3287 = vrot.lane.b32.xlu1 %v6225_v51, %s4614_s7  ;;  %3474 = vrot.lane.b32.xlu0 %v6024_v0, %s4615_s8 }
 0x478   : > { %v2916_v16 = vpop.permute.xlu1 %2915  ;;  %v2918_v23 = vpop.permute.xlu0 %2917 }
 0x479   : > { %2994 = vst.msk [vmem:[#allocation4 + $0x88] sm:$0xff] %vm1016_vm5, %v2916_v16  ;;  %2995 = vst.msk [vmem:[#allocation4 + $0x90] sm:$0xff] %vm1016_vm5, %v2918_v23 }
 0x47a   : > { %3476 = vrot.lane.b32.xlu1 %v6041_v7, %s4615_s8  ;;  %3478 = vrot.lane.b32.xlu0 %v6066_v44, %s4615_s8  ;;  %v3596_v7 = vld [vmem:[#allocation3 + $0xa9] sm:$0xff] }
 0x47c   : > { %v2920_v33 = vpop.permute.xlu1 %2919  ;;  %v2922_v55 = vpop.permute.xlu0 %2921 }
 0x47d   : > { %2996 = vst.msk [vmem:[#allocation4 + $0x98] sm:$0xff] %vm1016_vm5, %v2920_v33  ;;  %2997 = vst.msk [vmem:[#allocation4 + $0xa0] sm:$0xff] %vm1016_vm5, %v2922_v55 }
 0x47e   : > { %3480 = vrot.lane.b32.xlu1 %v6079_v3, %s4615_s8  ;;  %3666 = vrot.lane.b32.xlu0 %v3019_v27, %s4616_s9  ;;  %v3597_v3 = vld [vmem:[#allocation3 + $0xb1] sm:$0xff] }
 0x480   : > { %v2924_v0 = vpop.permute.xlu1 %2923  ;;  %v2926_v25 = vpop.permute.xlu0 %2925 }
 0x481   : > { %2998 = vst.msk [vmem:[#allocation4 + $0xa8] sm:$0xff] %vm1016_vm5, %v2924_v0  ;;  %2999 = vst.msk [vmem:[#allocation4 + $0xb0] sm:$0xff] %vm1016_vm5, %v2926_v25 }
 0x482   : > { %3668 = vrot.lane.b32.xlu1 %v3020_v30, %s4616_s9  ;;  %3670 = vrot.lane.b32.xlu0 %v3596_v7, %s4616_s9 }
 0x484   : > { %v2928_v44 = vpop.permute.xlu1 %2927  ;;  %v2930_v60 = vpop.permute.xlu0 %2929 }
 0x485   : > { %3000 = vst.msk [vmem:[#allocation4 + $0xb8] sm:$0xff] %vm1016_vm5, %v2928_v44  ;;  %3001 = vst.msk [vmem:[#allocation4 + $0xc0] sm:$0xff] %vm1016_vm5, %v2930_v60 }
 0x486   : > { %3672 = vrot.lane.b32.xlu1 %v3597_v3, %s4616_s9  ;;  %3858 = vrot.lane.b32.xlu0 %v6217_v24, %s4617_s14 }
 0x488   : > { %v2932_v42 = vpop.permute.xlu1 %2931  ;;  %v3074_v52 = vpop.permute.xlu0 %3073 }
 0x489   : > { %3002 = vst.msk [vmem:[#allocation4 + $0xc8] sm:$0xff] %vm1016_vm5, %v2932_v42 }
 0x48a   : > { %3169 = vst.msk [vmem:[#allocation4] sm:$0xff] %vm1209_vm6, %v3074_v52  ;;  %3860 = vrot.lane.b32.xlu1 %v6225_v51, %s4617_s14  ;;  %3862 = vrot.lane.b32.xlu0 %v6227_v63, %s4617_s14  ;;  %v3023_v51 = vld [vmem:[#allocation3 + $0xc1] sm:$0xff]  ;;  %v3797_v52 = vld [vmem:[#allocation3 + $0x112] sm:$0xff] }
 0x48c   : > { %v3076_v29 = vpop.permute.xlu1 %3075  ;;  %v3078_v49 = vpop.permute.xlu0 %3077 }
 0x48d   : > { %3170 = vst.msk [vmem:[#allocation4 + $0x8] sm:$0xff] %vm1209_vm6, %v3076_v29  ;;  %3171 = vst.msk [vmem:[#allocation4 + $0x10] sm:$0xff] %vm1209_vm6, %v3078_v49 }
 0x48e   : > { %3864 = vrot.lane.b32.xlu1 %v6235_v18, %s4617_s14  ;;  %3097 = vrot.lane.b32.xlu0 %v3596_v7, %s4613_s6  ;;  %v3796_v7 = vld [vmem:[#allocation3 + $0x10a] sm:$0xff] }
 0x490   : > { %v3080_v24 = vpop.permute.xlu1 %3079  ;;  %v3266_v39 = vpop.permute.xlu0 %3265 }
 0x491   : > { %3172 = vst.msk [vmem:[#allocation4 + $0x18] sm:$0xff] %vm1209_vm6, %v3080_v24 }
 0x492   : > { %3361 = vst.msk [vmem:[#allocation4] sm:$0xff] %vm1402_vm7, %v3266_v39  ;;  %3099 = vrot.lane.b32.xlu1 %v3597_v3, %s4613_s6  ;;  %3101 = vrot.lane.b32.xlu0 %v3023_v51, %s4613_s6 }
 0x494   : > { %v3268_v37 = vpop.permute.xlu1 %3267  ;;  %v3270_v17 = vpop.permute.xlu0 %3269 }
 0x495   : > { %3362 = vst.msk [vmem:[#allocation4 + $0x8] sm:$0xff] %vm1402_vm7, %v3268_v37  ;;  %3363 = vst.msk [vmem:[#allocation4 + $0x10] sm:$0xff] %vm1402_vm7, %v3270_v17  ;;  %v3031_v37 = vld [vmem:[#allocation3 + $0x121] sm:$0xff] }
 0x496   : > { %3103 = vrot.lane.b32.xlu1 %v3024_v22, %s4613_s6  ;;  %3289 = vrot.lane.b32.xlu0 %v6227_v63, %s4614_s7 }
 0x498   : > { %v3272_v53 = vpop.permute.xlu1 %3271  ;;  %v3459_v26 = vpop.permute.xlu0 %3458 }
 0x499   : > { %3364 = vst.msk [vmem:[#allocation4 + $0x18] sm:$0xff] %vm1402_vm7, %v3272_v53 }
 0x49a   : > { %3554 = vst.msk [vmem:[#allocation4] sm:$0xff] %vm1596_vm9, %v3459_v26  ;;  %3291 = vrot.lane.b32.xlu1 %v6235_v18, %s4614_s7  ;;  %3293 = vrot.lane.b32.xlu0 %v6237_v38, %s4614_s7  ;;  %v3032_v26 = vld [vmem:[#allocation3 + $0x129] sm:$0xff] }
 0x49c   : > { %v3461_v40 = vpop.permute.xlu1 %3460  ;;  %v3463_v36 = vpop.permute.xlu0 %3462 }
 0x49d   : > { %3555 = vst.msk [vmem:[#allocation4 + $0x8] sm:$0xff] %vm1596_vm9, %v3461_v40  ;;  %3556 = vst.msk [vmem:[#allocation4 + $0x10] sm:$0xff] %vm1596_vm9, %v3463_v36 }
 0x49e   : > { %3295 = vrot.lane.b32.xlu1 %v6245_v12, %s4614_s7  ;;  %3482 = vrot.lane.b32.xlu0 %v6062_v43, %s4615_s8 }
 0x4a0   : > { %v3465_v63 = vpop.permute.xlu1 %3464  ;;  %v3651_v58 = vpop.permute.xlu0 %3650 }
 0x4a1   : > { %3557 = vst.msk [vmem:[#allocation4 + $0x18] sm:$0xff] %vm1596_vm9, %v3465_v63  ;;  %v3223_v63 = vld [vmem:[#allocation3 + $0x122] sm:$0xff] }
 0x4a2   : > { %3746 = vst.msk [vmem:[#allocation4] sm:$0xff] %vm1789_vm10, %v3651_v58  ;;  %3484 = vrot.lane.b32.xlu1 %v6072_v46, %s4615_s8  ;;  %3486 = vrot.lane.b32.xlu0 %v6094_v48, %s4615_s8  ;;  %v3600_v46 = vld [vmem:[#allocation3 + $0xd9] sm:$0xff] }
 0x4a4   : > { %v3653_v18 = vpop.permute.xlu1 %3652  ;;  %v3655_v5 = vpop.permute.xlu0 %3654 }
 0x4a5   : > { %3747 = vst.msk [vmem:[#allocation4 + $0x8] sm:$0xff] %vm1789_vm10, %v3653_v18  ;;  %3748 = vst.msk [vmem:[#allocation4 + $0x10] sm:$0xff] %vm1789_vm10, %v3655_v5  ;;  %v3224_v5 = vld [vmem:[#allocation3 + $0x12a] sm:$0xff] }
 0x4a6   : > { %3488 = vrot.lane.b32.xlu1 %v6107_v10, %s4615_s8  ;;  %3674 = vrot.lane.b32.xlu0 %v3023_v51, %s4616_s9  ;;  %v3601_v10 = vld [vmem:[#allocation3 + $0xe1] sm:$0xff] }
 0x4a8   : > { %v3657_v43 = vpop.permute.xlu1 %3656  ;;  %v3843_v56 = vpop.permute.xlu0 %3842 }
 0x4a9   : > { %3749 = vst.msk [vmem:[#allocation4 + $0x18] sm:$0xff] %vm1789_vm10, %v3657_v43  ;;  %v3414_v43 = vld [vmem:[#allocation3 + $0x120] sm:$0xff] }
 0x4aa   : > { %3938 = vst.msk [vmem:[#allocation4] sm:$0xff] %vm1982_vm11, %v3843_v56  ;;  %3676 = vrot.lane.b32.xlu1 %v3024_v22, %s4616_s9  ;;  %3678 = vrot.lane.b32.xlu0 %v3600_v46, %s4616_s9 }
 0x4ac   : > { %v3845_v48 = vpop.permute.xlu1 %3844  ;;  %v3847_v35 = vpop.permute.xlu0 %3846 }
 0x4ad   : > { %3939 = vst.msk [vmem:[#allocation4 + $0x8] sm:$0xff] %vm1982_vm11, %v3845_v48  ;;  %3940 = vst.msk [vmem:[#allocation4 + $0x10] sm:$0xff] %vm1982_vm11, %v3847_v35  ;;  %v3415_v48 = vld [vmem:[#allocation3 + $0x128] sm:$0xff]  ;;  %v3416_v35 = vld [vmem:[#allocation3 + $0x138] sm:$0xff] }
 0x4ae   : > { %3680 = vrot.lane.b32.xlu1 %v3601_v10, %s4616_s9  ;;  %3866 = vrot.lane.b32.xlu0 %v6237_v38, %s4617_s14 }
 0x4b0   : > { %v3849_v6 = vpop.permute.xlu1 %3848  ;;  %v3082_v4 = vpop.permute.xlu0 %3081 }
 0x4b1   : > { %3941 = vst.msk [vmem:[#allocation4 + $0x18] sm:$0xff] %vm1982_vm11, %v3849_v6  ;;  %v3970_v59 = vld [vmem:[#allocation4] sm:$0xff] }
 0x4b2   : > { %3173 = vst.msk [vmem:[#allocation4 + $0x20] sm:$0xff] %vm1209_vm6, %v3082_v4  ;;  %3868 = vrot.lane.b32.xlu1 %v6245_v12, %s4617_s14  ;;  %3870 = vrot.lane.b32.xlu0 %v6247_v45, %s4617_s14  ;;  %v3417_v4 = vld [vmem:[#allocation3 + $0x140] sm:$0xff] }
 0x4b4   : > { %v3084_v34 = vpop.permute.xlu1 %3083  ;;  %v3086_v11 = vpop.permute.xlu0 %3085  ;;  %v3971_v1 = vld [vmem:[#allocation4 + $0x8] sm:$0xff]  ;;  %v3972_v13 = vld [vmem:[#allocation4 + $0x10] sm:$0xff] }
 0x4b5   : > { %3174 = vst.msk [vmem:[#allocation4 + $0x28] sm:$0xff] %vm1209_vm6, %v3084_v34  ;;  %3175 = vst.msk [vmem:[#allocation4 + $0x30] sm:$0xff] %vm1209_vm6, %v3086_v11  ;;  %v4002_v38 = vpack.c.bf16 %v3971_v1, %v3970_v59  ;;  %v3608_v59 = vld [vmem:[#allocation3 + $0x139] sm:$0xff] }
 0x4b6   : > { %3872 = vrot.lane.b32.xlu1 %v6254_v15, %s4617_s14  ;;  %3105 = vrot.lane.b32.xlu0 %v3600_v46, %s4613_s6 }
 0x4b7   : > { %4544 = vmatprep.mubr.msk.bf16.mxu1 %vm2090_vm12, %v4002_v38 }
 0x4b8   : > { %v3088_v12 = vpop.permute.xlu1 %3087  ;;  %v3274_v61 = vpop.permute.xlu0 %3273  ;;  %v3973_v45 = vld [vmem:[#allocation4 + $0x18] sm:$0xff] }
 0x4b9   : > { %3176 = vst.msk [vmem:[#allocation4 + $0x38] sm:$0xff] %vm1209_vm6, %v3088_v12  ;;  %v4003_v2 = vpack.c.bf16 %v3973_v45, %v3972_v13  ;;  %v3609_v12 = vld [vmem:[#allocation3 + $0x141] sm:$0xff] }
 0x4ba   : > { %3365 = vst.msk [vmem:[#allocation4 + $0x20] sm:$0xff] %vm1402_vm7, %v3274_v61  ;;  %3107 = vrot.lane.b32.xlu1 %v3601_v10, %s4613_s6  ;;  %3109 = vrot.lane.b32.xlu0 %v3027_v62, %s4613_s6  ;;  %v3800_v45 = vld [vmem:[#allocation3 + $0x13a] sm:$0xff] }
 0x4bb   : > { %4545 = vmatmul.mubr.msk.bf16.vlgmr.msra.gmra.mxu1 %vm2090_vm12, %v4003_v2 }
 0x4bc   : > { %v3276_v15 = vpop.permute.xlu1 %3275  ;;  %v3278_v9 = vpop.permute.xlu0 %3277 }
 0x4bd   : > { %3366 = vst.msk [vmem:[#allocation4 + $0x28] sm:$0xff] %vm1402_vm7, %v3276_v15  ;;  %3367 = vst.msk [vmem:[#allocation4 + $0x30] sm:$0xff] %vm1402_vm7, %v3278_v9 }
 0x4be   : > { %3111 = vrot.lane.b32.xlu1 %v3028_v8, %s4613_s6  ;;  %3297 = vrot.lane.b32.xlu0 %v3217_v20, %s4614_s7  ;;  %v2843_v20 = vld [vmem:[#allocation3 + $0x150] sm:$0xff] }
 0x4c0   : > { %v3280_v41 = vpop.permute.xlu1 %3279  ;;  %v3467_v27 = vpop.permute.xlu0 %3466 }
 0x4c1   : > { %3368 = vst.msk [vmem:[#allocation4 + $0x38] sm:$0xff] %vm1402_vm7, %v3280_v41 }
 0x4c2   : > { %3558 = vst.msk [vmem:[#allocation4 + $0x20] sm:$0xff] %vm1596_vm9, %v3467_v27  ;;  %3299 = vrot.lane.b32.xlu1 %v3218_v14, %s4614_s7  ;;  %3301 = vrot.lane.b32.xlu0 %v3219_v28, %s4614_s7 }
 0x4c4   : > { %v3469_v30 = vpop.permute.xlu1 %3468  ;;  %v3471_v32 = vpop.permute.xlu0 %3470 }
 0x4c5   : > { %3559 = vst.msk [vmem:[#allocation4 + $0x28] sm:$0xff] %vm1596_vm9, %v3469_v30  ;;  %3560 = vst.msk [vmem:[#allocation4 + $0x30] sm:$0xff] %vm1596_vm9, %v3471_v32  ;;  %v2844_v32 = vld [vmem:[#allocation3 + $0x158] sm:$0xff] }
 0x4c6   : > { %3303 = vrot.lane.b32.xlu1 %v3220_v19, %s4614_s7  ;;  %3490 = vrot.lane.b32.xlu0 %v6090_v31, %s4615_s8 }
 0x4c8   : > { %v3473_v54 = vpop.permute.xlu1 %3472  ;;  %v3659_v50 = vpop.permute.xlu0 %3658 }
 0x4c9   : > { %3561 = vst.msk [vmem:[#allocation4 + $0x38] sm:$0xff] %vm1596_vm9, %v3473_v54 }
 0x4ca   : > { %3750 = vst.msk [vmem:[#allocation4 + $0x20] sm:$0xff] %vm1789_vm10, %v3659_v50  ;;  %3492 = vrot.lane.b32.xlu1 %v6100_v57, %s4615_s8  ;;  %3494 = vrot.lane.b32.xlu0 %v6122_v47, %s4615_s8  ;;  %v3604_v57 = vld [vmem:[#allocation3 + $0x109] sm:$0xff] }
 0x4cc   : > { %v3661_v16 = vpop.permute.xlu1 %3660  ;;  %v3663_v23 = vpop.permute.xlu0 %3662 }
 0x4cd   : > { %3751 = vst.msk [vmem:[#allocation4 + $0x28] sm:$0xff] %vm1789_vm10, %v3661_v16  ;;  %3752 = vst.msk [vmem:[#allocation4 + $0x30] sm:$0xff] %vm1789_vm10, %v3663_v23  ;;  %v3035_v16 = vld [vmem:[#allocation3 + $0x151] sm:$0xff] }
 0x4ce   : > { %3496 = vrot.lane.b32.xlu1 %v6135_v21, %s4615_s8  ;;  %3682 = vrot.lane.b32.xlu0 %v3027_v62, %s4616_s9  ;;  %v3605_v21 = vld [vmem:[#allocation3 + $0x111] sm:$0xff] }
 0x4d0   : > { %v3665_v31 = vpop.permute.xlu1 %3664  ;;  %v3851_v33 = vpop.permute.xlu0 %3850 }
 0x4d1   : > { %3753 = vst.msk [vmem:[#allocation4 + $0x38] sm:$0xff] %vm1789_vm10, %v3665_v31 }
 0x4d2   : > { %3942 = vst.msk [vmem:[#allocation4 + $0x20] sm:$0xff] %vm1982_vm11, %v3851_v33  ;;  %3684 = vrot.lane.b32.xlu1 %v3028_v8, %s4616_s9  ;;  %3686 = vrot.lane.b32.xlu0 %v3604_v57, %s4616_s9  ;;  %v3801_v8 = vld [vmem:[#allocation3 + $0x142] sm:$0xff]  ;;  %v3036_v33 = vld [vmem:[#allocation3 + $0x159] sm:$0xff] }
 0x4d4   : > { %v3853_v47 = vpop.permute.xlu1 %3852  ;;  %v3855_v55 = vpop.permute.xlu0 %3854 }
 0x4d5   : > { %3943 = vst.msk [vmem:[#allocation4 + $0x28] sm:$0xff] %vm1982_vm11, %v3853_v47  ;;  %3944 = vst.msk [vmem:[#allocation4 + $0x30] sm:$0xff] %vm1982_vm11, %v3855_v55  ;;  %v3227_v55 = vld [vmem:[#allocation3 + $0x152] sm:$0xff] }
 0x4d6   : > { %3688 = vrot.lane.b32.xlu1 %v3605_v21, %s4616_s9  ;;  %3874 = vrot.lane.b32.xlu0 %v3219_v28, %s4617_s14 }
 0x4d8   : > { %v3857_v0 = vpop.permute.xlu1 %3856  ;;  %v3090_v25 = vpop.permute.xlu0 %3089 }
 0x4d9   : > { %3945 = vst.msk [vmem:[#allocation4 + $0x38] sm:$0xff] %vm1982_vm11, %v3857_v0  ;;  %v3974_v3 = vld [vmem:[#allocation4 + $0x20] sm:$0xff] }
 0x4da   : > { %3177 = vst.msk [vmem:[#allocation4 + $0x40] sm:$0xff] %vm1209_vm6, %v3090_v25  ;;  %3876 = vrot.lane.b32.xlu1 %v3220_v19, %s4617_s14  ;;  %3878 = vrot.lane.b32.xlu0 %v3796_v7, %s4617_s14  ;;  %v3228_v25 = vld [vmem:[#allocation3 + $0x15a] sm:$0xff] }
 0x4dc   : > { %v3092_v44 = vpop.permute.xlu1 %3091  ;;  %v3094_v60 = vpop.permute.xlu0 %3093  ;;  %v3975_v42 = vld [vmem:[#allocation4 + $0x28] sm:$0xff]  ;;  %v3976_v39 = vld [vmem:[#allocation4 + $0x30] sm:$0xff] }
 0x4dd   : > { %3178 = vst.msk [vmem:[#allocation4 + $0x48] sm:$0xff] %vm1209_vm6, %v3092_v44  ;;  %3179 = vst.msk [vmem:[#allocation4 + $0x50] sm:$0xff] %vm1209_vm6, %v3094_v60  ;;  %v4004_v29 = vpack.c.bf16 %v3975_v42, %v3974_v3  ;;  %v3420_v60 = vld [vmem:[#allocation3 + $0x168] sm:$0xff] }
 0x4de   : > { %3880 = vrot.lane.b32.xlu1 %v3797_v52, %s4617_s14  ;;  %3113 = vrot.lane.b32.xlu0 %v3604_v57, %s4613_s6 }
 0x4df   : > { %4548 = vmatprep.mubr.msk.bf16.mxu1 %vm2090_vm12, %v4004_v29 }
 0x4e0   : > { %v3096_v49 = vpop.permute.xlu1 %3095  ;;  %v3282_v24 = vpop.permute.xlu0 %3281  ;;  %v3977_v51 = vld [vmem:[#allocation4 + $0x38] sm:$0xff] }
 0x4e1   : > { %3180 = vst.msk [vmem:[#allocation4 + $0x58] sm:$0xff] %vm1209_vm6, %v3096_v49  ;;  %v4005_v17 = vpack.c.bf16 %v3977_v51, %v3976_v39 }
 0x4e2   : > { %3369 = vst.msk [vmem:[#allocation4 + $0x40] sm:$0xff] %vm1402_vm7, %v3282_v24  ;;  %3115 = vrot.lane.b32.xlu1 %v3605_v21, %s4613_s6  ;;  %3117 = vrot.lane.b32.xlu0 %v3031_v37, %s4613_s6  ;;  %v3612_v24 = vld [vmem:[#allocation3 + $0x169] sm:$0xff] }
 0x4e3   : > { %4549 = vmatmul.mubr.msk.bf16.gmra.mxu1 %vm2090_vm12, %v4005_v17 }
 0x4e4   : > { %v3284_v22 = vpop.permute.xlu1 %3283  ;;  %v3286_v53 = vpop.permute.xlu0 %3285 }
 0x4e5   : > { %3370 = vst.msk [vmem:[#allocation4 + $0x48] sm:$0xff] %vm1402_vm7, %v3284_v22  ;;  %3371 = vst.msk [vmem:[#allocation4 + $0x50] sm:$0xff] %vm1402_vm7, %v3286_v53 }
 0x4e6   : > { %3119 = vrot.lane.b32.xlu1 %v3032_v26, %s4613_s6  ;;  %3305 = vrot.lane.b32.xlu0 %v3796_v7, %s4614_s7 }
 0x4e8   : > { %v3288_v40 = vpop.permute.xlu1 %3287  ;;  %v3475_v36 = vpop.permute.xlu0 %3474 }
 0x4e9   : > { %3372 = vst.msk [vmem:[#allocation4 + $0x58] sm:$0xff] %vm1402_vm7, %v3288_v40  ;;  %v3804_v40 = vld [vmem:[#allocation3 + $0x16a] sm:$0xff] }
 0x4ea   : > { %3562 = vst.msk [vmem:[#allocation4 + $0x40] sm:$0xff] %vm1596_vm9, %v3475_v36  ;;  %3307 = vrot.lane.b32.xlu1 %v3797_v52, %s4614_s7  ;;  %3309 = vrot.lane.b32.xlu0 %v3223_v63, %s4614_s7  ;;  %v3421_v52 = vld [vmem:[#allocation3 + $0x170] sm:$0xff] }
 0x4ec   : > { %v3477_v58 = vpop.permute.xlu1 %3476  ;;  %v3479_v18 = vpop.permute.xlu0 %3478 }
 0x4ed   : > { %3563 = vst.msk [vmem:[#allocation4 + $0x48] sm:$0xff] %vm1596_vm9, %v3477_v58  ;;  %3564 = vst.msk [vmem:[#allocation4 + $0x50] sm:$0xff] %vm1596_vm9, %v3479_v18 }
 0x4ee   : > { %3311 = vrot.lane.b32.xlu1 %v3224_v5, %s4614_s7  ;;  %3498 = vrot.lane.b32.xlu0 %v3414_v43, %s4615_s8  ;;  %v3805_v43 = vld [vmem:[#allocation3 + $0x172] sm:$0xff] }
 0x4f0   : > { %v3481_v56 = vpop.permute.xlu1 %3480  ;;  %v3667_v46 = vpop.permute.xlu0 %3666 }
 0x4f1   : > { %3565 = vst.msk [vmem:[#allocation4 + $0x58] sm:$0xff] %vm1596_vm9, %v3481_v56 }
 0x4f2   : > { %3754 = vst.msk [vmem:[#allocation4 + $0x40] sm:$0xff] %vm1789_vm10, %v3667_v46  ;;  %3500 = vrot.lane.b32.xlu1 %v3415_v48, %s4615_s8  ;;  %3502 = vrot.lane.b32.xlu0 %v3416_v35, %s4615_s8  ;;  %v2847_v35 = vld [vmem:[#allocation3 + $0x180] sm:$0xff] }
 0x4f4   : > { %v3669_v10 = vpop.permute.xlu1 %3668  ;;  %v3671_v6 = vpop.permute.xlu0 %3670 }
 0x4f5   : > { %3755 = vst.msk [vmem:[#allocation4 + $0x48] sm:$0xff] %vm1789_vm10, %v3669_v10  ;;  %3756 = vst.msk [vmem:[#allocation4 + $0x50] sm:$0xff] %vm1789_vm10, %v3671_v6 }
 0x4f6   : > { %3504 = vrot.lane.b32.xlu1 %v3417_v4, %s4615_s8  ;;  %3690 = vrot.lane.b32.xlu0 %v3031_v37, %s4616_s9  ;;  %v3613_v37 = vld [vmem:[#allocation3 + $0x171] sm:$0xff]  ;;  %v2848_v4 = vld [vmem:[#allocation3 + $0x188] sm:$0xff] }
 0x4f8   : > { %v3673_v34 = vpop.permute.xlu1 %3672  ;;  %v3859_v11 = vpop.permute.xlu0 %3858 }
 0x4f9   : > { %3757 = vst.msk [vmem:[#allocation4 + $0x58] sm:$0xff] %vm1789_vm10, %v3673_v34 }
 0x4fa   : > { %3946 = vst.msk [vmem:[#allocation4 + $0x40] sm:$0xff] %vm1982_vm11, %v3859_v11  ;;  %3692 = vrot.lane.b32.xlu1 %v3032_v26, %s4616_s9  ;;  %3694 = vrot.lane.b32.xlu0 %v3608_v59, %s4616_s9 }
 0x4fc   : > { %v3861_v1 = vpop.permute.xlu1 %3860  ;;  %v3863_v38 = vpop.permute.xlu0 %3862 }
 0x4fd   : > { %3947 = vst.msk [vmem:[#allocation4 + $0x48] sm:$0xff] %vm1982_vm11, %v3861_v1  ;;  %3948 = vst.msk [vmem:[#allocation4 + $0x50] sm:$0xff] %vm1982_vm11, %v3863_v38 }
 0x4fe   : > { %3696 = vrot.lane.b32.xlu1 %v3609_v12, %s4616_s9  ;;  %3882 = vrot.lane.b32.xlu0 %v3223_v63, %s4617_s14 }
 0x500   : > { %v3865_v61 = vpop.permute.xlu1 %3864  ;;  %v3098_v13 = vpop.permute.xlu0 %3097 }
 0x501   : > { %3949 = vst.msk [vmem:[#allocation4 + $0x58] sm:$0xff] %vm1982_vm11, %v3865_v61  ;;  %v3978_v15 = vld [vmem:[#allocation4 + $0x40] sm:$0xff] }
 0x502   : > { %3181 = vst.msk [vmem:[#allocation4 + $0x60] sm:$0xff] %vm1209_vm6, %v3098_v13  ;;  %3884 = vrot.lane.b32.xlu1 %v3224_v5, %s4617_s14  ;;  %3886 = vrot.lane.b32.xlu0 %v3800_v45, %s4617_s14 }
 0x504   : > { %v3100_v62 = vpop.permute.xlu1 %3099  ;;  %v3102_v2 = vpop.permute.xlu0 %3101  ;;  %v3979_v9 = vld [vmem:[#allocation4 + $0x48] sm:$0xff]  ;;  %v3980_v28 = vld [vmem:[#allocation4 + $0x50] sm:$0xff] }
 0x505   : > { %3182 = vst.msk [vmem:[#allocation4 + $0x68] sm:$0xff] %vm1209_vm6, %v3100_v62  ;;  %3183 = vst.msk [vmem:[#allocation4 + $0x70] sm:$0xff] %vm1209_vm6, %v3102_v2  ;;  %v4006_v41 = vpack.c.bf16 %v3979_v9, %v3978_v15  ;;  %v3232_v15 = vld [vmem:[#allocation3 + $0x18a] sm:$0xff]  ;;  %v3424_v9 = vld [vmem:[#allocation3 + $0x198] sm:$0xff] }
 0x506   : > { %3888 = vrot.lane.b32.xlu1 %v3801_v8, %s4617_s14  ;;  %2933 = vrot.lane.b32.xlu0 %v2843_v20, %s4612_s30 }
 0x507   : > { %4552 = vmatprep.mubr.msk.bf16.mxu1 %vm2090_vm12, %v4006_v41  ;;  %v3425_v41 = vld [vmem:[#allocation3 + $0x1a0] sm:$0xff] }
 0x508   : > { %v3104_v27 = vpop.permute.xlu1 %3103  ;;  %v3290_v14 = vpop.permute.xlu0 %3289  ;;  %v3981_v30 = vld [vmem:[#allocation4 + $0x58] sm:$0xff] }
 0x509   : > { %3184 = vst.msk [vmem:[#allocation4 + $0x78] sm:$0xff] %vm1209_vm6, %v3104_v27  ;;  %v4007_v19 = vpack.c.bf16 %v3981_v30, %v3980_v28  ;;  %v3616_v28 = vld [vmem:[#allocation3 + $0x199] sm:$0xff] }
 0x50a   : > { %3373 = vst.msk [vmem:[#allocation4 + $0x60] sm:$0xff] %vm1402_vm7, %v3290_v14  ;;  %2935 = vrot.lane.b32.xlu1 %v2844_v32, %s4612_s30  ;;  %3121 = vrot.lane.b32.xlu0 %v3608_v59, %s4613_s6  ;;  %v3039_v59 = vld [vmem:[#allocation3 + $0x181] sm:$0xff] }
 0x50b   : > { %4553 = vmatmul.mubr.msk.bf16.gmra.mxu1 %vm2090_vm12, %v4007_v19 }
 0x50c   : > { %v3292_v54 = vpop.permute.xlu1 %3291  ;;  %v3294_v50 = vpop.permute.xlu0 %3293 }
 0x50d   : > { %3374 = vst.msk [vmem:[#allocation4 + $0x68] sm:$0xff] %vm1402_vm7, %v3292_v54  ;;  %3375 = vst.msk [vmem:[#allocation4 + $0x70] sm:$0xff] %vm1402_vm7, %v3294_v50 }
 0x50e   : > { %3123 = vrot.lane.b32.xlu1 %v3609_v12, %s4613_s6  ;;  %3125 = vrot.lane.b32.xlu0 %v3035_v16, %s4613_s6  ;;  %v3040_v12 = vld [vmem:[#allocation3 + $0x189] sm:$0xff] }
 0x510   : > { %v3296_v23 = vpop.permute.xlu1 %3295  ;;  %v3483_v31 = vpop.permute.xlu0 %3482 }
 0x511   : > { %3376 = vst.msk [vmem:[#allocation4 + $0x78] sm:$0xff] %vm1402_vm7, %v3296_v23 }
 0x512   : > { %3566 = vst.msk [vmem:[#allocation4 + $0x60] sm:$0xff] %vm1596_vm9, %v3483_v31  ;;  %3127 = vrot.lane.b32.xlu1 %v3036_v33, %s4613_s6  ;;  %3313 = vrot.lane.b32.xlu0 %v3800_v45, %s4614_s7  ;;  %v3231_v45 = vld [vmem:[#allocation3 + $0x182] sm:$0xff] }
 0x514   : > { %v3485_v57 = vpop.permute.xlu1 %3484  ;;  %v3487_v47 = vpop.permute.xlu0 %3486 }
 0x515   : > { %3567 = vst.msk [vmem:[#allocation4 + $0x68] sm:$0xff] %vm1596_vm9, %v3485_v57  ;;  %3568 = vst.msk [vmem:[#allocation4 + $0x70] sm:$0xff] %vm1596_vm9, %v3487_v47 }
 0x516   : > { %3315 = vrot.lane.b32.xlu1 %v3801_v8, %s4614_s7  ;;  %3317 = vrot.lane.b32.xlu0 %v3227_v55, %s4614_s7 }
 0x518   : > { %v3489_v21 = vpop.permute.xlu1 %3488  ;;  %v3675_v0 = vpop.permute.xlu0 %3674 }
 0x519   : > { %3569 = vst.msk [vmem:[#allocation4 + $0x78] sm:$0xff] %vm1596_vm9, %v3489_v21 }
 0x51a   : > { %3758 = vst.msk [vmem:[#allocation4 + $0x60] sm:$0xff] %vm1789_vm10, %v3675_v0  ;;  %3319 = vrot.lane.b32.xlu1 %v3228_v25, %s4614_s7  ;;  %3506 = vrot.lane.b32.xlu0 %v2843_v20, %s4615_s8 }
 0x51c   : > { %v3677_v7 = vpop.permute.xlu1 %3676  ;;  %v3679_v44 = vpop.permute.xlu0 %3678 }
 0x51d   : > { %3759 = vst.msk [vmem:[#allocation4 + $0x68] sm:$0xff] %vm1789_vm10, %v3677_v7  ;;  %3760 = vst.msk [vmem:[#allocation4 + $0x70] sm:$0xff] %vm1789_vm10, %v3679_v44 }
 0x51e   : > { %3508 = vrot.lane.b32.xlu1 %v2844_v32, %s4615_s8  ;;  %3510 = vrot.lane.b32.xlu0 %v3420_v60, %s4615_s8 }
 0x520   : > { %v3681_v3 = vpop.permute.xlu1 %3680  ;;  %v3867_v42 = vpop.permute.xlu0 %3866 }
 0x521   : > { %3761 = vst.msk [vmem:[#allocation4 + $0x78] sm:$0xff] %vm1789_vm10, %v3681_v3 }
 0x522   : > { %3950 = vst.msk [vmem:[#allocation4 + $0x60] sm:$0xff] %vm1982_vm11, %v3867_v42  ;;  %3512 = vrot.lane.b32.xlu1 %v3421_v52, %s4615_s8  ;;  %3698 = vrot.lane.b32.xlu0 %v3035_v16, %s4616_s9  ;;  %v3617_v16 = vld [vmem:[#allocation3 + $0x1a1] sm:$0xff] }
 0x524   : > { %v3869_v29 = vpop.permute.xlu1 %3868  ;;  %v3871_v49 = vpop.permute.xlu0 %3870 }
 0x525   : > { %3951 = vst.msk [vmem:[#allocation4 + $0x68] sm:$0xff] %vm1982_vm11, %v3869_v29  ;;  %3952 = vst.msk [vmem:[#allocation4 + $0x70] sm:$0xff] %vm1982_vm11, %v3871_v49 }
 0x526   : > { %3700 = vrot.lane.b32.xlu1 %v3036_v33, %s4616_s9  ;;  %3702 = vrot.lane.b32.xlu0 %v3612_v24, %s4616_s9 }
 0x528   : > { %v3873_v39 = vpop.permute.xlu1 %3872  ;;  %v3106_v51 = vpop.permute.xlu0 %3105 }
 0x529   : > { %3953 = vst.msk [vmem:[#allocation4 + $0x78] sm:$0xff] %vm1982_vm11, %v3873_v39  ;;  %v3982_v53 = vld [vmem:[#allocation4 + $0x60] sm:$0xff] }
 0x52a   : > { %3185 = vst.msk [vmem:[#allocation4 + $0x80] sm:$0xff] %vm1209_vm6, %v3106_v51  ;;  %3704 = vrot.lane.b32.xlu1 %v3613_v37, %s4616_s9  ;;  %3890 = vrot.lane.b32.xlu0 %v3227_v55, %s4617_s14  ;;  %v3808_v55 = vld [vmem:[#allocation3 + $0x19a] sm:$0xff] }
 0x52c   : > { %v3108_v17 = vpop.permute.xlu1 %3107  ;;  %v3110_v22 = vpop.permute.xlu0 %3109  ;;  %v3983_v26 = vld [vmem:[#allocation4 + $0x68] sm:$0xff]  ;;  %v3984_v18 = vld [vmem:[#allocation4 + $0x70] sm:$0xff] }
 0x52d   : > { %3186 = vst.msk [vmem:[#allocation4 + $0x88] sm:$0xff] %vm1209_vm6, %v3108_v17  ;;  %3187 = vst.msk [vmem:[#allocation4 + $0x90] sm:$0xff] %vm1209_vm6, %v3110_v22  ;;  %v4008_v36 = vpack.c.bf16 %v3983_v26, %v3982_v53  ;;  %v6777_v53 = vld [vmem:[%s6965_s4] ss:$0 sm:$0xff] }
 0x52e   : > { %3892 = vrot.lane.b32.xlu1 %v3228_v25, %s4617_s14  ;;  %3894 = vrot.lane.b32.xlu0 %v3804_v40, %s4617_s14  ;;  %v3809_v25 = vld [vmem:[#allocation3 + $0x1a2] sm:$0xff] }
 0x52f   : > { %4556 = vmatprep.mubr.msk.bf16.mxu1 %vm2090_vm12, %v4008_v36 }
 0x530   : > { %v3112_v63 = vpop.permute.xlu1 %3111  ;;  %v3298_v58 = vpop.permute.xlu0 %3297  ;;  %v3985_v5 = vld [vmem:[#allocation4 + $0x78] sm:$0xff] }
 0x531   : > { %3188 = vst.msk [vmem:[#allocation4 + $0x98] sm:$0xff] %vm1209_vm6, %v3112_v63  ;;  %v4009_v56 = vpack.c.bf16 %v3985_v5, %v3984_v18 }
 0x532   : > { %3377 = vst.msk [vmem:[#allocation4 + $0x80] sm:$0xff] %vm1402_vm7, %v3298_v58  ;;  %3896 = vrot.lane.b32.xlu1 %v3805_v43, %s4617_s14  ;;  %2937 = vrot.lane.b32.xlu0 %v3420_v60, %s4612_s30 }
 0x533   : > { %4557 = vmatmul.mubr.msk.bf16.gmra.mxu1 %vm2090_vm12, %v4009_v56  ;;  %v4257_v56 = vld [vmem:[%s4659_s24] sm:$0xff] }
 0x534   : > { %v3300_v46 = vpop.permute.xlu1 %3299  ;;  %v3302_v48 = vpop.permute.xlu0 %3301 }
 0x535   : > { %3378 = vst.msk [vmem:[#allocation4 + $0x88] sm:$0xff] %vm1402_vm7, %v3300_v46  ;;  %3379 = vst.msk [vmem:[#allocation4 + $0x90] sm:$0xff] %vm1402_vm7, %v3302_v48 }
 0x536   : > { %2939 = vrot.lane.b32.xlu1 %v3421_v52, %s4612_s30  ;;  %2941 = vrot.lane.b32.xlu0 %v2847_v35, %s4612_s30 }
 0x538   : > { %v3304_v10 = vpop.permute.xlu1 %3303  ;;  %v3491_v6 = vpop.permute.xlu0 %3490 }
 0x539   : > { %3380 = vst.msk [vmem:[#allocation4 + $0x98] sm:$0xff] %vm1402_vm7, %v3304_v10 }
 0x53a   : > { %3570 = vst.msk [vmem:[#allocation4 + $0x80] sm:$0xff] %vm1596_vm9, %v3491_v6  ;;  %2943 = vrot.lane.b32.xlu1 %v2848_v4, %s4612_s30  ;;  %3129 = vrot.lane.b32.xlu0 %v3612_v24, %s4613_s6  ;;  %v4260_v6 = vld [vmem:[%s4659_s24 + $0x18] sm:$0xff] }
 0x53c   : > { %v3493_v34 = vpop.permute.xlu1 %3492  ;;  %v3495_v11 = vpop.permute.xlu0 %3494 }
 0x53d   : > { %3571 = vst.msk [vmem:[#allocation4 + $0x88] sm:$0xff] %vm1596_vm9, %v3493_v34  ;;  %3572 = vst.msk [vmem:[#allocation4 + $0x90] sm:$0xff] %vm1596_vm9, %v3495_v11 }
 0x53e   : > { %3131 = vrot.lane.b32.xlu1 %v3613_v37, %s4613_s6  ;;  %3133 = vrot.lane.b32.xlu0 %v3039_v59, %s4613_s6 }
 0x540   : > { %v3497_v1 = vpop.permute.xlu1 %3496  ;;  %v3683_v38 = vpop.permute.xlu0 %3682 }
 0x541   : > { %3573 = vst.msk [vmem:[#allocation4 + $0x98] sm:$0xff] %vm1596_vm9, %v3497_v1 }
 0x542   : > { %3762 = vst.msk [vmem:[#allocation4 + $0x80] sm:$0xff] %vm1789_vm10, %v3683_v38  ;;  %3135 = vrot.lane.b32.xlu1 %v3040_v12, %s4613_s6  ;;  %3321 = vrot.lane.b32.xlu0 %v3804_v40, %s4614_s7  ;;  %v4259_v40 = vld [vmem:[%s4659_s24 + $0x10] sm:$0xff] }
 0x544   : > { %v3685_v61 = vpop.permute.xlu1 %3684  ;;  %v3687_v13 = vpop.permute.xlu0 %3686 }
 0x545   : > { %3763 = vst.msk [vmem:[#allocation4 + $0x88] sm:$0xff] %vm1789_vm10, %v3685_v61  ;;  %3764 = vst.msk [vmem:[#allocation4 + $0x90] sm:$0xff] %vm1789_vm10, %v3687_v13  ;;  %v4258_v61 = vld [vmem:[%s4659_s24 + $0x8] sm:$0xff] }
 0x546   : > { %3323 = vrot.lane.b32.xlu1 %v3805_v43, %s4614_s7  ;;  %3325 = vrot.lane.b32.xlu0 %v3231_v45, %s4614_s7 }
 0x548   : > { %v3689_v62 = vpop.permute.xlu1 %3688  ;;  %v3875_v2 = vpop.permute.xlu0 %3874 }
 0x549   : > { %3765 = vst.msk [vmem:[#allocation4 + $0x98] sm:$0xff] %vm1789_vm10, %v3689_v62 }
 0x54a   : > { %3954 = vst.msk [vmem:[#allocation4 + $0x80] sm:$0xff] %vm1982_vm11, %v3875_v2  ;;  %3327 = vrot.lane.b32.xlu1 %v3232_v15, %s4614_s7  ;;  %3514 = vrot.lane.b32.xlu0 %v2847_v35, %s4615_s8 }
 0x54c   : > { %v3877_v8 = vpop.permute.xlu1 %3876  ;;  %v3879_v20 = vpop.permute.xlu0 %3878 }
 0x54d   : > { %3955 = vst.msk [vmem:[#allocation4 + $0x88] sm:$0xff] %vm1982_vm11, %v3877_v8  ;;  %3956 = vst.msk [vmem:[#allocation4 + $0x90] sm:$0xff] %vm1982_vm11, %v3879_v20 }
 0x54e   : > { %3516 = vrot.lane.b32.xlu1 %v2848_v4, %s4615_s8  ;;  %3518 = vrot.lane.b32.xlu0 %v3424_v9, %s4615_s8 }
 0x550   : > { %v3881_v27 = vpop.permute.xlu1 %3880  ;;  %v3114_v14 = vpop.permute.xlu0 %3113 }
 0x551   : > { %3957 = vst.msk [vmem:[#allocation4 + $0x98] sm:$0xff] %vm1982_vm11, %v3881_v27  ;;  %v3986_v19 = vld [vmem:[#allocation4 + $0x80] sm:$0xff] }
 0x552   : > { %3189 = vst.msk [vmem:[#allocation4 + $0xa0] sm:$0xff] %vm1209_vm6, %v3114_v14  ;;  %3520 = vrot.lane.b32.xlu1 %v3425_v41, %s4615_s8  ;;  %3706 = vrot.lane.b32.xlu0 %v3039_v59, %s4616_s9 }
 0x554   : > { %v3116_v30 = vpop.permute.xlu1 %3115  ;;  %v3118_v32 = vpop.permute.xlu0 %3117  ;;  %v3987_v54 = vld [vmem:[#allocation4 + $0x88] sm:$0xff]  ;;  %v3988_v33 = vld [vmem:[#allocation4 + $0x90] sm:$0xff] }
 0x555   : > { %3190 = vst.msk [vmem:[#allocation4 + $0xa8] sm:$0xff] %vm1209_vm6, %v3116_v30  ;;  %3191 = vst.msk [vmem:[#allocation4 + $0xb0] sm:$0xff] %vm1209_vm6, %v3118_v32  ;;  %v4010_v50 = vpack.c.bf16 %v3987_v54, %v3986_v19 }
 0x556   : > { %3708 = vrot.lane.b32.xlu1 %v3040_v12, %s4616_s9  ;;  %3710 = vrot.lane.b32.xlu0 %v3616_v28, %s4616_s9 }
 0x557   : > { %4560 = vmatprep.mubr.msk.bf16.mxu1 %vm2090_vm12, %v4010_v50 }
 0x558   : > { %v3120_v23 = vpop.permute.xlu1 %3119  ;;  %v3306_v31 = vpop.permute.xlu0 %3305  ;;  %v3989_v57 = vld [vmem:[#allocation4 + $0x98] sm:$0xff] }
 0x559   : > { %3192 = vst.msk [vmem:[#allocation4 + $0xb8] sm:$0xff] %vm1209_vm6, %v3120_v23  ;;  %v4011_v47 = vpack.c.bf16 %v3989_v57, %v3988_v33  ;;  %v4263_v57 = vld [vmem:[%s4659_s24 + $0x30] sm:$0xff] }
 0x55a   : > { %3381 = vst.msk [vmem:[#allocation4 + $0xa0] sm:$0xff] %vm1402_vm7, %v3306_v31  ;;  %3712 = vrot.lane.b32.xlu1 %v3617_v16, %s4616_s9  ;;  %3898 = vrot.lane.b32.xlu0 %v3231_v45, %s4617_s14 }
 0x55b   : > { %4561 = vmatmul.mubr.msk.bf16.gmra.mxu1 %vm2090_vm12, %v4011_v47 }
 0x55c   : > { %v3308_v21 = vpop.permute.xlu1 %3307  ;;  %v3310_v0 = vpop.permute.xlu0 %3309 }
 0x55d   : > { %3382 = vst.msk [vmem:[#allocation4 + $0xa8] sm:$0xff] %vm1402_vm7, %v3308_v21  ;;  %3383 = vst.msk [vmem:[#allocation4 + $0xb0] sm:$0xff] %vm1402_vm7, %v3310_v0 }
 0x55e   : > { %3900 = vrot.lane.b32.xlu1 %v3232_v15, %s4617_s14  ;;  %3902 = vrot.lane.b32.xlu0 %v3808_v55, %s4617_s14 }
 0x560   : > { %v3312_v7 = vpop.permute.xlu1 %3311  ;;  %v3499_v44 = vpop.permute.xlu0 %3498 }
 0x561   : > { %3384 = vst.msk [vmem:[#allocation4 + $0xb8] sm:$0xff] %vm1402_vm7, %v3312_v7 }
 0x562   : > { %3574 = vst.msk [vmem:[#allocation4 + $0xa0] sm:$0xff] %vm1596_vm9, %v3499_v44  ;;  %3904 = vrot.lane.b32.xlu1 %v3809_v25, %s4617_s14  ;;  %v4261_v25 = vld [vmem:[%s4659_s24 + $0x20] sm:$0xff] }
 0x564   : > { %v3501_v60 = vpop.permute.xlu1 %3500  ;;  %v3503_v3 = vpop.permute.xlu0 %3502 }
 0x565   : > { %3575 = vst.msk [vmem:[#allocation4 + $0xa8] sm:$0xff] %vm1596_vm9, %v3501_v60  ;;  %3576 = vst.msk [vmem:[#allocation4 + $0xb0] sm:$0xff] %vm1596_vm9, %v3503_v3  ;;  %v4264_v3 = vld [vmem:[%s4659_s24 + $0x38] sm:$0xff] }
 0x568   : > { %v3505_v42 = vpop.permute.xlu1 %3504  ;;  %v3691_v52 = vpop.permute.xlu0 %3690 }
 0x569   : > { %3577 = vst.msk [vmem:[#allocation4 + $0xb8] sm:$0xff] %vm1596_vm9, %v3505_v42 }
 0x56a   : > { %3766 = vst.msk [vmem:[#allocation4 + $0xa0] sm:$0xff] %vm1789_vm10, %v3691_v52 }
 0x56c   : > { %v3693_v29 = vpop.permute.xlu1 %3692  ;;  %v3695_v49 = vpop.permute.xlu0 %3694 }
 0x56d   : > { %3767 = vst.msk [vmem:[#allocation4 + $0xa8] sm:$0xff] %vm1789_vm10, %v3693_v29  ;;  %3768 = vst.msk [vmem:[#allocation4 + $0xb0] sm:$0xff] %vm1789_vm10, %v3695_v49 }
 0x570   : > { %v3697_v24 = vpop.permute.xlu1 %3696  ;;  %v3883_v39 = vpop.permute.xlu0 %3882 }
 0x571   : > { %3769 = vst.msk [vmem:[#allocation4 + $0xb8] sm:$0xff] %vm1789_vm10, %v3697_v24 }
 0x572   : > { %3958 = vst.msk [vmem:[#allocation4 + $0xa0] sm:$0xff] %vm1982_vm11, %v3883_v39 }
 0x574   : > { %v3885_v51 = vpop.permute.xlu1 %3884  ;;  %v3887_v37 = vpop.permute.xlu0 %3886 }
 0x575   : > { %3959 = vst.msk [vmem:[#allocation4 + $0xa8] sm:$0xff] %vm1982_vm11, %v3885_v51  ;;  %3960 = vst.msk [vmem:[#allocation4 + $0xb0] sm:$0xff] %vm1982_vm11, %v3887_v37  ;;  %v4262_v37 = vld [vmem:[%s4659_s24 + $0x28] sm:$0xff] }
 0x578   : > { %v3889_v17 = vpop.permute.xlu1 %3888  ;;  %v2934_v22 = vpop.permute.xlu0 %2933 }
 0x579   : > { %3961 = vst.msk [vmem:[#allocation4 + $0xb8] sm:$0xff] %vm1982_vm11, %v3889_v17  ;;  %v3990_v18 = vld [vmem:[#allocation4 + $0xa0] sm:$0xff] }
 0x57a   : > { %3003 = vst.msk [vmem:[#allocation4 + $0xd0] sm:$0xff] %vm1016_vm5, %v2934_v22 }
 0x57b   : > { %v4546_v26 = vpop.f32.mrf.mxu1 }
 0x57c   : > { %v4139_v36 = vadd.f32 %v4546_v26, %v6777_v53  ;;  %v2936_v63 = vpop.permute.xlu1 %2935  ;;  %v3122_v58 = vpop.permute.xlu0 %3121  ;;  %v3991_v5 = vld [vmem:[#allocation4 + $0xa8] sm:$0xff]  ;;  %v3992_v1 = vld [vmem:[#allocation4 + $0xb0] sm:$0xff] }
 0x57d   : > { %3004 = vst.msk [vmem:[#allocation4 + $0xd8] sm:$0xff] %vm1016_vm5, %v2936_v63  ;;  %v4130_v43 = vpop.f32.mrf.mxu1  ;;  %v4012_v46 = vpack.c.bf16 %v3991_v5, %v3990_v18 }
 0x57e   : > { %3193 = vst.msk [vmem:[#allocation4 + $0xc0] sm:$0xff] %vm1209_vm6, %v3122_v58  ;;  %v4291_v48 = vadd.f32 %v4259_v40, %v4139_v36  ;;  %v4131_v35 = vadd.f32 %v6777_v53, %v4130_v43 }
 0x57f   : > { %v4547_v10 = vpop.f32.mrf.mxu1  ;;  %4564 = vmatprep.mubr.msk.bf16.mxu1 %vm2090_vm12, %v4012_v46 }
 0x580   : > { %4323 = vst.msk [vmem:[%s4664_s27 + $0x10] sm:$0xff] %vm373_vm2, %v4291_v48  ;;  %v4289_v4 = vadd.f32 %v4257_v56, %v4131_v35  ;;  %v4142_v34 = vadd.f32 %v4547_v10, %v6777_v53  ;;  %v3124_v11 = vpop.permute.xlu1 %3123  ;;  %v3126_v59 = vpop.permute.xlu0 %3125  ;;  %v3993_v38 = vld [vmem:[#allocation4 + $0xb8] sm:$0xff] }
 0x581   : > { %3194 = vst.msk [vmem:[#allocation4 + $0xc8] sm:$0xff] %vm1209_vm6, %v3124_v11  ;;  %3195 = vst.msk [vmem:[#allocation4 + $0xd0] sm:$0xff] %vm1209_vm6, %v3126_v59  ;;  %v4133_v12 = vpop.f32.mrf.mxu1  ;;  %v4013_v13 = vpack.c.bf16 %v3993_v38, %v3992_v1 }
 0x582   : > { %4321 = vst.msk [vmem:[%s4664_s27] sm:$0xff] %vm373_vm2, %v4289_v4  ;;  %v4292_v45 = vadd.f32 %v4260_v6, %v4142_v34  ;;  %v4134_v62 = vadd.f32 %v6777_v53, %v4133_v12 }
 0x583   : > { %4565 = vmatmul.mubr.msk.bf16.gmra.mxu1 %vm2090_vm12, %v4013_v13  ;;  %v4267_v13 = vld [vmem:[%s4659_s24 + $0x50] sm:$0xff] }
 0x584   : > { %4324 = vst.msk [vmem:[%s4664_s27 + $0x18] sm:$0xff] %vm373_vm2, %v4292_v45  ;;  %v4290_v2 = vadd.f32 %v4258_v61, %v4134_v62  ;;  %v3128_v15 = vpop.permute.xlu1 %3127  ;;  %v3314_v9 = vpop.permute.xlu0 %3313 }
 0x585   : > { %3196 = vst.msk [vmem:[#allocation4 + $0xd8] sm:$0xff] %vm1209_vm6, %v3128_v15 }
 0x586   : > { %3385 = vst.msk [vmem:[#allocation4 + $0xc0] sm:$0xff] %vm1402_vm7, %v3314_v9  ;;  %v4265_v9 = vld [vmem:[%s4659_s24 + $0x40] sm:$0xff] }
 0x587   : > { %4322 = vst.msk [vmem:[%s4664_s27 + $0x8] sm:$0xff] %vm373_vm2, %v4290_v2 }
 0x588   : > { %v3316_v8 = vpop.permute.xlu1 %3315  ;;  %v3318_v20 = vpop.permute.xlu0 %3317 }
 0x589   : > { %3386 = vst.msk [vmem:[#allocation4 + $0xc8] sm:$0xff] %vm1402_vm7, %v3316_v8  ;;  %3387 = vst.msk [vmem:[#allocation4 + $0xd0] sm:$0xff] %vm1402_vm7, %v3318_v20 }
 0x58c   : > { %v3320_v41 = vpop.permute.xlu1 %3319  ;;  %v3507_v27 = vpop.permute.xlu0 %3506 }
 0x58d   : > { %3388 = vst.msk [vmem:[#allocation4 + $0xd8] sm:$0xff] %vm1402_vm7, %v3320_v41 }
 0x58e   : > { %3578 = vst.msk [vmem:[#allocation4 + $0xc0] sm:$0xff] %vm1596_vm9, %v3507_v27  ;;  %v4268_v27 = vld [vmem:[%s4659_s24 + $0x58] sm:$0xff] }
 0x590   : > { %v3509_v14 = vpop.permute.xlu1 %3508  ;;  %v3511_v28 = vpop.permute.xlu0 %3510 }
 0x591   : > { %3579 = vst.msk [vmem:[#allocation4 + $0xc8] sm:$0xff] %vm1596_vm9, %v3509_v14  ;;  %3580 = vst.msk [vmem:[#allocation4 + $0xd0] sm:$0xff] %vm1596_vm9, %v3511_v28 }
 0x594   : > { %v3513_v30 = vpop.permute.xlu1 %3512  ;;  %v3699_v32 = vpop.permute.xlu0 %3698 }
 0x595   : > { %3581 = vst.msk [vmem:[#allocation4 + $0xd8] sm:$0xff] %vm1596_vm9, %v3513_v30 }
 0x596   : > { %3770 = vst.msk [vmem:[#allocation4 + $0xc0] sm:$0xff] %vm1789_vm10, %v3699_v32 }
 0x598   : > { %v3701_v19 = vpop.permute.xlu1 %3700  ;;  %v3703_v54 = vpop.permute.xlu0 %3702 }
 0x599   : > { %3771 = vst.msk [vmem:[#allocation4 + $0xc8] sm:$0xff] %vm1789_vm10, %v3701_v19  ;;  %3772 = vst.msk [vmem:[#allocation4 + $0xd0] sm:$0xff] %vm1789_vm10, %v3703_v54  ;;  %v4266_v54 = vld [vmem:[%s4659_s24 + $0x48] sm:$0xff] }
 0x59c   : > { %v3705_v50 = vpop.permute.xlu1 %3704  ;;  %v3891_v16 = vpop.permute.xlu0 %3890 }
 0x59d   : > { %3773 = vst.msk [vmem:[#allocation4 + $0xd8] sm:$0xff] %vm1789_vm10, %v3705_v50 }
 0x59e   : > { %3962 = vst.msk [vmem:[#allocation4 + $0xc0] sm:$0xff] %vm1982_vm11, %v3891_v16 }
 0x5a0   : > { %v3893_v23 = vpop.permute.xlu1 %3892  ;;  %v3895_v31 = vpop.permute.xlu0 %3894 }
 0x5a1   : > { %3963 = vst.msk [vmem:[#allocation4 + $0xc8] sm:$0xff] %vm1982_vm11, %v3893_v23  ;;  %3964 = vst.msk [vmem:[#allocation4 + $0xd0] sm:$0xff] %vm1982_vm11, %v3895_v31 }
 0x5a3   : > { %v4550_v33 = vpop.f32.mrf.mxu1 }
 0x5a4   : > { %v4155_v47 = vadd.f32 %v4550_v33, %v6777_v53  ;;  %v3897_v55 = vpop.permute.xlu1 %3896  ;;  %v2938_v21 = vpop.permute.xlu0 %2937 }
 0x5a5   : > { %3965 = vst.msk [vmem:[#allocation4 + $0xd8] sm:$0xff] %vm1982_vm11, %v3897_v55  ;;  %v4146_v0 = vpop.f32.mrf.mxu1  ;;  %v3994_v24 = vld [vmem:[#allocation4 + $0xc0] sm:$0xff] }
 0x5a6   : > { %3005 = vst.msk [vmem:[#allocation4 + $0xe0] sm:$0xff] %vm1016_vm5, %v2938_v21  ;;  %v4295_v7 = vadd.f32 %v4263_v57, %v4155_v47  ;;  %v4147_v44 = vadd.f32 %v6777_v53, %v4146_v0 }
 0x5a7   : > { %v4551_v60 = vpop.f32.mrf.mxu1 }
 0x5a8   : > { %4327 = vst.msk [vmem:[%s4664_s27 + $0x30] sm:$0xff] %vm373_vm2, %v4295_v7  ;;  %v4293_v42 = vadd.f32 %v4261_v25, %v4147_v44  ;;  %v4158_v52 = vadd.f32 %v4551_v60, %v6777_v53  ;;  %v2940_v29 = vpop.permute.xlu1 %2939  ;;  %v2942_v49 = vpop.permute.xlu0 %2941  ;;  %v3995_v39 = vld [vmem:[#allocation4 + $0xc8] sm:$0xff]  ;;  %v3996_v58 = vld [vmem:[#allocation4 + $0xd0] sm:$0xff] }
 0x5a9   : > { %3006 = vst.msk [vmem:[#allocation4 + $0xe8] sm:$0xff] %vm1016_vm5, %v2940_v29  ;;  %3007 = vst.msk [vmem:[#allocation4 + $0xf0] sm:$0xff] %vm1016_vm5, %v2942_v49  ;;  %v4149_v51 = vpop.f32.mrf.mxu1  ;;  %v4014_v17 = vpack.c.bf16 %v3995_v39, %v3994_v24  ;;  %v4271_v7 = vld [vmem:[%s4659_s24 + $0x70] sm:$0xff]  ;;  %v4272_v49 = vld [vmem:[%s4659_s24 + $0x78] sm:$0xff] }
 0x5aa   : > { %4325 = vst.msk [vmem:[%s4664_s27 + $0x20] sm:$0xff] %vm373_vm2, %v4293_v42  ;;  %v4296_v22 = vadd.f32 %v4264_v3, %v4158_v52  ;;  %v4150_v26 = vadd.f32 %v6777_v53, %v4149_v51  ;;  %v4269_v3 = vld [vmem:[%s4659_s24 + $0x60] sm:$0xff] }
 0x5ab   : > { %4568 = vmatprep.mubr.msk.bf16.mxu1 %vm2090_vm12, %v4014_v17 }
 0x5ac   : > { %4328 = vst.msk [vmem:[%s4664_s27 + $0x38] sm:$0xff] %vm373_vm2, %v4296_v22  ;;  %v4294_v40 = vadd.f32 %v4262_v37, %v4150_v26  ;;  %v2944_v36 = vpop.permute.xlu1 %2943  ;;  %v3130_v63 = vpop.permute.xlu0 %3129  ;;  %v3997_v18 = vld [vmem:[#allocation4 + $0xd8] sm:$0xff]  ;;  %v4270_v37 = vld [vmem:[%s4659_s24 + $0x68] sm:$0xff] }
 0x5ad   : > { %3008 = vst.msk [vmem:[#allocation4 + $0xf8] sm:$0xff] %vm1016_vm5, %v2944_v36  ;;  %v4015_v5 = vpack.c.bf16 %v3997_v18, %v3996_v58  ;;  %v4275_v36 = vld [vmem:[%s4659_s24 + $0x90] sm:$0xff]  ;;  %v4273_v18 = vld [vmem:[%s4659_s24 + $0x80] sm:$0xff] }
 0x5ae   : > { %3197 = vst.msk [vmem:[#allocation4 + $0xe0] sm:$0xff] %vm1209_vm6, %v3130_v63 }
 0x5af   : > { %4326 = vst.msk [vmem:[%s4664_s27 + $0x28] sm:$0xff] %vm373_vm2, %v4294_v40  ;;  %4569 = vmatmul.mubr.msk.bf16.gmra.mxu1 %vm2090_vm12, %v4015_v5 }
 0x5b0   : > { %v3132_v43 = vpop.permute.xlu1 %3131  ;;  %v3134_v56 = vpop.permute.xlu0 %3133 }
 0x5b1   : > { %3198 = vst.msk [vmem:[#allocation4 + $0xe8] sm:$0xff] %vm1209_vm6, %v3132_v43  ;;  %3199 = vst.msk [vmem:[#allocation4 + $0xf0] sm:$0xff] %vm1209_vm6, %v3134_v56 }
 0x5b4   : > { %v3136_v46 = vpop.permute.xlu1 %3135  ;;  %v3322_v48 = vpop.permute.xlu0 %3321 }
 0x5b5   : > { %3200 = vst.msk [vmem:[#allocation4 + $0xf8] sm:$0xff] %vm1209_vm6, %v3136_v46  ;;  %v4276_v46 = vld [vmem:[%s4659_s24 + $0x98] sm:$0xff] }
 0x5b6   : > { %3389 = vst.msk [vmem:[#allocation4 + $0xe0] sm:$0xff] %vm1402_vm7, %v3322_v48 }
 0x5b8   : > { %v3324_v35 = vpop.permute.xlu1 %3323  ;;  %v3326_v10 = vpop.permute.xlu0 %3325 }
 0x5b9   : > { %3390 = vst.msk [vmem:[#allocation4 + $0xe8] sm:$0xff] %vm1402_vm7, %v3324_v35  ;;  %3391 = vst.msk [vmem:[#allocation4 + $0xf0] sm:$0xff] %vm1402_vm7, %v3326_v10 }
 0x5bc   : > { %v3328_v6 = vpop.permute.xlu1 %3327  ;;  %v3515_v4 = vpop.permute.xlu0 %3514 }
 0x5bd   : > { %3392 = vst.msk [vmem:[#allocation4 + $0xf8] sm:$0xff] %vm1402_vm7, %v3328_v6  ;;  %v4274_v6 = vld [vmem:[%s4659_s24 + $0x88] sm:$0xff] }
 0x5be   : > { %3582 = vst.msk [vmem:[#allocation4 + $0xe0] sm:$0xff] %vm1596_vm9, %v3515_v4 }
 0x5c0   : > { %v3517_v34 = vpop.permute.xlu1 %3516  ;;  %v3519_v11 = vpop.permute.xlu0 %3518 }
 0x5c1   : > { %3583 = vst.msk [vmem:[#allocation4 + $0xe8] sm:$0xff] %vm1596_vm9, %v3517_v34  ;;  %3584 = vst.msk [vmem:[#allocation4 + $0xf0] sm:$0xff] %vm1596_vm9, %v3519_v11 }
 0x5c4   : > { %v3521_v59 = vpop.permute.xlu1 %3520  ;;  %v3707_v1 = vpop.permute.xlu0 %3706 }
 0x5c5   : > { %3585 = vst.msk [vmem:[#allocation4 + $0xf8] sm:$0xff] %vm1596_vm9, %v3521_v59 }
 0x5c6   : > { %3774 = vst.msk [vmem:[#allocation4 + $0xe0] sm:$0xff] %vm1789_vm10, %v3707_v1  ;;  %v4279_v1 = vld [vmem:[%s4659_s24 + $0xb0] sm:$0xff] }
 0x5c8   : > { %v3709_v38 = vpop.permute.xlu1 %3708  ;;  %v3711_v12 = vpop.permute.xlu0 %3710 }
 0x5c9   : > { %3775 = vst.msk [vmem:[#allocation4 + $0xe8] sm:$0xff] %vm1789_vm10, %v3709_v38  ;;  %3776 = vst.msk [vmem:[#allocation4 + $0xf0] sm:$0xff] %vm1789_vm10, %v3711_v12 }
 0x5cb   : > { %v4554_v61 = vpop.f32.mrf.mxu1 }
 0x5cc   : > { %v4171_v45 = vadd.f32 %v4554_v61, %v6777_v53  ;;  %v3713_v62 = vpop.permute.xlu1 %3712  ;;  %v3899_v2 = vpop.permute.xlu0 %3898  ;;  %v4277_v61 = vld [vmem:[%s4659_s24 + $0xa0] sm:$0xff] }
 0x5cd   : > { %3777 = vst.msk [vmem:[#allocation4 + $0xf8] sm:$0xff] %vm1789_vm10, %v3713_v62  ;;  %v4162_v15 = vpop.f32.mrf.mxu1 }
 0x5ce   : > { %3966 = vst.msk [vmem:[#allocation4 + $0xe0] sm:$0xff] %vm1982_vm11, %v3899_v2  ;;  %v4299_v8 = vadd.f32 %v4267_v13, %v4171_v45  ;;  %v4163_v20 = vadd.f32 %v6777_v53, %v4162_v15  ;;  %v4280_v2 = vld [vmem:[%s4659_s24 + $0xb8] sm:$0xff] }
 0x5cf   : > { %v4555_v41 = vpop.f32.mrf.mxu1 }
 0x5d0   : > { %4331 = vst.msk [vmem:[%s4664_s27 + $0x50] sm:$0xff] %vm373_vm2, %v4299_v8  ;;  %v4297_v14 = vadd.f32 %v4265_v9, %v4163_v20  ;;  %v4174_v28 = vadd.f32 %v4555_v41, %v6777_v53  ;;  %v3901_v30 = vpop.permute.xlu1 %3900  ;;  %v3903_v32 = vpop.permute.xlu0 %3902  ;;  %v4278_v20 = vld [vmem:[%s4659_s24 + $0xa8] sm:$0xff] }
 0x5d1   : > { %3967 = vst.msk [vmem:[#allocation4 + $0xe8] sm:$0xff] %vm1982_vm11, %v3901_v30  ;;  %v4165_v19 = vpop.f32.mrf.mxu1  ;;  %3968 = vst.msk [vmem:[#allocation4 + $0xf0] sm:$0xff] %vm1982_vm11, %v3903_v32  ;;  %v4283_v30 = vld [vmem:[%s4659_s24 + $0xd0] sm:$0xff] }
 0x5d2   : > { %4329 = vst.msk [vmem:[%s4664_s27 + $0x40] sm:$0xff] %vm373_vm2, %v4297_v14  ;;  %v4300_v50 = vadd.f32 %v4268_v27, %v4174_v28  ;;  %v4166_v16 = vadd.f32 %v6777_v53, %v4165_v19 }
 0x5d4   : > { %4332 = vst.msk [vmem:[%s4664_s27 + $0x58] sm:$0xff] %vm373_vm2, %v4300_v50  ;;  %v4298_v23 = vadd.f32 %v4266_v54, %v4166_v16  ;;  %v3905_v31 = vpop.permute.xlu1 %3904  ;;  %v4281_v54 = vld [vmem:[%s4659_s24 + $0xc0] sm:$0xff] }
 0x5d5   : > { %3969 = vst.msk [vmem:[#allocation4 + $0xf8] sm:$0xff] %vm1982_vm11, %v3905_v31  ;;  %v3998_v33 = vld [vmem:[#allocation4 + $0xe0] sm:$0xff]  ;;  %v4284_v31 = vld [vmem:[%s4659_s24 + $0xd8] sm:$0xff] }
 0x5d6   : > { %4330 = vst.msk [vmem:[%s4664_s27 + $0x48] sm:$0xff] %vm373_vm2, %v4298_v23 }
 0x5d8   : > { %v3999_v57 = vld [vmem:[#allocation4 + $0xe8] sm:$0xff]  ;;  %v4000_v55 = vld [vmem:[#allocation4 + $0xf0] sm:$0xff] }
 0x5d9   : > { %v4016_v47 = vpack.c.bf16 %v3999_v57, %v3998_v33 }
 0x5db   : > { %4572 = vmatprep.mubr.msk.bf16.mxu1 %vm2090_vm12, %v4016_v47 }
 0x5dc   : > { %v4001_v21 = vld [vmem:[#allocation4 + $0xf8] sm:$0xff] }
 0x5dd   : > { %v4017_v0 = vpack.c.bf16 %v4001_v21, %v4000_v55  ;;  %v4282_v55 = vld [vmem:[%s4659_s24 + $0xc8] sm:$0xff] }
 0x5df   : > { %4573 = vmatmul.mubr.msk.bf16.gmra.mxu1 %vm2090_vm12, %v4017_v0 }
 0x5f3   : > { %v4558_v25 = vpop.f32.mrf.mxu1 }
 0x5f4   : > { %v4187_v44 = vadd.f32 %v4558_v25, %v6777_v53 }
 0x5f5   : > { %v4178_v60 = vpop.f32.mrf.mxu1 }
 0x5f6   : > { %v4303_v42 = vadd.f32 %v4271_v7, %v4187_v44  ;;  %v4179_v52 = vadd.f32 %v6777_v53, %v4178_v60  ;;  %v4287_v44 = vld [vmem:[%s4659_s24 + $0xf0] sm:$0xff] }
 0x5f7   : > { %v4559_v29 = vpop.f32.mrf.mxu1 }
 0x5f8   : > { %4335 = vst.msk [vmem:[%s4664_s27 + $0x70] sm:$0xff] %vm373_vm2, %v4303_v42  ;;  %v4301_v24 = vadd.f32 %v4269_v3, %v4179_v52  ;;  %v4190_v39 = vadd.f32 %v4559_v29, %v6777_v53  ;;  %v4285_v42 = vld [vmem:[%s4659_s24 + $0xe0] sm:$0xff] }
 0x5f9   : > { %v4181_v51 = vpop.f32.mrf.mxu1 }
 0x5fa   : > { %4333 = vst.msk [vmem:[%s4664_s27 + $0x60] sm:$0xff] %vm373_vm2, %v4301_v24  ;;  %v4304_v17 = vadd.f32 %v4272_v49, %v4190_v39  ;;  %v4182_v22 = vadd.f32 %v6777_v53, %v4181_v51  ;;  %v4288_v24 = vld [vmem:[%s4659_s24 + $0xf8] sm:$0xff] }
 0x5fc   : > { %4336 = vst.msk [vmem:[%s4664_s27 + $0x78] sm:$0xff] %vm373_vm2, %v4304_v17  ;;  %v4302_v26 = vadd.f32 %v4270_v37, %v4182_v22  ;;  %v4286_v17 = vld [vmem:[%s4659_s24 + $0xe8] sm:$0xff] }
 0x5fe   : > { %4334 = vst.msk [vmem:[%s4664_s27 + $0x68] sm:$0xff] %vm373_vm2, %v4302_v26 }
 0x61b   : > { %v4562_v40 = vpop.f32.mrf.mxu1 }
 0x61c   : > { %v4203_v63 = vadd.f32 %v4562_v40, %v6777_v53 }
 0x61d   : > { %v4194_v58 = vpop.f32.mrf.mxu1 }
 0x61e   : > { %v4307_v5 = vadd.f32 %v4275_v36, %v4203_v63  ;;  %v4195_v43 = vadd.f32 %v6777_v53, %v4194_v58 }
 0x61f   : > { %v4563_v56 = vpop.f32.mrf.mxu1 }
 0x620   : > { %4339 = vst.msk [vmem:[%s4664_s27 + $0x90] sm:$0xff] %vm373_vm2, %v4307_v5  ;;  %v4305_v48 = vadd.f32 %v4273_v18, %v4195_v43  ;;  %v4206_v35 = vadd.f32 %v4563_v56, %v6777_v53 }
 0x621   : > { %v4197_v10 = vpop.f32.mrf.mxu1 }
 0x622   : > { %4337 = vst.msk [vmem:[%s4664_s27 + $0x80] sm:$0xff] %vm373_vm2, %v4305_v48  ;;  %v4308_v4 = vadd.f32 %v4276_v46, %v4206_v35  ;;  %v4198_v34 = vadd.f32 %v6777_v53, %v4197_v10 }
 0x624   : > { %4340 = vst.msk [vmem:[%s4664_s27 + $0x98] sm:$0xff] %vm373_vm2, %v4308_v4  ;;  %v4306_v11 = vadd.f32 %v4274_v6, %v4198_v34 }
 0x626   : > { %4338 = vst.msk [vmem:[%s4664_s27 + $0x88] sm:$0xff] %vm373_vm2, %v4306_v11 }
 0x643   : > { %v4566_v59 = vpop.f32.mrf.mxu1 }
 0x644   : > { %v4219_v38 = vadd.f32 %v4566_v59, %v6777_v53 }
 0x645   : > { %v4210_v12 = vpop.f32.mrf.mxu1 }
 0x646   : > { %v4311_v13 = vadd.f32 %v4279_v1, %v4219_v38  ;;  %v4211_v45 = vadd.f32 %v6777_v53, %v4210_v12 }
 0x647   : > { %v4567_v62 = vpop.f32.mrf.mxu1 }
 0x648   : > { %4343 = vst.msk [vmem:[%s4664_s27 + $0xb0] sm:$0xff] %vm373_vm2, %v4311_v13  ;;  %v4309_v15 = vadd.f32 %v4277_v61, %v4211_v45  ;;  %v4222_v9 = vadd.f32 %v4567_v62, %v6777_v53 }
 0x649   : > { %v4213_v8 = vpop.f32.mrf.mxu1 }
 0x64a   : > { %4341 = vst.msk [vmem:[%s4664_s27 + $0xa0] sm:$0xff] %vm373_vm2, %v4309_v15  ;;  %v4312_v41 = vadd.f32 %v4280_v2, %v4222_v9  ;;  %v4214_v27 = vadd.f32 %v6777_v53, %v4213_v8 }
 0x64c   : > { %4344 = vst.msk [vmem:[%s4664_s27 + $0xb8] sm:$0xff] %vm373_vm2, %v4312_v41  ;;  %v4310_v14 = vadd.f32 %v4278_v20, %v4214_v27 }
 0x64e   : > { %4342 = vst.msk [vmem:[%s4664_s27 + $0xa8] sm:$0xff] %vm373_vm2, %v4310_v14 }
 0x66f   : > { %v4570_v28 = vpop.f32.mrf.mxu1 }
 0x670   : > { %v4235_v32 = vadd.f32 %v4570_v28, %v6777_v53 }
 0x671   : > { %v4226_v19 = vpop.f32.mrf.mxu1 }
 0x672   : > { %v4315_v50 = vadd.f32 %v4283_v30, %v4235_v32  ;;  %v4227_v16 = vadd.f32 %v6777_v53, %v4226_v19 }
 0x673   : > { %v4571_v23 = vpop.f32.mrf.mxu1 }
 0x674   : > { %4347 = vst.msk [vmem:[%s4664_s27 + $0xd0] sm:$0xff] %vm373_vm2, %v4315_v50  ;;  %v4313_v33 = vadd.f32 %v4281_v54, %v4227_v16  ;;  %v4238_v57 = vadd.f32 %v4571_v23, %v6777_v53 }
 0x675   : > { %v4229_v47 = vpop.f32.mrf.mxu1 }
 0x676   : > { %4345 = vst.msk [vmem:[%s4664_s27 + $0xc0] sm:$0xff] %vm373_vm2, %v4313_v33  ;;  %v4316_v21 = vadd.f32 %v4284_v31, %v4238_v57  ;;  %v4230_v0 = vadd.f32 %v6777_v53, %v4229_v47 }
 0x678   : > { %4348 = vst.msk [vmem:[%s4664_s27 + $0xd8] sm:$0xff] %vm373_vm2, %v4316_v21  ;;  %v4314_v25 = vadd.f32 %v4282_v55, %v4230_v0 }
 0x67a   : > { %4346 = vst.msk [vmem:[%s4664_s27 + $0xc8] sm:$0xff] %vm373_vm2, %v4314_v25 }
 0x69f   : > { %v4574_v7 = vpop.f32.mrf.mxu1 }
 0x6a0   : > { %v4251_v60 = vadd.f32 %v4574_v7, %v6777_v53 }
 0x6a1   : > { %v4242_v3 = vpop.f32.mrf.mxu1 }
 0x6a2   : > { %v4319_v52 = vadd.f32 %v4287_v44, %v4251_v60  ;;  %v4243_v29 = vadd.f32 %v6777_v53, %v4242_v3 }
 0x6a3   : > { %v4575_v49 = vpop.f32.mrf.mxu1 }
 0x6a4   : > { %4351 = vst.msk [vmem:[%s4664_s27 + $0xf0] sm:$0xff] %vm373_vm2, %v4319_v52  ;;  %v4317_v39 = vadd.f32 %v4285_v42, %v4243_v29  ;;  %v4254_v51 = vadd.f32 %v4575_v49, %v6777_v53 }
 0x6a5   : > { %v4245_v37 = vpop.f32.mrf.mxu1 }
 0x6a6   : > { %4349 = vst.msk [vmem:[%s4664_s27 + $0xe0] sm:$0xff] %vm373_vm2, %v4317_v39  ;;  %v4320_v22 = vadd.f32 %v4288_v24, %v4254_v51  ;;  %v4246_v26 = vadd.f32 %v6777_v53, %v4245_v37 }
 0x6a8   : > { %4352 = vst.msk [vmem:[%s4664_s27 + $0xf8] sm:$0xff] %vm373_vm2, %v4320_v22  ;;  %v4318_v40 = vadd.f32 %v4286_v17, %v4246_v26 }
 0x6aa   : > { %4350 = vst.msk [vmem:[%s4664_s27 + $0xe8] sm:$0xff] %vm373_vm2, %v4318_v40 }
 0x6ab PF: > { %s15_s18 = sadd.s32 1, %s4607_s18  }
 0x6ac   : > { %p12_p5 = scmp.ge.s32.totalorder %s15_s18, 4  }
 0x6ae   :  { %14 = sbr.rel (!%p12_p5) target bundleno = 1 (0x1), region = 78 }

</bundles_post_ra>
